<compile_context>
chip_gen: v7x
topology: tpu7x:2x2x1
jax: 0.10.0
libtpu: 0.0.40
codegen_flags: <defaults>
</compile_context>

<pallas_src>
import jax
import jax.numpy as jnp
from jax.experimental import pallas as pl
from jax.experimental.pallas import tpu as pltpu


# ---------------------------------------------------------------------------
# helpers
# ---------------------------------------------------------------------------
def _vmem_limit_bytes():
    """Per-generation VMEM budget with headroom (v7x has only 64 MiB/TC)."""
    try:
        cap = pltpu.get_tpu_info().vmem_capacity_bytes
        return int(cap * 3 // 4)
    except Exception:  # pragma: no cover - fall back to compiler default
        return None


def _pick_row_tile(H, target=256):
    """Largest row tile <= target that divides H and is sublane friendly."""
    if H <= target:
        return H
    for th in range(min(target, H), 7, -1):
        if H % th == 0 and th % 8 == 0:
            return th
    return H


# ---------------------------------------------------------------------------
# Kernel 1: fused channel mean + channel max (the torch.cat is implicit:
#           avg -> output channel 0, max -> output channel 1)
# ---------------------------------------------------------------------------
def _channel_pool_kernel(x_ref, o_ref):
    # x_ref: (1, C, th, W)    o_ref: (1, 2, th, W)
    x = x_ref[0].astype(jnp.float32)                 # (C, th, W)
    o_ref[0, 0] = jnp.mean(x, axis=0).astype(o_ref.dtype)
    o_ref[0, 1] = jnp.max(x, axis=0).astype(o_ref.dtype)


def channel_avg_max(x):
    """(B, C, H, W) -> (B, 2, H, W) with [avg, max] over channels (f32)."""
    B, C, H, W = x.shape
    th = _pick_row_tile(H)
    return pl.pallas_call(
        _channel_pool_kernel,
        out_shape=jax.ShapeDtypeStruct((B, 2, H, W), jnp.float32),
        grid=(B, H // th),
        in_specs=[pl.BlockSpec((1, C, th, W), lambda b, i: (b, 0, i, 0))],
        out_specs=pl.BlockSpec((1, 2, th, W), lambda b, i: (b, 0, i, 0)),
        compiler_params=pltpu.CompilerParams(
            dimension_semantics=("parallel", "parallel"),
            vmem_limit_bytes=_vmem_limit_bytes(),
        ),
    )(x)


# ---------------------------------------------------------------------------
# Kernel 2: 7x7 conv (Cin=2, Cout=1, 'same' via pre-padded halo) + bias
#           + sigmoid.  Pure VPU/EUP work: 98 shifted scalar*tile FMAs.
# ---------------------------------------------------------------------------
def _conv7x7_sigmoid_kernel(xp_ref, w_ref, b_ref, o_ref):
    # xp_ref: (1, 2, H+6, W+6)  zero-padded (avg, max) planes in VMEM
    # w_ref : (2, 7, 7) f32 in SMEM      b_ref: (1,) f32 in SMEM
    # o_ref : (1, 1, H, W)
    H = o_ref.shape[2]
    W = o_ref.shape[3]
    acc = jnp.full((H, W), b_ref[0], dtype=jnp.float32)
    for c in range(2):                       # fully unrolled: 98 shifted FMAs
        for ky in range(7):
            for kx in range(7):
                tap = xp_ref[0, c, ky:ky + H, kx:kx + W]
                acc = acc + w_ref[c, ky, kx] * tap
    o_ref[0, 0] = (1.0 / (1.0 + jnp.exp(-acc))).astype(o_ref.dtype)


def conv7x7_sigmoid(xp, w, b, out_dtype):
    """xp: (B, 2, H+6, W+6) padded map; w: (2,7,7); b: (1,) -> (B,1,H,W)."""
    B, _, Hp, Wp = xp.shape
    H, W = Hp - 6, Wp - 6
    return pl.pallas_call(
        _conv7x7_sigmoid_kernel,
        out_shape=jax.ShapeDtypeStruct((B, 1, H, W), out_dtype),
        grid=(B,),
        in_specs=[
            pl.BlockSpec((1, 2, Hp, Wp), lambda b_: (b_, 0, 0, 0)),
            pl.BlockSpec(memory_space=pltpu.MemorySpace.SMEM),   # weights
            pl.BlockSpec(memory_space=pltpu.MemorySpace.SMEM),   # bias
        ],
        out_specs=pl.BlockSpec((1, 1, H, W), lambda b_: (b_, 0, 0, 0)),
        compiler_params=pltpu.CompilerParams(
            dimension_semantics=("parallel",),
            vmem_limit_bytes=_vmem_limit_bytes(),
        ),
    )(xp, w, b)


# ---------------------------------------------------------------------------
# Forward pass (mirrors SpatialAttentionModule.forward)
# ---------------------------------------------------------------------------
@jax.jit
def spatial_attention_forward(x, w, b):
    """x: (B, C, H, W) NCHW;  w: (1, 2, 7, 7) OIHW;  b: (1,) -> (B, 1, H, W)."""
    red = channel_avg_max(x)                                  # (B, 2, H, W) f32
    # 'same' padding=3 for the 7x7 conv; the padded map is only 2 channels, so
    # this glue is a negligible fraction of the bytes read from x.
    xp = jnp.pad(red, ((0, 0), (0, 0), (3, 3), (3, 3)))
    return conv7x7_sigmoid(xp, w[0].astype(jnp.float32),
                           b.astype(jnp.float32), x.dtype)


# ---------------------------------------------------------------------------
# Pure-JAX reference for correctness checking
# ---------------------------------------------------------------------------
def _reference(x, w, b):
    avg = jnp.mean(x, axis=1, keepdims=True)
    mx = jnp.max(x, axis=1, keepdims=True)
    cat = jnp.concatenate([avg, mx], axis=1)
    y = jax.lax.conv_general_dilated(
        cat, w, window_strides=(1, 1), padding=((3, 3), (3, 3)),
        dimension_numbers=("NCHW", "OIHW", "NCHW"))
    return jax.nn.sigmoid(y + b.reshape(1, -1, 1, 1))


if __name__ == "__main__":
    key = jax.random.PRNGKey(0)
    kx, kw, kb = jax.random.split(key, 3)

    B, C, H, W = 2, 4, 16, 16
    x = jax.random.normal(kx, (B, C, H, W), jnp.float32)              # NCHW
    w = 0.1 * jax.random.normal(kw, (1, 2, 7, 7), jnp.float32)        # OIHW
    b = 0.1 * jax.random.normal(kb, (1,), jnp.float32)

    y = spatial_attention_forward(x, w, b)
    y = jax.block_until_ready(y)

    assert y.shape == (B, 1, H, W)
    assert bool(jnp.all(jnp.isfinite(y)))
    y_ref = _reference(x, w, b)
    assert jnp.allclose(y, y_ref, atol=1e-5, rtol=1e-5), \
        float(jnp.max(jnp.abs(y - y_ref)))
    print("KERNEL_OK")
</pallas_src>

<mosaic_0001>
module attributes {stable_mosaic.version = 11 : i64} {
  func.func @_channel_pool_kernel(%arg0: i32, %arg1: i32, %arg2: memref<1x4x16x16xf32, #tpu.memory_space<vmem>>, %arg3: memref<1x2x16x16xf32, #tpu.memory_space<vmem>>) attributes {dimension_semantics = [#tpu.dimension_semantics<parallel>, #tpu.dimension_semantics<parallel>], iteration_bounds = array<i64: 2, 1>, scalar_prefetch = 0 : i64, scratch_operands = 0 : i64, tpu.core_type = #tpu.core_type<tc>, window_params = [{transform_indices = @transform_0, window_bounds = array<i64: 1, 4, 16, 16>}, {transform_indices = @transform_1, window_bounds = array<i64: 1, 2, 16, 16>}]} {
    %c0 = arith.constant 0 : index
    %c0_0 = arith.constant 0 : index
    %c0_1 = arith.constant 0 : index
    %c0_2 = arith.constant 0 : index
    %0 = vector.load %arg2[%c0, %c0_0, %c0_1, %c0_2] : memref<1x4x16x16xf32, #tpu.memory_space<vmem>>, vector<1x4x16x16xf32>
    %1 = vector.shape_cast %0 : vector<1x4x16x16xf32> to vector<4x16x16xf32>
    %cst = arith.constant dense<0.000000e+00> : vector<16x16xf32>
    %2 = vector.multi_reduction <add>, %1, %cst [0] : vector<4x16x16xf32> to vector<16x16xf32>
    %cst_3 = arith.constant 4.000000e+00 : f32
    %3 = vector.broadcast %cst_3 : f32 to vector<16x16xf32>
    %4 = arith.divf %2, %3 : vector<16x16xf32>
    %c0_4 = arith.constant 0 : index
    %c0_5 = arith.constant 0 : index
    %c0_6 = arith.constant 0 : index
    %c0_7 = arith.constant 0 : index
    %5 = vector.load %arg3[%c0_4, %c0_5, %c0_6, %c0_7] : memref<1x2x16x16xf32, #tpu.memory_space<vmem>>, vector<1x1x16x16xf32>
    %6 = vector.shape_cast %5 : vector<1x1x16x16xf32> to vector<16x16xf32>
    %7 = vector.shape_cast %4 : vector<16x16xf32> to vector<1x1x16x16xf32>
    tpu.vector_store %arg3[%c0_4, %c0_5, %c0_6, %c0_7], %7 {strides = array<i32>} : memref<1x2x16x16xf32, #tpu.memory_space<vmem>>, vector<1x1x16x16xf32>,
    %cst_8 = arith.constant dense<0xFF800000> : vector<16x16xf32>
    %8 = vector.multi_reduction <maximumf>, %1, %cst_8 [0] : vector<4x16x16xf32> to vector<16x16xf32>
    %c0_9 = arith.constant 0 : index
    %c1 = arith.constant 1 : index
    %c0_10 = arith.constant 0 : index
    %c0_11 = arith.constant 0 : index
    %9 = vector.load %arg3[%c0_9, %c1, %c0_10, %c0_11] : memref<1x2x16x16xf32, #tpu.memory_space<vmem>>, vector<1x1x16x16xf32>
    %10 = vector.shape_cast %9 : vector<1x1x16x16xf32> to vector<16x16xf32>
    %11 = vector.shape_cast %8 : vector<16x16xf32> to vector<1x1x16x16xf32>
    tpu.vector_store %arg3[%c0_9, %c1, %c0_10, %c0_11], %11 {strides = array<i32>} : memref<1x2x16x16xf32, #tpu.memory_space<vmem>>, vector<1x1x16x16xf32>,
    return
  }
  func.func @transform_0(%arg0: i32, %arg1: i32) -> (i32, i32, i32, i32) {
    %c0_i32 = arith.constant 0 : i32
    %c0_i32_0 = arith.constant 0 : i32
    %c0_i32_1 = arith.constant 0 : i32
    return %arg0, %c0_i32, %arg1, %c0_i32_0 : i32, i32, i32, i32
  }
  func.func @transform_1(%arg0: i32, %arg1: i32) -> (i32, i32, i32, i32) {
    %c0_i32 = arith.constant 0 : i32
    %c0_i32_0 = arith.constant 0 : i32
    %c0_i32_1 = arith.constant 0 : i32
    return %arg0, %c0_i32, %arg1, %c0_i32_0 : i32, i32, i32, i32
  }
}

module attributes {stable_mosaic.version = 11 : i64} {
  func.func @_conv7x7_sigmoid_kernel(%arg0: i32, %arg1: memref<1x2x22x22xf32, #tpu.memory_space<vmem>>, %arg2: memref<2x7x7xf32, #tpu.memory_space<smem>>, %arg3: memref<1xf32, #tpu.memory_space<smem>>, %arg4: memref<1x1x16x16xf32, #tpu.memory_space<vmem>>) attributes {dimension_semantics = [#tpu.dimension_semantics<parallel>], iteration_bounds = array<i64: 2>, scalar_prefetch = 0 : i64, scratch_operands = 0 : i64, tpu.core_type = #tpu.core_type<tc>, window_params = [{transform_indices = @transform_0, window_bounds = array<i64: 1, 2, 22, 22>}, {transform_indices = @transform_1, window_bounds = array<i64: 2, 7, 7>}, {transform_indices = @transform_2, window_bounds = array<i64: 1>}, {transform_indices = @transform_3, window_bounds = array<i64: 1, 1, 16, 16>}]} {
    %c0 = arith.constant 0 : index
    %0 = memref.load %arg3[%c0] : memref<1xf32, #tpu.memory_space<smem>>
    %1 = vector.broadcast %0 : f32 to vector<16x16xf32>
    %c0_0 = arith.constant 0 : index
    %c0_1 = arith.constant 0 : index
    %c0_2 = arith.constant 0 : index
    %c0_3 = arith.constant 0 : index
    %2 = vector.load %arg1[%c0_0, %c0_1, %c0_2, %c0_3] : memref<1x2x22x22xf32, #tpu.memory_space<vmem>>, vector<1x1x16x16xf32>
    %3 = vector.shape_cast %2 : vector<1x1x16x16xf32> to vector<16x16xf32>
    %c0_4 = arith.constant 0 : index
    %c0_5 = arith.constant 0 : index
    %c0_6 = arith.constant 0 : index
    %4 = memref.load %arg2[%c0_4, %c0_5, %c0_6] : memref<2x7x7xf32, #tpu.memory_space<smem>>
    %5 = vector.broadcast %4 : f32 to vector<16x16xf32>
    %6 = arith.mulf %5, %3 : vector<16x16xf32>
    %7 = arith.addf %1, %6 : vector<16x16xf32>
    %c0_7 = arith.constant 0 : index
    %c0_8 = arith.constant 0 : index
    %c0_9 = arith.constant 0 : index
    %c1 = arith.constant 1 : index
    %8 = vector.load %arg1[%c0_7, %c0_8, %c0_9, %c1] : memref<1x2x22x22xf32, #tpu.memory_space<vmem>>, vector<1x1x16x16xf32>
    %9 = vector.shape_cast %8 : vector<1x1x16x16xf32> to vector<16x16xf32>
    %c0_10 = arith.constant 0 : index
    %c0_11 = arith.constant 0 : index
    %c1_12 = arith.constant 1 : index
    %10 = memref.load %arg2[%c0_10, %c0_11, %c1_12] : memref<2x7x7xf32, #tpu.memory_space<smem>>
    %11 = vector.broadcast %10 : f32 to vector<16x16xf32>
    %12 = arith.mulf %11, %9 : vector<16x16xf32>
    %13 = arith.addf %7, %12 : vector<16x16xf32>
    %c0_13 = arith.constant 0 : index
    %c0_14 = arith.constant 0 : index
    %c0_15 = arith.constant 0 : index
    %c2 = arith.constant 2 : index
    %14 = vector.load %arg1[%c0_13, %c0_14, %c0_15, %c2] : memref<1x2x22x22xf32, #tpu.memory_space<vmem>>, vector<1x1x16x16xf32>
    %15 = vector.shape_cast %14 : vector<1x1x16x16xf32> to vector<16x16xf32>
    %c0_16 = arith.constant 0 : index
    %c0_17 = arith.constant 0 : index
    %c2_18 = arith.constant 2 : index
    %16 = memref.load %arg2[%c0_16, %c0_17, %c2_18] : memref<2x7x7xf32, #tpu.memory_space<smem>>
    %17 = vector.broadcast %16 : f32 to vector<16x16xf32>
    %18 = arith.mulf %17, %15 : vector<16x16xf32>
    %19 = arith.addf %13, %18 : vector<16x16xf32>
    %c0_19 = arith.constant 0 : index
    %c0_20 = arith.constant 0 : index
    %c0_21 = arith.constant 0 : index
    %c3 = arith.constant 3 : index
    %20 = vector.load %arg1[%c0_19, %c0_20, %c0_21, %c3] : memref<1x2x22x22xf32, #tpu.memory_space<vmem>>, vector<1x1x16x16xf32>
    %21 = vector.shape_cast %20 : vector<1x1x16x16xf32> to vector<16x16xf32>
    %c0_22 = arith.constant 0 : index
    %c0_23 = arith.constant 0 : index
    %c3_24 = arith.constant 3 : index
    %22 = memref.load %arg2[%c0_22, %c0_23, %c3_24] : memref<2x7x7xf32, #tpu.memory_space<smem>>
    %23 = vector.broadcast %22 : f32 to vector<16x16xf32>
    %24 = arith.mulf %23, %21 : vector<16x16xf32>
    %25 = arith.addf %19, %24 : vector<16x16xf32>
    %c0_25 = arith.constant 0 : index
    %c0_26 = arith.constant 0 : index
    %c0_27 = arith.constant 0 : index
    %c4 = arith.constant 4 : index
    %26 = vector.load %arg1[%c0_25, %c0_26, %c0_27, %c4] : memref<1x2x22x22xf32, #tpu.memory_space<vmem>>, vector<1x1x16x16xf32>
    %27 = vector.shape_cast %26 : vector<1x1x16x16xf32> to vector<16x16xf32>
    %c0_28 = arith.constant 0 : index
    %c0_29 = arith.constant 0 : index
    %c4_30 = arith.constant 4 : index
    %28 = memref.load %arg2[%c0_28, %c0_29, %c4_30] : memref<2x7x7xf32, #tpu.memory_space<smem>>
    %29 = vector.broadcast %28 : f32 to vector<16x16xf32>
    %30 = arith.mulf %29, %27 : vector<16x16xf32>
    %31 = arith.addf %25, %30 : vector<16x16xf32>
    %c0_31 = arith.constant 0 : index
    %c0_32 = arith.constant 0 : index
    %c0_33 = arith.constant 0 : index
    %c5 = arith.constant 5 : index
    %32 = vector.load %arg1[%c0_31, %c0_32, %c0_33, %c5] : memref<1x2x22x22xf32, #tpu.memory_space<vmem>>, vector<1x1x16x16xf32>
    %33 = vector.shape_cast %32 : vector<1x1x16x16xf32> to vector<16x16xf32>
    %c0_34 = arith.constant 0 : index
    %c0_35 = arith.constant 0 : index
    %c5_36 = arith.constant 5 : index
    %34 = memref.load %arg2[%c0_34, %c0_35, %c5_36] : memref<2x7x7xf32, #tpu.memory_space<smem>>
    %35 = vector.broadcast %34 : f32 to vector<16x16xf32>
    %36 = arith.mulf %35, %33 : vector<16x16xf32>
    %37 = arith.addf %31, %36 : vector<16x16xf32>
    %c0_37 = arith.constant 0 : index
    %c0_38 = arith.constant 0 : index
    %c0_39 = arith.constant 0 : index
    %c6 = arith.constant 6 : index
    %38 = vector.load %arg1[%c0_37, %c0_38, %c0_39, %c6] : memref<1x2x22x22xf32, #tpu.memory_space<vmem>>, vector<1x1x16x16xf32>
    %39 = vector.shape_cast %38 : vector<1x1x16x16xf32> to vector<16x16xf32>
    %c0_40 = arith.constant 0 : index
    %c0_41 = arith.constant 0 : index
    %c6_42 = arith.constant 6 : index
    %40 = memref.load %arg2[%c0_40, %c0_41, %c6_42] : memref<2x7x7xf32, #tpu.memory_space<smem>>
    %41 = vector.broadcast %40 : f32 to vector<16x16xf32>
    %42 = arith.mulf %41, %39 : vector<16x16xf32>
    %43 = arith.addf %37, %42 : vector<16x16xf32>
    %c0_43 = arith.constant 0 : index
    %c0_44 = arith.constant 0 : index
    %c1_45 = arith.constant 1 : index
    %c0_46 = arith.constant 0 : index
    %44 = vector.load %arg1[%c0_43, %c0_44, %c1_45, %c0_46] : memref<1x2x22x22xf32, #tpu.memory_space<vmem>>, vector<1x1x16x16xf32>
    %45 = vector.shape_cast %44 : vector<1x1x16x16xf32> to vector<16x16xf32>
    %c0_47 = arith.constant 0 : index
    %c1_48 = arith.constant 1 : index
    %c0_49 = arith.constant 0 : index
    %46 = memref.load %arg2[%c0_47, %c1_48, %c0_49] : memref<2x7x7xf32, #tpu.memory_space<smem>>
    %47 = vector.broadcast %46 : f32 to vector<16x16xf32>
    %48 = arith.mulf %47, %45 : vector<16x16xf32>
    %49 = arith.addf %43, %48 : vector<16x16xf32>
    %c0_50 = arith.constant 0 : index
    %c0_51 = arith.constant 0 : index
    %c1_52 = arith.constant 1 : index
    %c1_53 = arith.constant 1 : index
    %50 = vector.load %arg1[%c0_50, %c0_51, %c1_52, %c1_53] : memref<1x2x22x22xf32, #tpu.memory_space<vmem>>, vector<1x1x16x16xf32>
    %51 = vector.shape_cast %50 : vector<1x1x16x16xf32> to vector<16x16xf32>
    %c0_54 = arith.constant 0 : index
    %c1_55 = arith.constant 1 : index
    %c1_56 = arith.constant 1 : index
    %52 = memref.load %arg2[%c0_54, %c1_55, %c1_56] : memref<2x7x7xf32, #tpu.memory_space<smem>>
    %53 = vector.broadcast %52 : f32 to vector<16x16xf32>
    %54 = arith.mulf %53, %51 : vector<16x16xf32>
    %55 = arith.addf %49, %54 : vector<16x16xf32>
    %c0_57 = arith.constant 0 : index
    %c0_58 = arith.constant 0 : index
    %c1_59 = arith.constant 1 : index
    %c2_60 = arith.constant 2 : index
    %56 = vector.load %arg1[%c0_57, %c0_58, %c1_59, %c2_60] : memref<1x2x22x22xf32, #tpu.memory_space<vmem>>, vector<1x1x16x16xf32>
    %57 = vector.shape_cast %56 : vector<1x1x16x16xf32> to vector<16x16xf32>
    %c0_61 = arith.constant 0 : index
    %c1_62 = arith.constant 1 : index
    %c2_63 = arith.constant 2 : index
    %58 = memref.load %arg2[%c0_61, %c1_62, %c2_63] : memref<2x7x7xf32, #tpu.memory_space<smem>>
    %59 = vector.broadcast %58 : f32 to vector<16x16xf32>
    %60 = arith.mulf %59, %57 : vector<16x16xf32>
    %61 = arith.addf %55, %60 : vector<16x16xf32>
    %c0_64 = arith.constant 0 : index
    %c0_65 = arith.constant 0 : index
    %c1_66 = arith.constant 1 : index
    %c3_67 = arith.constant 3 : index
    %62 = vector.load %arg1[%c0_64, %c0_65, %c1_66, %c3_67] : memref<1x2x22x22xf32, #tpu.memory_space<vmem>>, vector<1x1x16x16xf32>
    %63 = vector.shape_cast %62 : vector<1x1x16x16xf32> to vector<16x16xf32>
    %c0_68 = arith.constant 0 : index
    %c1_69 = arith.constant 1 : index
    %c3_70 = arith.constant 3 : index
    %64 = memref.load %arg2[%c0_68, %c1_69, %c3_70] : memref<2x7x7xf32, #tpu.memory_space<smem>>
    %65 = vector.broadcast %64 : f32 to vector<16x16xf32>
    %66 = arith.mulf %65, %63 : vector<16x16xf32>
    %67 = arith.addf %61, %66 : vector<16x16xf32>
    %c0_71 = arith.constant 0 : index
    %c0_72 = arith.constant 0 : index
    %c1_73 = arith.constant 1 : index
    %c4_74 = arith.constant 4 : index
    %68 = vector.load %arg1[%c0_71, %c0_72, %c1_73, %c4_74] : memref<1x2x22x22xf32, #tpu.memory_space<vmem>>, vector<1x1x16x16xf32>
    %69 = vector.shape_cast %68 : vector<1x1x16x16xf32> to vector<16x16xf32>
    %c0_75 = arith.constant 0 : index
    %c1_76 = arith.constant 1 : index
    %c4_77 = arith.constant 4 : index
    %70 = memref.load %arg2[%c0_75, %c1_76, %c4_77] : memref<2x7x7xf32, #tpu.memory_space<smem>>
    %71 = vector.broadcast %70 : f32 to vector<16x16xf32>
    %72 = arith.mulf %71, %69 : vector<16x16xf32>
    %73 = arith.addf %67, %72 : vector<16x16xf32>
    %c0_78 = arith.constant 0 : index
    %c0_79 = arith.constant 0 : index
    %c1_80 = arith.constant 1 : index
    %c5_81 = arith.constant 5 : index
    %74 = vector.load %arg1[%c0_78, %c0_79, %c1_80, %c5_81] : memref<1x2x22x22xf32, #tpu.memory_space<vmem>>, vector<1x1x16x16xf32>
    %75 = vector.shape_cast %74 : vector<1x1x16x16xf32> to vector<16x16xf32>
    %c0_82 = arith.constant 0 : index
    %c1_83 = arith.constant 1 : index
    %c5_84 = arith.constant 5 : index
    %76 = memref.load %arg2[%c0_82, %c1_83, %c5_84] : memref<2x7x7xf32, #tpu.memory_space<smem>>
    %77 = vector.broadcast %76 : f32 to vector<16x16xf32>
    %78 = arith.mulf %77, %75 : vector<16x16xf32>
    %79 = arith.addf %73, %78 : vector<16x16xf32>
    %c0_85 = arith.constant 0 : index
    %c0_86 = arith.constant 0 : index
    %c1_87 = arith.constant 1 : index
    %c6_88 = arith.constant 6 : index
    %80 = vector.load %arg1[%c0_85, %c0_86, %c1_87, %c6_88] : memref<1x2x22x22xf32, #tpu.memory_space<vmem>>, vector<1x1x16x16xf32>
    %81 = vector.shape_cast %80 : vector<1x1x16x16xf32> to vector<16x16xf32>
    %c0_89 = arith.constant 0 : index
    %c1_90 = arith.constant 1 : index
    %c6_91 = arith.constant 6 : index
    %82 = memref.load %arg2[%c0_89, %c1_90, %c6_91] : memref<2x7x7xf32, #tpu.memory_space<smem>>
    %83 = vector.broadcast %82 : f32 to vector<16x16xf32>
    %84 = arith.mulf %83, %81 : vector<16x16xf32>
    %85 = arith.addf %79, %84 : vector<16x16xf32>
    %c0_92 = arith.constant 0 : index
    %c0_93 = arith.constant 0 : index
    %c2_94 = arith.constant 2 : index
    %c0_95 = arith.constant 0 : index
    %86 = vector.load %arg1[%c0_92, %c0_93, %c2_94, %c0_95] : memref<1x2x22x22xf32, #tpu.memory_space<vmem>>, vector<1x1x16x16xf32>
    %87 = vector.shape_cast %86 : vector<1x1x16x16xf32> to vector<16x16xf32>
    %c0_96 = arith.constant 0 : index
    %c2_97 = arith.constant 2 : index
    %c0_98 = arith.constant 0 : index
    %88 = memref.load %arg2[%c0_96, %c2_97, %c0_98] : memref<2x7x7xf32, #tpu.memory_space<smem>>
    %89 = vector.broadcast %88 : f32 to vector<16x16xf32>
    %90 = arith.mulf %89, %87 : vector<16x16xf32>
    %91 = arith.addf %85, %90 : vector<16x16xf32>
    %c0_99 = arith.constant 0 : index
    %c0_100 = arith.constant 0 : index
    %c2_101 = arith.constant 2 : index
    %c1_102 = arith.constant 1 : index
    %92 = vector.load %arg1[%c0_99, %c0_100, %c2_101, %c1_102] : memref<1x2x22x22xf32, #tpu.memory_space<vmem>>, vector<1x1x16x16xf32>
    %93 = vector.shape_cast %92 : vector<1x1x16x16xf32> to vector<16x16xf32>
    %c0_103 = arith.constant 0 : index
    %c2_104 = arith.constant 2 : index
    %c1_105 = arith.constant 1 : index
    %94 = memref.load %arg2[%c0_103, %c2_104, %c1_105] : memref<2x7x7xf32, #tpu.memory_space<smem>>
    %95 = vector.broadcast %94 : f32 to vector<16x16xf32>
    %96 = arith.mulf %95, %93 : vector<16x16xf32>
    %97 = arith.addf %91, %96 : vector<16x16xf32>
    %c0_106 = arith.constant 0 : index
    %c0_107 = arith.constant 0 : index
    %c2_108 = arith.constant 2 : index
    %c2_109 = arith.constant 2 : index
    %98 = vector.load %arg1[%c0_106, %c0_107, %c2_108, %c2_109] : memref<1x2x22x22xf32, #tpu.memory_space<vmem>>, vector<1x1x16x16xf32>
    %99 = vector.shape_cast %98 : vector<1x1x16x16xf32> to vector<16x16xf32>
    %c0_110 = arith.constant 0 : index
    %c2_111 = arith.constant 2 : index
    %c2_112 = arith.constant 2 : index
    %100 = memref.load %arg2[%c0_110, %c2_111, %c2_112] : memref<2x7x7xf32, #tpu.memory_space<smem>>
    %101 = vector.broadcast %100 : f32 to vector<16x16xf32>
    %102 = arith.mulf %101, %99 : vector<16x16xf32>
    %103 = arith.addf %97, %102 : vector<16x16xf32>
    %c0_113 = arith.constant 0 : index
    %c0_114 = arith.constant 0 : index
    %c2_115 = arith.constant 2 : index
    %c3_116 = arith.constant 3 : index
    %104 = vector.load %arg1[%c0_113, %c0_114, %c2_115, %c3_116] : memref<1x2x22x22xf32, #tpu.memory_space<vmem>>, vector<1x1x16x16xf32>
    %105 = vector.shape_cast %104 : vector<1x1x16x16xf32> to vector<16x16xf32>
    %c0_117 = arith.constant 0 : index
    %c2_118 = arith.constant 2 : index
    %c3_119 = arith.constant 3 : index
    %106 = memref.load %arg2[%c0_117, %c2_118, %c3_119] : memref<2x7x7xf32, #tpu.memory_space<smem>>
    %107 = vector.broadcast %106 : f32 to vector<16x16xf32>
    %108 = arith.mulf %107, %105 : vector<16x16xf32>
    %109 = arith.addf %103, %108 : vector<16x16xf32>
    %c0_120 = arith.constant 0 : index
    %c0_121 = arith.constant 0 : index
    %c2_122 = arith.constant 2 : index
    %c4_123 = arith.constant 4 : index
    %110 = vector.load %arg1[%c0_120, %c0_121, %c2_122, %c4_123] : memref<1x2x22x22xf32, #tpu.memory_space<vmem>>, vector<1x1x16x16xf32>
    %111 = vector.shape_cast %110 : vector<1x1x16x16xf32> to vector<16x16xf32>
    %c0_124 = arith.constant 0 : index
    %c2_125 = arith.constant 2 : index
    %c4_126 = arith.constant 4 : index
    %112 = memref.load %arg2[%c0_124, %c2_125, %c4_126] : memref<2x7x7xf32, #tpu.memory_space<smem>>
    %113 = vector.broadcast %112 : f32 to vector<16x16xf32>
    %114 = arith.mulf %113, %111 : vector<16x16xf32>
    %115 = arith.addf %109, %114 : vector<16x16xf32>
    %c0_127 = arith.constant 0 : index
    %c0_128 = arith.constant 0 : index
    %c2_129 = arith.constant 2 : index
    %c5_130 = arith.constant 5 : index
    %116 = vector.load %arg1[%c0_127, %c0_128, %c2_129, %c5_130] : memref<1x2x22x22xf32, #tpu.memory_space<vmem>>, vector<1x1x16x16xf32>
    %117 = vector.shape_cast %116 : vector<1x1x16x16xf32> to vector<16x16xf32>
    %c0_131 = arith.constant 0 : index
    %c2_132 = arith.constant 2 : index
    %c5_133 = arith.constant 5 : index
    %118 = memref.load %arg2[%c0_131, %c2_132, %c5_133] : memref<2x7x7xf32, #tpu.memory_space<smem>>
    %119 = vector.broadcast %118 : f32 to vector<16x16xf32>
    %120 = arith.mulf %119, %117 : vector<16x16xf32>
    %121 = arith.addf %115, %120 : vector<16x16xf32>
    %c0_134 = arith.constant 0 : index
    %c0_135 = arith.constant 0 : index
    %c2_136 = arith.constant 2 : index
    %c6_137 = arith.constant 6 : index
    %122 = vector.load %arg1[%c0_134, %c0_135, %c2_136, %c6_137] : memref<1x2x22x22xf32, #tpu.memory_space<vmem>>, vector<1x1x16x16xf32>
    %123 = vector.shape_cast %122 : vector<1x1x16x16xf32> to vector<16x16xf32>
    %c0_138 = arith.constant 0 : index
    %c2_139 = arith.constant 2 : index
    %c6_140 = arith.constant 6 : index
    %124 = memref.load %arg2[%c0_138, %c2_139, %c6_140] : memref<2x7x7xf32, #tpu.memory_space<smem>>
    %125 = vector.broadcast %124 : f32 to vector<16x16xf32>
    %126 = arith.mulf %125, %123 : vector<16x16xf32>
    %127 = arith.addf %121, %126 : vector<16x16xf32>
    %c0_141 = arith.constant 0 : index
    %c0_142 = arith.constant 0 : index
    %c3_143 = arith.constant 3 : index
    %c0_144 = arith.constant 0 : index
    %128 = vector.load %arg1[%c0_141, %c0_142, %c3_143, %c0_144] : memref<1x2x22x22xf32, #tpu.memory_space<vmem>>, vector<1x1x16x16xf32>
    %129 = vector.shape_cast %128 : vector<1x1x16x16xf32> to vector<16x16xf32>
    %c0_145 = arith.constant 0 : index
    %c3_146 = arith.constant 3 : index
    %c0_147 = arith.constant 0 : index
    %130 = memref.load %arg2[%c0_145, %c3_146, %c0_147] : memref<2x7x7xf32, #tpu.memory_space<smem>>
    %131 = vector.broadcast %130 : f32 to vector<16x16xf32>
    %132 = arith.mulf %131, %129 : vector<16x16xf32>
    %133 = arith.addf %127, %132 : vector<16x16xf32>
    %c0_148 = arith.constant 0 : index
    %c0_149 = arith.constant 0 : index
    %c3_150 = arith.constant 3 : index
    %c1_151 = arith.constant 1 : index
    %134 = vector.load %arg1[%c0_148, %c0_149, %c3_150, %c1_151] : memref<1x2x22x22xf32, #tpu.memory_space<vmem>>, vector<1x1x16x16xf32>
    %135 = vector.shape_cast %134 : vector<1x1x16x16xf32> to vector<16x16xf32>
    %c0_152 = arith.constant 0 : index
    %c3_153 = arith.constant 3 : index
    %c1_154 = arith.constant 1 : index
    %136 = memref.load %arg2[%c0_152, %c3_153, %c1_154] : memref<2x7x7xf32, #tpu.memory_space<smem>>
    %137 = vector.broadcast %136 : f32 to vector<16x16xf32>
    %138 = arith.mulf %137, %135 : vector<16x16xf32>
    %139 = arith.addf %133, %138 : vector<16x16xf32>
    %c0_155 = arith.constant 0 : index
    %c0_156 = arith.constant 0 : index
    %c3_157 = arith.constant 3 : index
    %c2_158 = arith.constant 2 : index
    %140 = vector.load %arg1[%c0_155, %c0_156, %c3_157, %c2_158] : memref<1x2x22x22xf32, #tpu.memory_space<vmem>>, vector<1x1x16x16xf32>
    %141 = vector.shape_cast %140 : vector<1x1x16x16xf32> to vector<16x16xf32>
    %c0_159 = arith.constant 0 : index
    %c3_160 = arith.constant 3 : index
    %c2_161 = arith.constant 2 : index
    %142 = memref.load %arg2[%c0_159, %c3_160, %c2_161] : memref<2x7x7xf32, #tpu.memory_space<smem>>
    %143 = vector.broadcast %142 : f32 to vector<16x16xf32>
    %144 = arith.mulf %143, %141 : vector<16x16xf32>
    %145 = arith.addf %139, %144 : vector<16x16xf32>
    %c0_162 = arith.constant 0 : index
    %c0_163 = arith.constant 0 : index
    %c3_164 = arith.constant 3 : index
    %c3_165 = arith.constant 3 : index
    %146 = vector.load %arg1[%c0_162, %c0_163, %c3_164, %c3_165] : memref<1x2x22x22xf32, #tpu.memory_space<vmem>>, vector<1x1x16x16xf32>
    %147 = vector.shape_cast %146 : vector<1x1x16x16xf32> to vector<16x16xf32>
    %c0_166 = arith.constant 0 : index
    %c3_167 = arith.constant 3 : index
    %c3_168 = arith.constant 3 : index
    %148 = memref.load %arg2[%c0_166, %c3_167, %c3_168] : memref<2x7x7xf32, #tpu.memory_space<smem>>
    %149 = vector.broadcast %148 : f32 to vector<16x16xf32>
    %150 = arith.mulf %149, %147 : vector<16x16xf32>
    %151 = arith.addf %145, %150 : vector<16x16xf32>
    %c0_169 = arith.constant 0 : index
    %c0_170 = arith.constant 0 : index
    %c3_171 = arith.constant 3 : index
    %c4_172 = arith.constant 4 : index
    %152 = vector.load %arg1[%c0_169, %c0_170, %c3_171, %c4_172] : memref<1x2x22x22xf32, #tpu.memory_space<vmem>>, vector<1x1x16x16xf32>
    %153 = vector.shape_cast %152 : vector<1x1x16x16xf32> to vector<16x16xf32>
    %c0_173 = arith.constant 0 : index
    %c3_174 = arith.constant 3 : index
    %c4_175 = arith.constant 4 : index
    %154 = memref.load %arg2[%c0_173, %c3_174, %c4_175] : memref<2x7x7xf32, #tpu.memory_space<smem>>
    %155 = vector.broadcast %154 : f32 to vector<16x16xf32>
    %156 = arith.mulf %155, %153 : vector<16x16xf32>
    %157 = arith.addf %151, %156 : vector<16x16xf32>
    %c0_176 = arith.constant 0 : index
    %c0_177 = arith.constant 0 : index
    %c3_178 = arith.constant 3 : index
    %c5_179 = arith.constant 5 : index
    %158 = vector.load %arg1[%c0_176, %c0_177, %c3_178, %c5_179] : memref<1x2x22x22xf32, #tpu.memory_space<vmem>>, vector<1x1x16x16xf32>
    %159 = vector.shape_cast %158 : vector<1x1x16x16xf32> to vector<16x16xf32>
    %c0_180 = arith.constant 0 : index
    %c3_181 = arith.constant 3 : index
    %c5_182 = arith.constant 5 : index
    %160 = memref.load %arg2[%c0_180, %c3_181, %c5_182] : memref<2x7x7xf32, #tpu.memory_space<smem>>
    %161 = vector.broadcast %160 : f32 to vector<16x16xf32>
    %162 = arith.mulf %161, %159 : vector<16x16xf32>
    %163 = arith.addf %157, %162 : vector<16x16xf32>
    %c0_183 = arith.constant 0 : index
    %c0_184 = arith.constant 0 : index
    %c3_185 = arith.constant 3 : index
    %c6_186 = arith.constant 6 : index
    %164 = vector.load %arg1[%c0_183, %c0_184, %c3_185, %c6_186] : memref<1x2x22x22xf32, #tpu.memory_space<vmem>>, vector<1x1x16x16xf32>
    %165 = vector.shape_cast %164 : vector<1x1x16x16xf32> to vector<16x16xf32>
    %c0_187 = arith.constant 0 : index
    %c3_188 = arith.constant 3 : index
    %c6_189 = arith.constant 6 : index
    %166 = memref.load %arg2[%c0_187, %c3_188, %c6_189] : memref<2x7x7xf32, #tpu.memory_space<smem>>
    %167 = vector.broadcast %166 : f32 to vector<16x16xf32>
    %168 = arith.mulf %167, %165 : vector<16x16xf32>
    %169 = arith.addf %163, %168 : vector<16x16xf32>
    %c0_190 = arith.constant 0 : index
    %c0_191 = arith.constant 0 : index
    %c4_192 = arith.constant 4 : index
    %c0_193 = arith.constant 0 : index
    %170 = vector.load %arg1[%c0_190, %c0_191, %c4_192, %c0_193] : memref<1x2x22x22xf32, #tpu.memory_space<vmem>>, vector<1x1x16x16xf32>
    %171 = vector.shape_cast %170 : vector<1x1x16x16xf32> to vector<16x16xf32>
    %c0_194 = arith.constant 0 : index
    %c4_195 = arith.constant 4 : index
    %c0_196 = arith.constant 0 : index
    %172 = memref.load %arg2[%c0_194, %c4_195, %c0_196] : memref<2x7x7xf32, #tpu.memory_space<smem>>
    %173 = vector.broadcast %172 : f32 to vector<16x16xf32>
    %174 = arith.mulf %173, %171 : vector<16x16xf32>
    %175 = arith.addf %169, %174 : vector<16x16xf32>
    %c0_197 = arith.constant 0 : index
    %c0_198 = arith.constant 0 : index
    %c4_199 = arith.constant 4 : index
    %c1_200 = arith.constant 1 : index
    %176 = vector.load %arg1[%c0_197, %c0_198, %c4_199, %c1_200] : memref<1x2x22x22xf32, #tpu.memory_space<vmem>>, vector<1x1x16x16xf32>
    %177 = vector.shape_cast %176 : vector<1x1x16x16xf32> to vector<16x16xf32>
    %c0_201 = arith.constant 0 : index
    %c4_202 = arith.constant 4 : index
    %c1_203 = arith.constant 1 : index
    %178 = memref.load %arg2[%c0_201, %c4_202, %c1_203] : memref<2x7x7xf32, #tpu.memory_space<smem>>
    %179 = vector.broadcast %178 : f32 to vector<16x16xf32>
    %180 = arith.mulf %179, %177 : vector<16x16xf32>
    %181 = arith.addf %175, %180 : vector<16x16xf32>
    %c0_204 = arith.constant 0 : index
    %c0_205 = arith.constant 0 : index
    %c4_206 = arith.constant 4 : index
    %c2_207 = arith.constant 2 : index
    %182 = vector.load %arg1[%c0_204, %c0_205, %c4_206, %c2_207] : memref<1x2x22x22xf32, #tpu.memory_space<vmem>>, vector<1x1x16x16xf32>
    %183 = vector.shape_cast %182 : vector<1x1x16x16xf32> to vector<16x16xf32>
    %c0_208 = arith.constant 0 : index
    %c4_209 = arith.constant 4 : index
    %c2_210 = arith.constant 2 : index
    %184 = memref.load %arg2[%c0_208, %c4_209, %c2_210] : memref<2x7x7xf32, #tpu.memory_space<smem>>
    %185 = vector.broadcast %184 : f32 to vector<16x16xf32>
    %186 = arith.mulf %185, %183 : vector<16x16xf32>
    %187 = arith.addf %181, %186 : vector<16x16xf32>
    %c0_211 = arith.constant 0 : index
    %c0_212 = arith.constant 0 : index
    %c4_213 = arith.constant 4 : index
    %c3_214 = arith.constant 3 : index
    %188 = vector.load %arg1[%c0_211, %c0_212, %c4_213, %c3_214] : memref<1x2x22x22xf32, #tpu.memory_space<vmem>>, vector<1x1x16x16xf32>
    %189 = vector.shape_cast %188 : vector<1x1x16x16xf32> to vector<16x16xf32>
    %c0_215 = arith.constant 0 : index
    %c4_216 = arith.constant 4 : index
    %c3_217 = arith.constant 3 : index
    %190 = memref.load %arg2[%c0_215, %c4_216, %c3_217] : memref<2x7x7xf32, #tpu.memory_space<smem>>
    %191 = vector.broadcast %190 : f32 to vector<16x16xf32>
    %192 = arith.mulf %191, %189 : vector<16x16xf32>
    %193 = arith.addf %187, %192 : vector<16x16xf32>
    %c0_218 = arith.constant 0 : index
    %c0_219 = arith.constant 0 : index
    %c4_220 = arith.constant 4 : index
    %c4_221 = arith.constant 4 : index
    %194 = vector.load %arg1[%c0_218, %c0_219, %c4_220, %c4_221] : memref<1x2x22x22xf32, #tpu.memory_space<vmem>>, vector<1x1x16x16xf32>
    %195 = vector.shape_cast %194 : vector<1x1x16x16xf32> to vector<16x16xf32>
    %c0_222 = arith.constant 0 : index
    %c4_223 = arith.constant 4 : index
    %c4_224 = arith.constant 4 : index
    %196 = memref.load %arg2[%c0_222, %c4_223, %c4_224] : memref<2x7x7xf32, #tpu.memory_space<smem>>
    %197 = vector.broadcast %196 : f32 to vector<16x16xf32>
    %198 = arith.mulf %197, %195 : vector<16x16xf32>
    %199 = arith.addf %193, %198 : vector<16x16xf32>
    %c0_225 = arith.constant 0 : index
    %c0_226 = arith.constant 0 : index
    %c4_227 = arith.constant 4 : index
    %c5_228 = arith.constant 5 : index
    %200 = vector.load %arg1[%c0_225, %c0_226, %c4_227, %c5_228] : memref<1x2x22x22xf32, #tpu.memory_space<vmem>>, vector<1x1x16x16xf32>
    %201 = vector.shape_cast %200 : vector<1x1x16x16xf32> to vector<16x16xf32>
    %c0_229 = arith.constant 0 : index
    %c4_230 = arith.constant 4 : index
    %c5_231 = arith.constant 5 : index
    %202 = memref.load %arg2[%c0_229, %c4_230, %c5_231] : memref<2x7x7xf32, #tpu.memory_space<smem>>
    %203 = vector.broadcast %202 : f32 to vector<16x16xf32>
    %204 = arith.mulf %203, %201 : vector<16x16xf32>
    %205 = arith.addf %199, %204 : vector<16x16xf32>
    %c0_232 = arith.constant 0 : index
    %c0_233 = arith.constant 0 : index
    %c4_234 = arith.constant 4 : index
    %c6_235 = arith.constant 6 : index
    %206 = vector.load %arg1[%c0_232, %c0_233, %c4_234, %c6_235] : memref<1x2x22x22xf32, #tpu.memory_space<vmem>>, vector<1x1x16x16xf32>
    %207 = vector.shape_cast %206 : vector<1x1x16x16xf32> to vector<16x16xf32>
    %c0_236 = arith.constant 0 : index
    %c4_237 = arith.constant 4 : index
    %c6_238 = arith.constant 6 : index
    %208 = memref.load %arg2[%c0_236, %c4_237, %c6_238] : memref<2x7x7xf32, #tpu.memory_space<smem>>
    %209 = vector.broadcast %208 : f32 to vector<16x16xf32>
    %210 = arith.mulf %209, %207 : vector<16x16xf32>
    %211 = arith.addf %205, %210 : vector<16x16xf32>
    %c0_239 = arith.constant 0 : index
    %c0_240 = arith.constant 0 : index
    %c5_241 = arith.constant 5 : index
    %c0_242 = arith.constant 0 : index
    %212 = vector.load %arg1[%c0_239, %c0_240, %c5_241, %c0_242] : memref<1x2x22x22xf32, #tpu.memory_space<vmem>>, vector<1x1x16x16xf32>
    %213 = vector.shape_cast %212 : vector<1x1x16x16xf32> to vector<16x16xf32>
    %c0_243 = arith.constant 0 : index
    %c5_244 = arith.constant 5 : index
    %c0_245 = arith.constant 0 : index
    %214 = memref.load %arg2[%c0_243, %c5_244, %c0_245] : memref<2x7x7xf32, #tpu.memory_space<smem>>
    %215 = vector.broadcast %214 : f32 to vector<16x16xf32>
    %216 = arith.mulf %215, %213 : vector<16x16xf32>
    %217 = arith.addf %211, %216 : vector<16x16xf32>
    %c0_246 = arith.constant 0 : index
    %c0_247 = arith.constant 0 : index
    %c5_248 = arith.constant 5 : index
    %c1_249 = arith.constant 1 : index
    %218 = vector.load %arg1[%c0_246, %c0_247, %c5_248, %c1_249] : memref<1x2x22x22xf32, #tpu.memory_space<vmem>>, vector<1x1x16x16xf32>
    %219 = vector.shape_cast %218 : vector<1x1x16x16xf32> to vector<16x16xf32>
    %c0_250 = arith.constant 0 : index
    %c5_251 = arith.constant 5 : index
    %c1_252 = arith.constant 1 : index
    %220 = memref.load %arg2[%c0_250, %c5_251, %c1_252] : memref<2x7x7xf32, #tpu.memory_space<smem>>
    %221 = vector.broadcast %220 : f32 to vector<16x16xf32>
    %222 = arith.mulf %221, %219 : vector<16x16xf32>
    %223 = arith.addf %217, %222 : vector<16x16xf32>
    %c0_253 = arith.constant 0 : index
    %c0_254 = arith.constant 0 : index
    %c5_255 = arith.constant 5 : index
    %c2_256 = arith.constant 2 : index
    %224 = vector.load %arg1[%c0_253, %c0_254, %c5_255, %c2_256] : memref<1x2x22x22xf32, #tpu.memory_space<vmem>>, vector<1x1x16x16xf32>
    %225 = vector.shape_cast %224 : vector<1x1x16x16xf32> to vector<16x16xf32>
    %c0_257 = arith.constant 0 : index
    %c5_258 = arith.constant 5 : index
    %c2_259 = arith.constant 2 : index
    %226 = memref.load %arg2[%c0_257, %c5_258, %c2_259] : memref<2x7x7xf32, #tpu.memory_space<smem>>
    %227 = vector.broadcast %226 : f32 to vector<16x16xf32>
    %228 = arith.mulf %227, %225 : vector<16x16xf32>
    %229 = arith.addf %223, %228 : vector<16x16xf32>
    %c0_260 = arith.constant 0 : index
    %c0_261 = arith.constant 0 : index
    %c5_262 = arith.constant 5 : index
    %c3_263 = arith.constant 3 : index
    %230 = vector.load %arg1[%c0_260, %c0_261, %c5_262, %c3_263] : memref<1x2x22x22xf32, #tpu.memory_space<vmem>>, vector<1x1x16x16xf32>
    %231 = vector.shape_cast %230 : vector<1x1x16x16xf32> to vector<16x16xf32>
    %c0_264 = arith.constant 0 : index
    %c5_265 = arith.constant 5 : index
    %c3_266 = arith.constant 3 : index
    %232 = memref.load %arg2[%c0_264, %c5_265, %c3_266] : memref<2x7x7xf32, #tpu.memory_space<smem>>
    %233 = vector.broadcast %232 : f32 to vector<16x16xf32>
    %234 = arith.mulf %233, %231 : vector<16x16xf32>
    %235 = arith.addf %229, %234 : vector<16x16xf32>
    %c0_267 = arith.constant 0 : index
    %c0_268 = arith.constant 0 : index
    %c5_269 = arith.constant 5 : index
    %c4_270 = arith.constant 4 : index
    %236 = vector.load %arg1[%c0_267, %c0_268, %c5_269, %c4_270] : memref<1x2x22x22xf32, #tpu.memory_space<vmem>>, vector<1x1x16x16xf32>
    %237 = vector.shape_cast %236 : vector<1x1x16x16xf32> to vector<16x16xf32>
    %c0_271 = arith.constant 0 : index
    %c5_272 = arith.constant 5 : index
    %c4_273 = arith.constant 4 : index
    %238 = memref.load %arg2[%c0_271, %c5_272, %c4_273] : memref<2x7x7xf32, #tpu.memory_space<smem>>
    %239 = vector.broadcast %238 : f32 to vector<16x16xf32>
    %240 = arith.mulf %239, %237 : vector<16x16xf32>
    %241 = arith.addf %235, %240 : vector<16x16xf32>
    %c0_274 = arith.constant 0 : index
    %c0_275 = arith.constant 0 : index
    %c5_276 = arith.constant 5 : index
    %c5_277 = arith.constant 5 : index
    %242 = vector.load %arg1[%c0_274, %c0_275, %c5_276, %c5_277] : memref<1x2x22x22xf32, #tpu.memory_space<vmem>>, vector<1x1x16x16xf32>
    %243 = vector.shape_cast %242 : vector<1x1x16x16xf32> to vector<16x16xf32>
    %c0_278 = arith.constant 0 : index
    %c5_279 = arith.constant 5 : index
    %c5_280 = arith.constant 5 : index
    %244 = memref.load %arg2[%c0_278, %c5_279, %c5_280] : memref<2x7x7xf32, #tpu.memory_space<smem>>
    %245 = vector.broadcast %244 : f32 to vector<16x16xf32>
    %246 = arith.mulf %245, %243 : vector<16x16xf32>
    %247 = arith.addf %241, %246 : vector<16x16xf32>
    %c0_281 = arith.constant 0 : index
    %c0_282 = arith.constant 0 : index
    %c5_283 = arith.constant 5 : index
    %c6_284 = arith.constant 6 : index
    %248 = vector.load %arg1[%c0_281, %c0_282, %c5_283, %c6_284] : memref<1x2x22x22xf32, #tpu.memory_space<vmem>>, vector<1x1x16x16xf32>
    %249 = vector.shape_cast %248 : vector<1x1x16x16xf32> to vector<16x16xf32>
    %c0_285 = arith.constant 0 : index
    %c5_286 = arith.constant 5 : index
    %c6_287 = arith.constant 6 : index
    %250 = memref.load %arg2[%c0_285, %c5_286, %c6_287] : memref<2x7x7xf32, #tpu.memory_space<smem>>
    %251 = vector.broadcast %250 : f32 to vector<16x16xf32>
    %252 = arith.mulf %251, %249 : vector<16x16xf32>
    %253 = arith.addf %247, %252 : vector<16x16xf32>
    %c0_288 = arith.constant 0 : index
    %c0_289 = arith.constant 0 : index
    %c6_290 = arith.constant 6 : index
    %c0_291 = arith.constant 0 : index
    %254 = vector.load %arg1[%c0_288, %c0_289, %c6_290, %c0_291] : memref<1x2x22x22xf32, #tpu.memory_space<vmem>>, vector<1x1x16x16xf32>
    %255 = vector.shape_cast %254 : vector<1x1x16x16xf32> to vector<16x16xf32>
    %c0_292 = arith.constant 0 : index
    %c6_293 = arith.constant 6 : index
    %c0_294 = arith.constant 0 : index
    %256 = memref.load %arg2[%c0_292, %c6_293, %c0_294] : memref<2x7x7xf32, #tpu.memory_space<smem>>
    %257 = vector.broadcast %256 : f32 to vector<16x16xf32>
    %258 = arith.mulf %257, %255 : vector<16x16xf32>
    %259 = arith.addf %253, %258 : vector<16x16xf32>
    %c0_295 = arith.constant 0 : index
    %c0_296 = arith.constant 0 : index
    %c6_297 = arith.constant 6 : index
    %c1_298 = arith.constant 1 : index
    %260 = vector.load %arg1[%c0_295, %c0_296, %c6_297, %c1_298] : memref<1x2x22x22xf32, #tpu.memory_space<vmem>>, vector<1x1x16x16xf32>
    %261 = vector.shape_cast %260 : vector<1x1x16x16xf32> to vector<16x16xf32>
    %c0_299 = arith.constant 0 : index
    %c6_300 = arith.constant 6 : index
    %c1_301 = arith.constant 1 : index
    %262 = memref.load %arg2[%c0_299, %c6_300, %c1_301] : memref<2x7x7xf32, #tpu.memory_space<smem>>
    %263 = vector.broadcast %262 : f32 to vector<16x16xf32>
    %264 = arith.mulf %263, %261 : vector<16x16xf32>
    %265 = arith.addf %259, %264 : vector<16x16xf32>
    %c0_302 = arith.constant 0 : index
    %c0_303 = arith.constant 0 : index
    %c6_304 = arith.constant 6 : index
    %c2_305 = arith.constant 2 : index
    %266 = vector.load %arg1[%c0_302, %c0_303, %c6_304, %c2_305] : memref<1x2x22x22xf32, #tpu.memory_space<vmem>>, vector<1x1x16x16xf32>
    %267 = vector.shape_cast %266 : vector<1x1x16x16xf32> to vector<16x16xf32>
    %c0_306 = arith.constant 0 : index
    %c6_307 = arith.constant 6 : index
    %c2_308 = arith.constant 2 : index
    %268 = memref.load %arg2[%c0_306, %c6_307, %c2_308] : memref<2x7x7xf32, #tpu.memory_space<smem>>
    %269 = vector.broadcast %268 : f32 to vector<16x16xf32>
    %270 = arith.mulf %269, %267 : vector<16x16xf32>
    %271 = arith.addf %265, %270 : vector<16x16xf32>
    %c0_309 = arith.constant 0 : index
    %c0_310 = arith.constant 0 : index
    %c6_311 = arith.constant 6 : index
    %c3_312 = arith.constant 3 : index
    %272 = vector.load %arg1[%c0_309, %c0_310, %c6_311, %c3_312] : memref<1x2x22x22xf32, #tpu.memory_space<vmem>>, vector<1x1x16x16xf32>
    %273 = vector.shape_cast %272 : vector<1x1x16x16xf32> to vector<16x16xf32>
    %c0_313 = arith.constant 0 : index
    %c6_314 = arith.constant 6 : index
    %c3_315 = arith.constant 3 : index
    %274 = memref.load %arg2[%c0_313, %c6_314, %c3_315] : memref<2x7x7xf32, #tpu.memory_space<smem>>
    %275 = vector.broadcast %274 : f32 to vector<16x16xf32>
    %276 = arith.mulf %275, %273 : vector<16x16xf32>
    %277 = arith.addf %271, %276 : vector<16x16xf32>
    %c0_316 = arith.constant 0 : index
    %c0_317 = arith.constant 0 : index
    %c6_318 = arith.constant 6 : index
    %c4_319 = arith.constant 4 : index
    %278 = vector.load %arg1[%c0_316, %c0_317, %c6_318, %c4_319] : memref<1x2x22x22xf32, #tpu.memory_space<vmem>>, vector<1x1x16x16xf32>
    %279 = vector.shape_cast %278 : vector<1x1x16x16xf32> to vector<16x16xf32>
    %c0_320 = arith.constant 0 : index
    %c6_321 = arith.constant 6 : index
    %c4_322 = arith.constant 4 : index
    %280 = memref.load %arg2[%c0_320, %c6_321, %c4_322] : memref<2x7x7xf32, #tpu.memory_space<smem>>
    %281 = vector.broadcast %280 : f32 to vector<16x16xf32>
    %282 = arith.mulf %281, %279 : vector<16x16xf32>
    %283 = arith.addf %277, %282 : vector<16x16xf32>
    %c0_323 = arith.constant 0 : index
    %c0_324 = arith.constant 0 : index
    %c6_325 = arith.constant 6 : index
    %c5_326 = arith.constant 5 : index
    %284 = vector.load %arg1[%c0_323, %c0_324, %c6_325, %c5_326] : memref<1x2x22x22xf32, #tpu.memory_space<vmem>>, vector<1x1x16x16xf32>
    %285 = vector.shape_cast %284 : vector<1x1x16x16xf32> to vector<16x16xf32>
    %c0_327 = arith.constant 0 : index
    %c6_328 = arith.constant 6 : index
    %c5_329 = arith.constant 5 : index
    %286 = memref.load %arg2[%c0_327, %c6_328, %c5_329] : memref<2x7x7xf32, #tpu.memory_space<smem>>
    %287 = vector.broadcast %286 : f32 to vector<16x16xf32>
    %288 = arith.mulf %287, %285 : vector<16x16xf32>
    %289 = arith.addf %283, %288 : vector<16x16xf32>
    %c0_330 = arith.constant 0 : index
    %c0_331 = arith.constant 0 : index
    %c6_332 = arith.constant 6 : index
    %c6_333 = arith.constant 6 : index
    %290 = vector.load %arg1[%c0_330, %c0_331, %c6_332, %c6_333] : memref<1x2x22x22xf32, #tpu.memory_space<vmem>>, vector<1x1x16x16xf32>
    %291 = vector.shape_cast %290 : vector<1x1x16x16xf32> to vector<16x16xf32>
    %c0_334 = arith.constant 0 : index
    %c6_335 = arith.constant 6 : index
    %c6_336 = arith.constant 6 : index
    %292 = memref.load %arg2[%c0_334, %c6_335, %c6_336] : memref<2x7x7xf32, #tpu.memory_space<smem>>
    %293 = vector.broadcast %292 : f32 to vector<16x16xf32>
    %294 = arith.mulf %293, %291 : vector<16x16xf32>
    %295 = arith.addf %289, %294 : vector<16x16xf32>
    %c0_337 = arith.constant 0 : index
    %c1_338 = arith.constant 1 : index
    %c0_339 = arith.constant 0 : index
    %c0_340 = arith.constant 0 : index
    %296 = vector.load %arg1[%c0_337, %c1_338, %c0_339, %c0_340] : memref<1x2x22x22xf32, #tpu.memory_space<vmem>>, vector<1x1x16x16xf32>
    %297 = vector.shape_cast %296 : vector<1x1x16x16xf32> to vector<16x16xf32>
    %c1_341 = arith.constant 1 : index
    %c0_342 = arith.constant 0 : index
    %c0_343 = arith.constant 0 : index
    %298 = memref.load %arg2[%c1_341, %c0_342, %c0_343] : memref<2x7x7xf32, #tpu.memory_space<smem>>
    %299 = vector.broadcast %298 : f32 to vector<16x16xf32>
    %300 = arith.mulf %299, %297 : vector<16x16xf32>
    %301 = arith.addf %295, %300 : vector<16x16xf32>
    %c0_344 = arith.constant 0 : index
    %c1_345 = arith.constant 1 : index
    %c0_346 = arith.constant 0 : index
    %c1_347 = arith.constant 1 : index
    %302 = vector.load %arg1[%c0_344, %c1_345, %c0_346, %c1_347] : memref<1x2x22x22xf32, #tpu.memory_space<vmem>>, vector<1x1x16x16xf32>
    %303 = vector.shape_cast %302 : vector<1x1x16x16xf32> to vector<16x16xf32>
    %c1_348 = arith.constant 1 : index
    %c0_349 = arith.constant 0 : index
    %c1_350 = arith.constant 1 : index
    %304 = memref.load %arg2[%c1_348, %c0_349, %c1_350] : memref<2x7x7xf32, #tpu.memory_space<smem>>
    %305 = vector.broadcast %304 : f32 to vector<16x16xf32>
    %306 = arith.mulf %305, %303 : vector<16x16xf32>
    %307 = arith.addf %301, %306 : vector<16x16xf32>
    %c0_351 = arith.constant 0 : index
    %c1_352 = arith.constant 1 : index
    %c0_353 = arith.constant 0 : index
    %c2_354 = arith.constant 2 : index
    %308 = vector.load %arg1[%c0_351, %c1_352, %c0_353, %c2_354] : memref<1x2x22x22xf32, #tpu.memory_space<vmem>>, vector<1x1x16x16xf32>
    %309 = vector.shape_cast %308 : vector<1x1x16x16xf32> to vector<16x16xf32>
    %c1_355 = arith.constant 1 : index
    %c0_356 = arith.constant 0 : index
    %c2_357 = arith.constant 2 : index
    %310 = memref.load %arg2[%c1_355, %c0_356, %c2_357] : memref<2x7x7xf32, #tpu.memory_space<smem>>
    %311 = vector.broadcast %310 : f32 to vector<16x16xf32>
    %312 = arith.mulf %311, %309 : vector<16x16xf32>
    %313 = arith.addf %307, %312 : vector<16x16xf32>
    %c0_358 = arith.constant 0 : index
    %c1_359 = arith.constant 1 : index
    %c0_360 = arith.constant 0 : index
    %c3_361 = arith.constant 3 : index
    %314 = vector.load %arg1[%c0_358, %c1_359, %c0_360, %c3_361] : memref<1x2x22x22xf32, #tpu.memory_space<vmem>>, vector<1x1x16x16xf32>
    %315 = vector.shape_cast %314 : vector<1x1x16x16xf32> to vector<16x16xf32>
    %c1_362 = arith.constant 1 : index
    %c0_363 = arith.constant 0 : index
    %c3_364 = arith.constant 3 : index
    %316 = memref.load %arg2[%c1_362, %c0_363, %c3_364] : memref<2x7x7xf32, #tpu.memory_space<smem>>
    %317 = vector.broadcast %316 : f32 to vector<16x16xf32>
    %318 = arith.mulf %317, %315 : vector<16x16xf32>
    %319 = arith.addf %313, %318 : vector<16x16xf32>
    %c0_365 = arith.constant 0 : index
    %c1_366 = arith.constant 1 : index
    %c0_367 = arith.constant 0 : index
    %c4_368 = arith.constant 4 : index
    %320 = vector.load %arg1[%c0_365, %c1_366, %c0_367, %c4_368] : memref<1x2x22x22xf32, #tpu.memory_space<vmem>>, vector<1x1x16x16xf32>
    %321 = vector.shape_cast %320 : vector<1x1x16x16xf32> to vector<16x16xf32>
    %c1_369 = arith.constant 1 : index
    %c0_370 = arith.constant 0 : index
    %c4_371 = arith.constant 4 : index
    %322 = memref.load %arg2[%c1_369, %c0_370, %c4_371] : memref<2x7x7xf32, #tpu.memory_space<smem>>
    %323 = vector.broadcast %322 : f32 to vector<16x16xf32>
    %324 = arith.mulf %323, %321 : vector<16x16xf32>
    %325 = arith.addf %319, %324 : vector<16x16xf32>
    %c0_372 = arith.constant 0 : index
    %c1_373 = arith.constant 1 : index
    %c0_374 = arith.constant 0 : index
    %c5_375 = arith.constant 5 : index
    %326 = vector.load %arg1[%c0_372, %c1_373, %c0_374, %c5_375] : memref<1x2x22x22xf32, #tpu.memory_space<vmem>>, vector<1x1x16x16xf32>
    %327 = vector.shape_cast %326 : vector<1x1x16x16xf32> to vector<16x16xf32>
    %c1_376 = arith.constant 1 : index
    %c0_377 = arith.constant 0 : index
    %c5_378 = arith.constant 5 : index
    %328 = memref.load %arg2[%c1_376, %c0_377, %c5_378] : memref<2x7x7xf32, #tpu.memory_space<smem>>
    %329 = vector.broadcast %328 : f32 to vector<16x16xf32>
    %330 = arith.mulf %329, %327 : vector<16x16xf32>
    %331 = arith.addf %325, %330 : vector<16x16xf32>
    %c0_379 = arith.constant 0 : index
    %c1_380 = arith.constant 1 : index
    %c0_381 = arith.constant 0 : index
    %c6_382 = arith.constant 6 : index
    %332 = vector.load %arg1[%c0_379, %c1_380, %c0_381, %c6_382] : memref<1x2x22x22xf32, #tpu.memory_space<vmem>>, vector<1x1x16x16xf32>
    %333 = vector.shape_cast %332 : vector<1x1x16x16xf32> to vector<16x16xf32>
    %c1_383 = arith.constant 1 : index
    %c0_384 = arith.constant 0 : index
    %c6_385 = arith.constant 6 : index
    %334 = memref.load %arg2[%c1_383, %c0_384, %c6_385] : memref<2x7x7xf32, #tpu.memory_space<smem>>
    %335 = vector.broadcast %334 : f32 to vector<16x16xf32>
    %336 = arith.mulf %335, %333 : vector<16x16xf32>
    %337 = arith.addf %331, %336 : vector<16x16xf32>
    %c0_386 = arith.constant 0 : index
    %c1_387 = arith.constant 1 : index
    %c1_388 = arith.constant 1 : index
    %c0_389 = arith.constant 0 : index
    %338 = vector.load %arg1[%c0_386, %c1_387, %c1_388, %c0_389] : memref<1x2x22x22xf32, #tpu.memory_space<vmem>>, vector<1x1x16x16xf32>
    %339 = vector.shape_cast %338 : vector<1x1x16x16xf32> to vector<16x16xf32>
    %c1_390 = arith.constant 1 : index
    %c1_391 = arith.constant 1 : index
    %c0_392 = arith.constant 0 : index
    %340 = memref.load %arg2[%c1_390, %c1_391, %c0_392] : memref<2x7x7xf32, #tpu.memory_space<smem>>
    %341 = vector.broadcast %340 : f32 to vector<16x16xf32>
    %342 = arith.mulf %341, %339 : vector<16x16xf32>
    %343 = arith.addf %337, %342 : vector<16x16xf32>
    %c0_393 = arith.constant 0 : index
    %c1_394 = arith.constant 1 : index
    %c1_395 = arith.constant 1 : index
    %c1_396 = arith.constant 1 : index
    %344 = vector.load %arg1[%c0_393, %c1_394, %c1_395, %c1_396] : memref<1x2x22x22xf32, #tpu.memory_space<vmem>>, vector<1x1x16x16xf32>
    %345 = vector.shape_cast %344 : vector<1x1x16x16xf32> to vector<16x16xf32>
    %c1_397 = arith.constant 1 : index
    %c1_398 = arith.constant 1 : index
    %c1_399 = arith.constant 1 : index
    %346 = memref.load %arg2[%c1_397, %c1_398, %c1_399] : memref<2x7x7xf32, #tpu.memory_space<smem>>
    %347 = vector.broadcast %346 : f32 to vector<16x16xf32>
    %348 = arith.mulf %347, %345 : vector<16x16xf32>
    %349 = arith.addf %343, %348 : vector<16x16xf32>
    %c0_400 = arith.constant 0 : index
    %c1_401 = arith.constant 1 : index
    %c1_402 = arith.constant 1 : index
    %c2_403 = arith.constant 2 : index
    %350 = vector.load %arg1[%c0_400, %c1_401, %c1_402, %c2_403] : memref<1x2x22x22xf32, #tpu.memory_space<vmem>>, vector<1x1x16x16xf32>
    %351 = vector.shape_cast %350 : vector<1x1x16x16xf32> to vector<16x16xf32>
    %c1_404 = arith.constant 1 : index
    %c1_405 = arith.constant 1 : index
    %c2_406 = arith.constant 2 : index
    %352 = memref.load %arg2[%c1_404, %c1_405, %c2_406] : memref<2x7x7xf32, #tpu.memory_space<smem>>
    %353 = vector.broadcast %352 : f32 to vector<16x16xf32>
    %354 = arith.mulf %353, %351 : vector<16x16xf32>
    %355 = arith.addf %349, %354 : vector<16x16xf32>
    %c0_407 = arith.constant 0 : index
    %c1_408 = arith.constant 1 : index
    %c1_409 = arith.constant 1 : index
    %c3_410 = arith.constant 3 : index
    %356 = vector.load %arg1[%c0_407, %c1_408, %c1_409, %c3_410] : memref<1x2x22x22xf32, #tpu.memory_space<vmem>>, vector<1x1x16x16xf32>
    %357 = vector.shape_cast %356 : vector<1x1x16x16xf32> to vector<16x16xf32>
    %c1_411 = arith.constant 1 : index
    %c1_412 = arith.constant 1 : index
    %c3_413 = arith.constant 3 : index
    %358 = memref.load %arg2[%c1_411, %c1_412, %c3_413] : memref<2x7x7xf32, #tpu.memory_space<smem>>
    %359 = vector.broadcast %358 : f32 to vector<16x16xf32>
    %360 = arith.mulf %359, %357 : vector<16x16xf32>
    %361 = arith.addf %355, %360 : vector<16x16xf32>
    %c0_414 = arith.constant 0 : index
    %c1_415 = arith.constant 1 : index
    %c1_416 = arith.constant 1 : index
    %c4_417 = arith.constant 4 : index
    %362 = vector.load %arg1[%c0_414, %c1_415, %c1_416, %c4_417] : memref<1x2x22x22xf32, #tpu.memory_space<vmem>>, vector<1x1x16x16xf32>
    %363 = vector.shape_cast %362 : vector<1x1x16x16xf32> to vector<16x16xf32>
    %c1_418 = arith.constant 1 : index
    %c1_419 = arith.constant 1 : index
    %c4_420 = arith.constant 4 : index
    %364 = memref.load %arg2[%c1_418, %c1_419, %c4_420] : memref<2x7x7xf32, #tpu.memory_space<smem>>
    %365 = vector.broadcast %364 : f32 to vector<16x16xf32>
    %366 = arith.mulf %365, %363 : vector<16x16xf32>
    %367 = arith.addf %361, %366 : vector<16x16xf32>
    %c0_421 = arith.constant 0 : index
    %c1_422 = arith.constant 1 : index
    %c1_423 = arith.constant 1 : index
    %c5_424 = arith.constant 5 : index
    %368 = vector.load %arg1[%c0_421, %c1_422, %c1_423, %c5_424] : memref<1x2x22x22xf32, #tpu.memory_space<vmem>>, vector<1x1x16x16xf32>
    %369 = vector.shape_cast %368 : vector<1x1x16x16xf32> to vector<16x16xf32>
    %c1_425 = arith.constant 1 : index
    %c1_426 = arith.constant 1 : index
    %c5_427 = arith.constant 5 : index
    %370 = memref.load %arg2[%c1_425, %c1_426, %c5_427] : memref<2x7x7xf32, #tpu.memory_space<smem>>
    %371 = vector.broadcast %370 : f32 to vector<16x16xf32>
    %372 = arith.mulf %371, %369 : vector<16x16xf32>
    %373 = arith.addf %367, %372 : vector<16x16xf32>
    %c0_428 = arith.constant 0 : index
    %c1_429 = arith.constant 1 : index
    %c1_430 = arith.constant 1 : index
    %c6_431 = arith.constant 6 : index
    %374 = vector.load %arg1[%c0_428, %c1_429, %c1_430, %c6_431] : memref<1x2x22x22xf32, #tpu.memory_space<vmem>>, vector<1x1x16x16xf32>
    %375 = vector.shape_cast %374 : vector<1x1x16x16xf32> to vector<16x16xf32>
    %c1_432 = arith.constant 1 : index
    %c1_433 = arith.constant 1 : index
    %c6_434 = arith.constant 6 : index
    %376 = memref.load %arg2[%c1_432, %c1_433, %c6_434] : memref<2x7x7xf32, #tpu.memory_space<smem>>
    %377 = vector.broadcast %376 : f32 to vector<16x16xf32>
    %378 = arith.mulf %377, %375 : vector<16x16xf32>
    %379 = arith.addf %373, %378 : vector<16x16xf32>
    %c0_435 = arith.constant 0 : index
    %c1_436 = arith.constant 1 : index
    %c2_437 = arith.constant 2 : index
    %c0_438 = arith.constant 0 : index
    %380 = vector.load %arg1[%c0_435, %c1_436, %c2_437, %c0_438] : memref<1x2x22x22xf32, #tpu.memory_space<vmem>>, vector<1x1x16x16xf32>
    %381 = vector.shape_cast %380 : vector<1x1x16x16xf32> to vector<16x16xf32>
    %c1_439 = arith.constant 1 : index
    %c2_440 = arith.constant 2 : index
    %c0_441 = arith.constant 0 : index
    %382 = memref.load %arg2[%c1_439, %c2_440, %c0_441] : memref<2x7x7xf32, #tpu.memory_space<smem>>
    %383 = vector.broadcast %382 : f32 to vector<16x16xf32>
    %384 = arith.mulf %383, %381 : vector<16x16xf32>
    %385 = arith.addf %379, %384 : vector<16x16xf32>
    %c0_442 = arith.constant 0 : index
    %c1_443 = arith.constant 1 : index
    %c2_444 = arith.constant 2 : index
    %c1_445 = arith.constant 1 : index
    %386 = vector.load %arg1[%c0_442, %c1_443, %c2_444, %c1_445] : memref<1x2x22x22xf32, #tpu.memory_space<vmem>>, vector<1x1x16x16xf32>
    %387 = vector.shape_cast %386 : vector<1x1x16x16xf32> to vector<16x16xf32>
    %c1_446 = arith.constant 1 : index
    %c2_447 = arith.constant 2 : index
    %c1_448 = arith.constant 1 : index
    %388 = memref.load %arg2[%c1_446, %c2_447, %c1_448] : memref<2x7x7xf32, #tpu.memory_space<smem>>
    %389 = vector.broadcast %388 : f32 to vector<16x16xf32>
    %390 = arith.mulf %389, %387 : vector<16x16xf32>
    %391 = arith.addf %385, %390 : vector<16x16xf32>
    %c0_449 = arith.constant 0 : index
    %c1_450 = arith.constant 1 : index
    %c2_451 = arith.constant 2 : index
    %c2_452 = arith.constant 2 : index
    %392 = vector.load %arg1[%c0_449, %c1_450, %c2_451, %c2_452] : memref<1x2x22x22xf32, #tpu.memory_space<vmem>>, vector<1x1x16x16xf32>
    %393 = vector.shape_cast %392 : vector<1x1x16x16xf32> to vector<16x16xf32>
    %c1_453 = arith.constant 1 : index
    %c2_454 = arith.constant 2 : index
    %c2_455 = arith.constant 2 : index
    %394 = memref.load %arg2[%c1_453, %c2_454, %c2_455] : memref<2x7x7xf32, #tpu.memory_space<smem>>
    %395 = vector.broadcast %394 : f32 to vector<16x16xf32>
    %396 = arith.mulf %395, %393 : vector<16x16xf32>
    %397 = arith.addf %391, %396 : vector<16x16xf32>
    %c0_456 = arith.constant 0 : index
    %c1_457 = arith.constant 1 : index
    %c2_458 = arith.constant 2 : index
    %c3_459 = arith.constant 3 : index
    %398 = vector.load %arg1[%c0_456, %c1_457, %c2_458, %c3_459] : memref<1x2x22x22xf32, #tpu.memory_space<vmem>>, vector<1x1x16x16xf32>
    %399 = vector.shape_cast %398 : vector<1x1x16x16xf32> to vector<16x16xf32>
    %c1_460 = arith.constant 1 : index
    %c2_461 = arith.constant 2 : index
    %c3_462 = arith.constant 3 : index
    %400 = memref.load %arg2[%c1_460, %c2_461, %c3_462] : memref<2x7x7xf32, #tpu.memory_space<smem>>
    %401 = vector.broadcast %400 : f32 to vector<16x16xf32>
    %402 = arith.mulf %401, %399 : vector<16x16xf32>
    %403 = arith.addf %397, %402 : vector<16x16xf32>
    %c0_463 = arith.constant 0 : index
    %c1_464 = arith.constant 1 : index
    %c2_465 = arith.constant 2 : index
    %c4_466 = arith.constant 4 : index
    %404 = vector.load %arg1[%c0_463, %c1_464, %c2_465, %c4_466] : memref<1x2x22x22xf32, #tpu.memory_space<vmem>>, vector<1x1x16x16xf32>
    %405 = vector.shape_cast %404 : vector<1x1x16x16xf32> to vector<16x16xf32>
    %c1_467 = arith.constant 1 : index
    %c2_468 = arith.constant 2 : index
    %c4_469 = arith.constant 4 : index
    %406 = memref.load %arg2[%c1_467, %c2_468, %c4_469] : memref<2x7x7xf32, #tpu.memory_space<smem>>
    %407 = vector.broadcast %406 : f32 to vector<16x16xf32>
    %408 = arith.mulf %407, %405 : vector<16x16xf32>
    %409 = arith.addf %403, %408 : vector<16x16xf32>
    %c0_470 = arith.constant 0 : index
    %c1_471 = arith.constant 1 : index
    %c2_472 = arith.constant 2 : index
    %c5_473 = arith.constant 5 : index
    %410 = vector.load %arg1[%c0_470, %c1_471, %c2_472, %c5_473] : memref<1x2x22x22xf32, #tpu.memory_space<vmem>>, vector<1x1x16x16xf32>
    %411 = vector.shape_cast %410 : vector<1x1x16x16xf32> to vector<16x16xf32>
    %c1_474 = arith.constant 1 : index
    %c2_475 = arith.constant 2 : index
    %c5_476 = arith.constant 5 : index
    %412 = memref.load %arg2[%c1_474, %c2_475, %c5_476] : memref<2x7x7xf32, #tpu.memory_space<smem>>
    %413 = vector.broadcast %412 : f32 to vector<16x16xf32>
    %414 = arith.mulf %413, %411 : vector<16x16xf32>
    %415 = arith.addf %409, %414 : vector<16x16xf32>
    %c0_477 = arith.constant 0 : index
    %c1_478 = arith.constant 1 : index
    %c2_479 = arith.constant 2 : index
    %c6_480 = arith.constant 6 : index
    %416 = vector.load %arg1[%c0_477, %c1_478, %c2_479, %c6_480] : memref<1x2x22x22xf32, #tpu.memory_space<vmem>>, vector<1x1x16x16xf32>
    %417 = vector.shape_cast %416 : vector<1x1x16x16xf32> to vector<16x16xf32>
    %c1_481 = arith.constant 1 : index
    %c2_482 = arith.constant 2 : index
    %c6_483 = arith.constant 6 : index
    %418 = memref.load %arg2[%c1_481, %c2_482, %c6_483] : memref<2x7x7xf32, #tpu.memory_space<smem>>
    %419 = vector.broadcast %418 : f32 to vector<16x16xf32>
    %420 = arith.mulf %419, %417 : vector<16x16xf32>
    %421 = arith.addf %415, %420 : vector<16x16xf32>
    %c0_484 = arith.constant 0 : index
    %c1_485 = arith.constant 1 : index
    %c3_486 = arith.constant 3 : index
    %c0_487 = arith.constant 0 : index
    %422 = vector.load %arg1[%c0_484, %c1_485, %c3_486, %c0_487] : memref<1x2x22x22xf32, #tpu.memory_space<vmem>>, vector<1x1x16x16xf32>
    %423 = vector.shape_cast %422 : vector<1x1x16x16xf32> to vector<16x16xf32>
    %c1_488 = arith.constant 1 : index
    %c3_489 = arith.constant 3 : index
    %c0_490 = arith.constant 0 : index
    %424 = memref.load %arg2[%c1_488, %c3_489, %c0_490] : memref<2x7x7xf32, #tpu.memory_space<smem>>
    %425 = vector.broadcast %424 : f32 to vector<16x16xf32>
    %426 = arith.mulf %425, %423 : vector<16x16xf32>
    %427 = arith.addf %421, %426 : vector<16x16xf32>
    %c0_491 = arith.constant 0 : index
    %c1_492 = arith.constant 1 : index
    %c3_493 = arith.constant 3 : index
    %c1_494 = arith.constant 1 : index
    %428 = vector.load %arg1[%c0_491, %c1_492, %c3_493, %c1_494] : memref<1x2x22x22xf32, #tpu.memory_space<vmem>>, vector<1x1x16x16xf32>
    %429 = vector.shape_cast %428 : vector<1x1x16x16xf32> to vector<16x16xf32>
    %c1_495 = arith.constant 1 : index
    %c3_496 = arith.constant 3 : index
    %c1_497 = arith.constant 1 : index
    %430 = memref.load %arg2[%c1_495, %c3_496, %c1_497] : memref<2x7x7xf32, #tpu.memory_space<smem>>
    %431 = vector.broadcast %430 : f32 to vector<16x16xf32>
    %432 = arith.mulf %431, %429 : vector<16x16xf32>
    %433 = arith.addf %427, %432 : vector<16x16xf32>
    %c0_498 = arith.constant 0 : index
    %c1_499 = arith.constant 1 : index
    %c3_500 = arith.constant 3 : index
    %c2_501 = arith.constant 2 : index
    %434 = vector.load %arg1[%c0_498, %c1_499, %c3_500, %c2_501] : memref<1x2x22x22xf32, #tpu.memory_space<vmem>>, vector<1x1x16x16xf32>
    %435 = vector.shape_cast %434 : vector<1x1x16x16xf32> to vector<16x16xf32>
    %c1_502 = arith.constant 1 : index
    %c3_503 = arith.constant 3 : index
    %c2_504 = arith.constant 2 : index
    %436 = memref.load %arg2[%c1_502, %c3_503, %c2_504] : memref<2x7x7xf32, #tpu.memory_space<smem>>
    %437 = vector.broadcast %436 : f32 to vector<16x16xf32>
    %438 = arith.mulf %437, %435 : vector<16x16xf32>
    %439 = arith.addf %433, %438 : vector<16x16xf32>
    %c0_505 = arith.constant 0 : index
    %c1_506 = arith.constant 1 : index
    %c3_507 = arith.constant 3 : index
    %c3_508 = arith.constant 3 : index
    %440 = vector.load %arg1[%c0_505, %c1_506, %c3_507, %c3_508] : memref<1x2x22x22xf32, #tpu.memory_space<vmem>>, vector<1x1x16x16xf32>
    %441 = vector.shape_cast %440 : vector<1x1x16x16xf32> to vector<16x16xf32>
    %c1_509 = arith.constant 1 : index
    %c3_510 = arith.constant 3 : index
    %c3_511 = arith.constant 3 : index
    %442 = memref.load %arg2[%c1_509, %c3_510, %c3_511] : memref<2x7x7xf32, #tpu.memory_space<smem>>
    %443 = vector.broadcast %442 : f32 to vector<16x16xf32>
    %444 = arith.mulf %443, %441 : vector<16x16xf32>
    %445 = arith.addf %439, %444 : vector<16x16xf32>
    %c0_512 = arith.constant 0 : index
    %c1_513 = arith.constant 1 : index
    %c3_514 = arith.constant 3 : index
    %c4_515 = arith.constant 4 : index
    %446 = vector.load %arg1[%c0_512, %c1_513, %c3_514, %c4_515] : memref<1x2x22x22xf32, #tpu.memory_space<vmem>>, vector<1x1x16x16xf32>
    %447 = vector.shape_cast %446 : vector<1x1x16x16xf32> to vector<16x16xf32>
    %c1_516 = arith.constant 1 : index
    %c3_517 = arith.constant 3 : index
    %c4_518 = arith.constant 4 : index
    %448 = memref.load %arg2[%c1_516, %c3_517, %c4_518] : memref<2x7x7xf32, #tpu.memory_space<smem>>
    %449 = vector.broadcast %448 : f32 to vector<16x16xf32>
    %450 = arith.mulf %449, %447 : vector<16x16xf32>
    %451 = arith.addf %445, %450 : vector<16x16xf32>
    %c0_519 = arith.constant 0 : index
    %c1_520 = arith.constant 1 : index
    %c3_521 = arith.constant 3 : index
    %c5_522 = arith.constant 5 : index
    %452 = vector.load %arg1[%c0_519, %c1_520, %c3_521, %c5_522] : memref<1x2x22x22xf32, #tpu.memory_space<vmem>>, vector<1x1x16x16xf32>
    %453 = vector.shape_cast %452 : vector<1x1x16x16xf32> to vector<16x16xf32>
    %c1_523 = arith.constant 1 : index
    %c3_524 = arith.constant 3 : index
    %c5_525 = arith.constant 5 : index
    %454 = memref.load %arg2[%c1_523, %c3_524, %c5_525] : memref<2x7x7xf32, #tpu.memory_space<smem>>
    %455 = vector.broadcast %454 : f32 to vector<16x16xf32>
    %456 = arith.mulf %455, %453 : vector<16x16xf32>
    %457 = arith.addf %451, %456 : vector<16x16xf32>
    %c0_526 = arith.constant 0 : index
    %c1_527 = arith.constant 1 : index
    %c3_528 = arith.constant 3 : index
    %c6_529 = arith.constant 6 : index
    %458 = vector.load %arg1[%c0_526, %c1_527, %c3_528, %c6_529] : memref<1x2x22x22xf32, #tpu.memory_space<vmem>>, vector<1x1x16x16xf32>
    %459 = vector.shape_cast %458 : vector<1x1x16x16xf32> to vector<16x16xf32>
    %c1_530 = arith.constant 1 : index
    %c3_531 = arith.constant 3 : index
    %c6_532 = arith.constant 6 : index
    %460 = memref.load %arg2[%c1_530, %c3_531, %c6_532] : memref<2x7x7xf32, #tpu.memory_space<smem>>
    %461 = vector.broadcast %460 : f32 to vector<16x16xf32>
    %462 = arith.mulf %461, %459 : vector<16x16xf32>
    %463 = arith.addf %457, %462 : vector<16x16xf32>
    %c0_533 = arith.constant 0 : index
    %c1_534 = arith.constant 1 : index
    %c4_535 = arith.constant 4 : index
    %c0_536 = arith.constant 0 : index
    %464 = vector.load %arg1[%c0_533, %c1_534, %c4_535, %c0_536] : memref<1x2x22x22xf32, #tpu.memory_space<vmem>>, vector<1x1x16x16xf32>
    %465 = vector.shape_cast %464 : vector<1x1x16x16xf32> to vector<16x16xf32>
    %c1_537 = arith.constant 1 : index
    %c4_538 = arith.constant 4 : index
    %c0_539 = arith.constant 0 : index
    %466 = memref.load %arg2[%c1_537, %c4_538, %c0_539] : memref<2x7x7xf32, #tpu.memory_space<smem>>
    %467 = vector.broadcast %466 : f32 to vector<16x16xf32>
    %468 = arith.mulf %467, %465 : vector<16x16xf32>
    %469 = arith.addf %463, %468 : vector<16x16xf32>
    %c0_540 = arith.constant 0 : index
    %c1_541 = arith.constant 1 : index
    %c4_542 = arith.constant 4 : index
    %c1_543 = arith.constant 1 : index
    %470 = vector.load %arg1[%c0_540, %c1_541, %c4_542, %c1_543] : memref<1x2x22x22xf32, #tpu.memory_space<vmem>>, vector<1x1x16x16xf32>
    %471 = vector.shape_cast %470 : vector<1x1x16x16xf32> to vector<16x16xf32>
    %c1_544 = arith.constant 1 : index
    %c4_545 = arith.constant 4 : index
    %c1_546 = arith.constant 1 : index
    %472 = memref.load %arg2[%c1_544, %c4_545, %c1_546] : memref<2x7x7xf32, #tpu.memory_space<smem>>
    %473 = vector.broadcast %472 : f32 to vector<16x16xf32>
    %474 = arith.mulf %473, %471 : vector<16x16xf32>
    %475 = arith.addf %469, %474 : vector<16x16xf32>
    %c0_547 = arith.constant 0 : index
    %c1_548 = arith.constant 1 : index
    %c4_549 = arith.constant 4 : index
    %c2_550 = arith.constant 2 : index
    %476 = vector.load %arg1[%c0_547, %c1_548, %c4_549, %c2_550] : memref<1x2x22x22xf32, #tpu.memory_space<vmem>>, vector<1x1x16x16xf32>
    %477 = vector.shape_cast %476 : vector<1x1x16x16xf32> to vector<16x16xf32>
    %c1_551 = arith.constant 1 : index
    %c4_552 = arith.constant 4 : index
    %c2_553 = arith.constant 2 : index
    %478 = memref.load %arg2[%c1_551, %c4_552, %c2_553] : memref<2x7x7xf32, #tpu.memory_space<smem>>
    %479 = vector.broadcast %478 : f32 to vector<16x16xf32>
    %480 = arith.mulf %479, %477 : vector<16x16xf32>
    %481 = arith.addf %475, %480 : vector<16x16xf32>
    %c0_554 = arith.constant 0 : index
    %c1_555 = arith.constant 1 : index
    %c4_556 = arith.constant 4 : index
    %c3_557 = arith.constant 3 : index
    %482 = vector.load %arg1[%c0_554, %c1_555, %c4_556, %c3_557] : memref<1x2x22x22xf32, #tpu.memory_space<vmem>>, vector<1x1x16x16xf32>
    %483 = vector.shape_cast %482 : vector<1x1x16x16xf32> to vector<16x16xf32>
    %c1_558 = arith.constant 1 : index
    %c4_559 = arith.constant 4 : index
    %c3_560 = arith.constant 3 : index
    %484 = memref.load %arg2[%c1_558, %c4_559, %c3_560] : memref<2x7x7xf32, #tpu.memory_space<smem>>
    %485 = vector.broadcast %484 : f32 to vector<16x16xf32>
    %486 = arith.mulf %485, %483 : vector<16x16xf32>
    %487 = arith.addf %481, %486 : vector<16x16xf32>
    %c0_561 = arith.constant 0 : index
    %c1_562 = arith.constant 1 : index
    %c4_563 = arith.constant 4 : index
    %c4_564 = arith.constant 4 : index
    %488 = vector.load %arg1[%c0_561, %c1_562, %c4_563, %c4_564] : memref<1x2x22x22xf32, #tpu.memory_space<vmem>>, vector<1x1x16x16xf32>
    %489 = vector.shape_cast %488 : vector<1x1x16x16xf32> to vector<16x16xf32>
    %c1_565 = arith.constant 1 : index
    %c4_566 = arith.constant 4 : index
    %c4_567 = arith.constant 4 : index
    %490 = memref.load %arg2[%c1_565, %c4_566, %c4_567] : memref<2x7x7xf32, #tpu.memory_space<smem>>
    %491 = vector.broadcast %490 : f32 to vector<16x16xf32>
    %492 = arith.mulf %491, %489 : vector<16x16xf32>
    %493 = arith.addf %487, %492 : vector<16x16xf32>
    %c0_568 = arith.constant 0 : index
    %c1_569 = arith.constant 1 : index
    %c4_570 = arith.constant 4 : index
    %c5_571 = arith.constant 5 : index
    %494 = vector.load %arg1[%c0_568, %c1_569, %c4_570, %c5_571] : memref<1x2x22x22xf32, #tpu.memory_space<vmem>>, vector<1x1x16x16xf32>
    %495 = vector.shape_cast %494 : vector<1x1x16x16xf32> to vector<16x16xf32>
    %c1_572 = arith.constant 1 : index
    %c4_573 = arith.constant 4 : index
    %c5_574 = arith.constant 5 : index
    %496 = memref.load %arg2[%c1_572, %c4_573, %c5_574] : memref<2x7x7xf32, #tpu.memory_space<smem>>
    %497 = vector.broadcast %496 : f32 to vector<16x16xf32>
    %498 = arith.mulf %497, %495 : vector<16x16xf32>
    %499 = arith.addf %493, %498 : vector<16x16xf32>
    %c0_575 = arith.constant 0 : index
    %c1_576 = arith.constant 1 : index
    %c4_577 = arith.constant 4 : index
    %c6_578 = arith.constant 6 : index
    %500 = vector.load %arg1[%c0_575, %c1_576, %c4_577, %c6_578] : memref<1x2x22x22xf32, #tpu.memory_space<vmem>>, vector<1x1x16x16xf32>
    %501 = vector.shape_cast %500 : vector<1x1x16x16xf32> to vector<16x16xf32>
    %c1_579 = arith.constant 1 : index
    %c4_580 = arith.constant 4 : index
    %c6_581 = arith.constant 6 : index
    %502 = memref.load %arg2[%c1_579, %c4_580, %c6_581] : memref<2x7x7xf32, #tpu.memory_space<smem>>
    %503 = vector.broadcast %502 : f32 to vector<16x16xf32>
    %504 = arith.mulf %503, %501 : vector<16x16xf32>
    %505 = arith.addf %499, %504 : vector<16x16xf32>
    %c0_582 = arith.constant 0 : index
    %c1_583 = arith.constant 1 : index
    %c5_584 = arith.constant 5 : index
    %c0_585 = arith.constant 0 : index
    %506 = vector.load %arg1[%c0_582, %c1_583, %c5_584, %c0_585] : memref<1x2x22x22xf32, #tpu.memory_space<vmem>>, vector<1x1x16x16xf32>
    %507 = vector.shape_cast %506 : vector<1x1x16x16xf32> to vector<16x16xf32>
    %c1_586 = arith.constant 1 : index
    %c5_587 = arith.constant 5 : index
    %c0_588 = arith.constant 0 : index
    %508 = memref.load %arg2[%c1_586, %c5_587, %c0_588] : memref<2x7x7xf32, #tpu.memory_space<smem>>
    %509 = vector.broadcast %508 : f32 to vector<16x16xf32>
    %510 = arith.mulf %509, %507 : vector<16x16xf32>
    %511 = arith.addf %505, %510 : vector<16x16xf32>
    %c0_589 = arith.constant 0 : index
    %c1_590 = arith.constant 1 : index
    %c5_591 = arith.constant 5 : index
    %c1_592 = arith.constant 1 : index
    %512 = vector.load %arg1[%c0_589, %c1_590, %c5_591, %c1_592] : memref<1x2x22x22xf32, #tpu.memory_space<vmem>>, vector<1x1x16x16xf32>
    %513 = vector.shape_cast %512 : vector<1x1x16x16xf32> to vector<16x16xf32>
    %c1_593 = arith.constant 1 : index
    %c5_594 = arith.constant 5 : index
    %c1_595 = arith.constant 1 : index
    %514 = memref.load %arg2[%c1_593, %c5_594, %c1_595] : memref<2x7x7xf32, #tpu.memory_space<smem>>
    %515 = vector.broadcast %514 : f32 to vector<16x16xf32>
    %516 = arith.mulf %515, %513 : vector<16x16xf32>
    %517 = arith.addf %511, %516 : vector<16x16xf32>
    %c0_596 = arith.constant 0 : index
    %c1_597 = arith.constant 1 : index
    %c5_598 = arith.constant 5 : index
    %c2_599 = arith.constant 2 : index
    %518 = vector.load %arg1[%c0_596, %c1_597, %c5_598, %c2_599] : memref<1x2x22x22xf32, #tpu.memory_space<vmem>>, vector<1x1x16x16xf32>
    %519 = vector.shape_cast %518 : vector<1x1x16x16xf32> to vector<16x16xf32>
    %c1_600 = arith.constant 1 : index
    %c5_601 = arith.constant 5 : index
    %c2_602 = arith.constant 2 : index
    %520 = memref.load %arg2[%c1_600, %c5_601, %c2_602] : memref<2x7x7xf32, #tpu.memory_space<smem>>
    %521 = vector.broadcast %520 : f32 to vector<16x16xf32>
    %522 = arith.mulf %521, %519 : vector<16x16xf32>
    %523 = arith.addf %517, %522 : vector<16x16xf32>
    %c0_603 = arith.constant 0 : index
    %c1_604 = arith.constant 1 : index
    %c5_605 = arith.constant 5 : index
    %c3_606 = arith.constant 3 : index
    %524 = vector.load %arg1[%c0_603, %c1_604, %c5_605, %c3_606] : memref<1x2x22x22xf32, #tpu.memory_space<vmem>>, vector<1x1x16x16xf32>
    %525 = vector.shape_cast %524 : vector<1x1x16x16xf32> to vector<16x16xf32>
    %c1_607 = arith.constant 1 : index
    %c5_608 = arith.constant 5 : index
    %c3_609 = arith.constant 3 : index
    %526 = memref.load %arg2[%c1_607, %c5_608, %c3_609] : memref<2x7x7xf32, #tpu.memory_space<smem>>
    %527 = vector.broadcast %526 : f32 to vector<16x16xf32>
    %528 = arith.mulf %527, %525 : vector<16x16xf32>
    %529 = arith.addf %523, %528 : vector<16x16xf32>
    %c0_610 = arith.constant 0 : index
    %c1_611 = arith.constant 1 : index
    %c5_612 = arith.constant 5 : index
    %c4_613 = arith.constant 4 : index
    %530 = vector.load %arg1[%c0_610, %c1_611, %c5_612, %c4_613] : memref<1x2x22x22xf32, #tpu.memory_space<vmem>>, vector<1x1x16x16xf32>
    %531 = vector.shape_cast %530 : vector<1x1x16x16xf32> to vector<16x16xf32>
    %c1_614 = arith.constant 1 : index
    %c5_615 = arith.constant 5 : index
    %c4_616 = arith.constant 4 : index
    %532 = memref.load %arg2[%c1_614, %c5_615, %c4_616] : memref<2x7x7xf32, #tpu.memory_space<smem>>
    %533 = vector.broadcast %532 : f32 to vector<16x16xf32>
    %534 = arith.mulf %533, %531 : vector<16x16xf32>
    %535 = arith.addf %529, %534 : vector<16x16xf32>
    %c0_617 = arith.constant 0 : index
    %c1_618 = arith.constant 1 : index
    %c5_619 = arith.constant 5 : index
    %c5_620 = arith.constant 5 : index
    %536 = vector.load %arg1[%c0_617, %c1_618, %c5_619, %c5_620] : memref<1x2x22x22xf32, #tpu.memory_space<vmem>>, vector<1x1x16x16xf32>
    %537 = vector.shape_cast %536 : vector<1x1x16x16xf32> to vector<16x16xf32>
    %c1_621 = arith.constant 1 : index
    %c5_622 = arith.constant 5 : index
    %c5_623 = arith.constant 5 : index
    %538 = memref.load %arg2[%c1_621, %c5_622, %c5_623] : memref<2x7x7xf32, #tpu.memory_space<smem>>
    %539 = vector.broadcast %538 : f32 to vector<16x16xf32>
    %540 = arith.mulf %539, %537 : vector<16x16xf32>
    %541 = arith.addf %535, %540 : vector<16x16xf32>
    %c0_624 = arith.constant 0 : index
    %c1_625 = arith.constant 1 : index
    %c5_626 = arith.constant 5 : index
    %c6_627 = arith.constant 6 : index
    %542 = vector.load %arg1[%c0_624, %c1_625, %c5_626, %c6_627] : memref<1x2x22x22xf32, #tpu.memory_space<vmem>>, vector<1x1x16x16xf32>
    %543 = vector.shape_cast %542 : vector<1x1x16x16xf32> to vector<16x16xf32>
    %c1_628 = arith.constant 1 : index
    %c5_629 = arith.constant 5 : index
    %c6_630 = arith.constant 6 : index
    %544 = memref.load %arg2[%c1_628, %c5_629, %c6_630] : memref<2x7x7xf32, #tpu.memory_space<smem>>
    %545 = vector.broadcast %544 : f32 to vector<16x16xf32>
    %546 = arith.mulf %545, %543 : vector<16x16xf32>
    %547 = arith.addf %541, %546 : vector<16x16xf32>
    %c0_631 = arith.constant 0 : index
    %c1_632 = arith.constant 1 : index
    %c6_633 = arith.constant 6 : index
    %c0_634 = arith.constant 0 : index
    %548 = vector.load %arg1[%c0_631, %c1_632, %c6_633, %c0_634] : memref<1x2x22x22xf32, #tpu.memory_space<vmem>>, vector<1x1x16x16xf32>
    %549 = vector.shape_cast %548 : vector<1x1x16x16xf32> to vector<16x16xf32>
    %c1_635 = arith.constant 1 : index
    %c6_636 = arith.constant 6 : index
    %c0_637 = arith.constant 0 : index
    %550 = memref.load %arg2[%c1_635, %c6_636, %c0_637] : memref<2x7x7xf32, #tpu.memory_space<smem>>
    %551 = vector.broadcast %550 : f32 to vector<16x16xf32>
    %552 = arith.mulf %551, %549 : vector<16x16xf32>
    %553 = arith.addf %547, %552 : vector<16x16xf32>
    %c0_638 = arith.constant 0 : index
    %c1_639 = arith.constant 1 : index
    %c6_640 = arith.constant 6 : index
    %c1_641 = arith.constant 1 : index
    %554 = vector.load %arg1[%c0_638, %c1_639, %c6_640, %c1_641] : memref<1x2x22x22xf32, #tpu.memory_space<vmem>>, vector<1x1x16x16xf32>
    %555 = vector.shape_cast %554 : vector<1x1x16x16xf32> to vector<16x16xf32>
    %c1_642 = arith.constant 1 : index
    %c6_643 = arith.constant 6 : index
    %c1_644 = arith.constant 1 : index
    %556 = memref.load %arg2[%c1_642, %c6_643, %c1_644] : memref<2x7x7xf32, #tpu.memory_space<smem>>
    %557 = vector.broadcast %556 : f32 to vector<16x16xf32>
    %558 = arith.mulf %557, %555 : vector<16x16xf32>
    %559 = arith.addf %553, %558 : vector<16x16xf32>
    %c0_645 = arith.constant 0 : index
    %c1_646 = arith.constant 1 : index
    %c6_647 = arith.constant 6 : index
    %c2_648 = arith.constant 2 : index
    %560 = vector.load %arg1[%c0_645, %c1_646, %c6_647, %c2_648] : memref<1x2x22x22xf32, #tpu.memory_space<vmem>>, vector<1x1x16x16xf32>
    %561 = vector.shape_cast %560 : vector<1x1x16x16xf32> to vector<16x16xf32>
    %c1_649 = arith.constant 1 : index
    %c6_650 = arith.constant 6 : index
    %c2_651 = arith.constant 2 : index
    %562 = memref.load %arg2[%c1_649, %c6_650, %c2_651] : memref<2x7x7xf32, #tpu.memory_space<smem>>
    %563 = vector.broadcast %562 : f32 to vector<16x16xf32>
    %564 = arith.mulf %563, %561 : vector<16x16xf32>
    %565 = arith.addf %559, %564 : vector<16x16xf32>
    %c0_652 = arith.constant 0 : index
    %c1_653 = arith.constant 1 : index
    %c6_654 = arith.constant 6 : index
    %c3_655 = arith.constant 3 : index
    %566 = vector.load %arg1[%c0_652, %c1_653, %c6_654, %c3_655] : memref<1x2x22x22xf32, #tpu.memory_space<vmem>>, vector<1x1x16x16xf32>
    %567 = vector.shape_cast %566 : vector<1x1x16x16xf32> to vector<16x16xf32>
    %c1_656 = arith.constant 1 : index
    %c6_657 = arith.constant 6 : index
    %c3_658 = arith.constant 3 : index
    %568 = memref.load %arg2[%c1_656, %c6_657, %c3_658] : memref<2x7x7xf32, #tpu.memory_space<smem>>
    %569 = vector.broadcast %568 : f32 to vector<16x16xf32>
    %570 = arith.mulf %569, %567 : vector<16x16xf32>
    %571 = arith.addf %565, %570 : vector<16x16xf32>
    %c0_659 = arith.constant 0 : index
    %c1_660 = arith.constant 1 : index
    %c6_661 = arith.constant 6 : index
    %c4_662 = arith.constant 4 : index
    %572 = vector.load %arg1[%c0_659, %c1_660, %c6_661, %c4_662] : memref<1x2x22x22xf32, #tpu.memory_space<vmem>>, vector<1x1x16x16xf32>
    %573 = vector.shape_cast %572 : vector<1x1x16x16xf32> to vector<16x16xf32>
    %c1_663 = arith.constant 1 : index
    %c6_664 = arith.constant 6 : index
    %c4_665 = arith.constant 4 : index
    %574 = memref.load %arg2[%c1_663, %c6_664, %c4_665] : memref<2x7x7xf32, #tpu.memory_space<smem>>
    %575 = vector.broadcast %574 : f32 to vector<16x16xf32>
    %576 = arith.mulf %575, %573 : vector<16x16xf32>
    %577 = arith.addf %571, %576 : vector<16x16xf32>
    %c0_666 = arith.constant 0 : index
    %c1_667 = arith.constant 1 : index
    %c6_668 = arith.constant 6 : index
    %c5_669 = arith.constant 5 : index
    %578 = vector.load %arg1[%c0_666, %c1_667, %c6_668, %c5_669] : memref<1x2x22x22xf32, #tpu.memory_space<vmem>>, vector<1x1x16x16xf32>
    %579 = vector.shape_cast %578 : vector<1x1x16x16xf32> to vector<16x16xf32>
    %c1_670 = arith.constant 1 : index
    %c6_671 = arith.constant 6 : index
    %c5_672 = arith.constant 5 : index
    %580 = memref.load %arg2[%c1_670, %c6_671, %c5_672] : memref<2x7x7xf32, #tpu.memory_space<smem>>
    %581 = vector.broadcast %580 : f32 to vector<16x16xf32>
    %582 = arith.mulf %581, %579 : vector<16x16xf32>
    %583 = arith.addf %577, %582 : vector<16x16xf32>
    %c0_673 = arith.constant 0 : index
    %c1_674 = arith.constant 1 : index
    %c6_675 = arith.constant 6 : index
    %c6_676 = arith.constant 6 : index
    %584 = vector.load %arg1[%c0_673, %c1_674, %c6_675, %c6_676] : memref<1x2x22x22xf32, #tpu.memory_space<vmem>>, vector<1x1x16x16xf32>
    %585 = vector.shape_cast %584 : vector<1x1x16x16xf32> to vector<16x16xf32>
    %c1_677 = arith.constant 1 : index
    %c6_678 = arith.constant 6 : index
    %c6_679 = arith.constant 6 : index
    %586 = memref.load %arg2[%c1_677, %c6_678, %c6_679] : memref<2x7x7xf32, #tpu.memory_space<smem>>
    %587 = vector.broadcast %586 : f32 to vector<16x16xf32>
    %588 = arith.mulf %587, %585 : vector<16x16xf32>
    %589 = arith.addf %583, %588 : vector<16x16xf32>
    %cst = arith.constant 0.000000e+00 : f32
    %590 = vector.broadcast %cst : f32 to vector<16x16xf32>
    %591 = arith.subf %590, %589 : vector<16x16xf32>
    %592 = math.exp %591 : vector<16x16xf32>
    %cst_680 = arith.constant 1.000000e+00 : f32
    %593 = vector.broadcast %cst_680 : f32 to vector<16x16xf32>
    %594 = arith.addf %593, %592 : vector<16x16xf32>
    %cst_681 = arith.constant 1.000000e+00 : f32
    %595 = vector.broadcast %cst_681 : f32 to vector<16x16xf32>
    %596 = arith.divf %595, %594 : vector<16x16xf32>
    %c0_682 = arith.constant 0 : index
    %c0_683 = arith.constant 0 : index
    %c0_684 = arith.constant 0 : index
    %c0_685 = arith.constant 0 : index
    %597 = vector.load %arg4[%c0_682, %c0_683, %c0_684, %c0_685] : memref<1x1x16x16xf32, #tpu.memory_space<vmem>>, vector<1x1x16x16xf32>
    %598 = vector.shape_cast %597 : vector<1x1x16x16xf32> to vector<16x16xf32>
    %599 = vector.shape_cast %596 : vector<16x16xf32> to vector<1x1x16x16xf32>
    tpu.vector_store %arg4[%c0_682, %c0_683, %c0_684, %c0_685], %599 {strides = array<i32>} : memref<1x1x16x16xf32, #tpu.memory_space<vmem>>, vector<1x1x16x16xf32>,
    return
  }
  func.func @transform_0(%arg0: i32) -> (i32, i32, i32, i32) {
    %c0_i32 = arith.constant 0 : i32
    %c0_i32_0 = arith.constant 0 : i32
    %c0_i32_1 = arith.constant 0 : i32
    %c0_i32_2 = arith.constant 0 : i32
    return %arg0, %c0_i32, %c0_i32_0, %c0_i32_1 : i32, i32, i32, i32
  }
  func.func @transform_1(%arg0: i32) -> (i32, i32, i32) {
    %c0_i32 = arith.constant 0 : i32
    %c0_i32_0 = arith.constant 0 : i32
    %c0_i32_1 = arith.constant 0 : i32
    %c0_i32_2 = arith.constant 0 : i32
    return %c0_i32, %c0_i32_0, %c0_i32_1 : i32, i32, i32
  }
  func.func @transform_2(%arg0: i32) -> i32 {
    %c0_i32 = arith.constant 0 : i32
    %c0_i32_0 = arith.constant 0 : i32
    return %c0_i32 : i32
  }
  func.func @transform_3(%arg0: i32) -> (i32, i32, i32, i32) {
    %c0_i32 = arith.constant 0 : i32
    %c0_i32_0 = arith.constant 0 : i32
    %c0_i32_1 = arith.constant 0 : i32
    %c0_i32_2 = arith.constant 0 : i32
    return %arg0, %c0_i32, %c0_i32_0, %c0_i32_1 : i32, i32, i32, i32
  }
}

</mosaic_0001>

<bundles_post_ra>
// kernel: spatial_attention_forward.2
= control target key start
LH: loop header
LB: loop body
LE: loop exit
PB: predicated region body
PF: predicated region fallthrough
CT: control target
= control target key end

     0   :  { %6 = vsyncpa [#allocation3], 0  ;;  %s621_s0 = inlined_call_operand.hbm [shape: f32[2,4,16,16], index: 0, kind: input, shape index: {}]   ;;  %s622_s1 = inlined_call_operand.vmem [shape: f32[2,2,16,16], index: 1, kind: output, shape index: {}]  }
   0x1   :  { %8 = vsyncpa [#allocation3 + $0x1], 0  ;;  %s474_s6 = smov 0   ;;  %s476_s7 = smov 0  }
   0x2   :  { %s478_s8 = smov 0   ;;  %s480_s9 = smov 0  }
   0x3   :  { %s482_s10 = smov 0   ;;  %s484_s11 = smov 0  }
   0x4 LB: > { %s305_s12 = sadd.s32 4294967295, %s459_s11   ;;  %s26_s13 = sadd.s32 1, %s455_s10  ;;  %s459_s11 = sphi %s484_s11, %s14_s11   ;;  %s455_s10 = sphi %s482_s10, %s630_s10   ;;  %s451_s9 = sphi %s480_s9, %s629_s9   ;;  %s447_s8 = sphi %s478_s8, %s628_s8   ;;  %s443_s7 = sphi %s476_s7, %s627_s7   ;;  %s439_s6 = sphi %s474_s6, %s626_s6  }
   0x5   : > { %p28_p0 = scmp.ge.s32.totalorder %s26_s13, 2  ;;  %s35_s14 = sadd.s32 1, %s447_s8 }
   0x6   : > { %p42_p1 = scmp.ne.s32.totalorder %s447_s8, %s443_s7  ;;  %p43_p2 = scmp.eq.s32.totalorder %s459_s11, 0 }
   0x7   : > { %s632_s13 = smov (%p28_p0, %s26_s13), 0  ;;  %p48_p4 = scmp.ne.s32.totalorder %s443_s7, %s439_s6 }
   0x8   : > { %p510_p3 = por %p43_p2, %p42_p1  ;;  %s30_s16 = ssub.s32 %s455_s10, %s632_s13 }
   0x9   : > { %p49_p5 = scmp.eq.s32.totalorder %s305_s12, 0  ;;  %p33_p6 = scmp.eq.s32.totalorder %s30_s16, 0 }
   0xa   : > { %p328_p8 = scmp.lt.s32.totalorder %s459_s11, 2  ;;  %s100_s19 = sand.u32 1, %s447_s8  }
   0xb   : > { %p517_p7 = por %p49_p5, %p48_p4  ;;  %s320_s20 = sshll.u32 %s455_s10, 10 }
   0xc   : > { %s523_s18 = scalar_select %p33_p6, %s447_s8, %s35_s14  }
   0xd   : > { %s309_s21 = sshll.u32 %s100_s19, 6  ;;  %s530_s24 = scalar_lea.hbm %s621_s0, %s320_s20 }
   0xe   : > { %s104_s25 = scalar_lea.vmem [#allocation2], %s309_s21  ;;  %p534_p9 = pnand %p328_p8, %p510_p3 }
   0xf   : > { %s113_s26 = sshll.u32 %s104_s25, 4  ;;  %s540_s28 = scalar_lea.sflag [#allocation3], %s100_s19  ;;  %s538_s26 = int_to_ptr.vmem [resolvable:$true] %s113_s26 }
  0x10   : > { %s379_s29 = scalar_lea.hbm %s530_s24, 1024  ;;  %p381_p11 = pneg %p534_p9 }
  0x11   : > { %p380_p10 = scmp.ne.s32.totalorder %s530_s24, %s379_s29  ;;  %s384_s3 = scalar_lea.hbm %s621_s0, 2048 }
  0x12   : > { %p385_p0 = scmp.lt.u32.totalorder %s530_s24, %s621_s0  ;;  %p386_p1 = scmp.lt.u32.totalorder %s384_s3, %s379_s29 }
  0x13   : > { %p382_p12 = pnand %p381_p11, %p380_p10  ;;  %p388_p3 = scmp.lt.u32.totalorder %s379_s29, %s530_s24 }
  0x14   : > { %p387_p2 = por %p386_p1, %p385_p0 }
  0x15   : > { %p383_p13 = pneg %p382_p12 }
  0x16   : > { %p389_p4 = por %p388_p3, %p387_p2 }
  0x18   : > { %p390_p5 = pnand %p389_p4, %p383_p13 }
  0x1a   : > { %393 = shalt.err (!%p390_p5)
}
  0x1b   : > { %s394_s6 = scalar_lea.vmem %s538_s26, 1024  ;;  %s461_s12 = smov [#allocation2]  }
  0x1c   : > { %p395_p6 = scmp.ne.s32.totalorder %s538_s26, %s394_s6  ;;  %s399_s14 = sshll.u32 %s461_s12, 4  ;;  %s400_s14 = int_to_ptr.vmem [resolvable:$false] %s399_s14 }
  0x1d   : > { %s401_s15 = scalar_lea.vmem %s400_s14, 2048  ;;  %p402_p12 = scmp.lt.s32.totalorder %s538_s26, %s400_s14 }
  0x1e   : > { %p397_p8 = pnand %p395_p6, %p381_p11  ;;  %p403_p0 = scmp.lt.s32.totalorder %s401_s15, %s394_s6 }
  0x20   : > { %p398_p10 = pneg %p397_p8  ;;  %p404_p1 = por %p403_p0, %p402_p12 }
  0x22   : > { %p405_p2 = pnand %p404_p1, %p398_p10 }
  0x24   : > { %408 = shalt.err (!%p405_p2)
}
  0x25   : > { %s462_s16 = smov 128   ;;  %s463_s19 = smov 8  }
  0x26   : > { %327 = dma.hbm_to_vmem [thread:$0]  (!%p534_p9), %s530_s24, 1024, %s538_s26, %s540_s28, %s462_s16, %s462_s16, %s463_s19  }
  0x27   : > { %p312_p11 = scmp.ge.s32.totalorder %s459_s11, 1  ;;  %p121_p13 = scmp.lt.s32.totalorder %s459_s11, 3 }
  0x29   : > { %p122_p3 = pnand %p312_p11, %p121_p13 }
  0x2a   : > { %s127_s20 = sand.u32 (!%p122_p3), 1, %s443_s7  }
  0x2b   : > { %125 = sbr.rel (%p122_p3) target bundleno = 64 (0x40), region = 24  ;;  %s313_s21 = sshll.u32 (!%p122_p3), %s127_s20, 6 }
  0x2c   : > { %s128_s22 = scalar_lea.sflag (!%p122_p3), [#allocation3], %s127_s20  ;;  %s131_s23 = scalar_lea.vmem (!%p122_p3), [#allocation2], %s313_s21 }
  0x32   : > { %434 = dma.done.wait (%p517_p7), %s128_s22, 1024  }
  0x33   : > { %436 = vsyncadd (%p517_p7), %s128_s22, 4294966272  ;;  %p156_p4 = scmp.lt.s32.totalorder %s451_s9, 1  ;;  %vm173_vm0 = vcmask 130048   ;;  %v165_v0 = vld [vmem:[%s131_s23] sm:$0xff]  ;;  %v167_v1 = vld [vmem:[%s131_s23 + $0x10] sm:$0xff] }
  0x34   : > { %v169_v2 = vld [vmem:[%s131_s23 + $0x20] sm:$0xff]  ;;  %v171_v3 = vld [vmem:[%s131_s23 + $0x30] sm:$0xff]  ;;  %v174_v4 = vsel %vm173_vm0, %v165_v0, 0.0  ;;  %v175_v5 = vsel %vm173_vm0, %v167_v1, 0.0  ;;  %v166_v7 = vld [vmem:[%s131_s23 + $0x8] sm:$0xff]  ;;  %v193_v18 = vsel %vm173_vm0, %v165_v0, -inf }
  0x35   : > { %s634_s9 = smov (!%p156_p4, %s451_s9), 1  ;;  %v177_v6 = vsel %vm173_vm0, %v169_v2, 0.0  ;;  %v168_v8 = vld [vmem:[%s131_s23 + $0x18] sm:$0xff]  ;;  %v176_v9 = vadd.f32 %v175_v5, %v174_v4  ;;  %v179_v10 = vsel %vm173_vm0, %v171_v3, 0.0  ;;  %v170_v11 = vld [vmem:[%s131_s23 + $0x28] sm:$0xff]  ;;  %v181_v13 = vsel %vm173_vm0, %v166_v7, 0.0 }
  0x36   : > { %v172_v12 = vld [vmem:[%s131_s23 + $0x38] sm:$0xff]  ;;  %v182_v14 = vsel %vm173_vm0, %v168_v8, 0.0  ;;  %s321_s17 = sshll.u32 %s634_s9, 5  ;;  %v184_v16 = vsel %vm173_vm0, %v170_v11, 0.0  ;;  %v194_v20 = vsel %vm173_vm0, %v167_v1, -inf  ;;  %v195_v21 = vsel %vm173_vm0, %v169_v2, -inf }
  0x37   : > { %v183_v15 = vadd.f32 %v182_v14, %v181_v13  ;;  %v186_v17 = vsel %vm173_vm0, %v172_v12, 0.0  ;;  %v178_v19 = vadd.f32 %v177_v6, %v176_v9  ;;  %v197_v22 = vsel %vm173_vm0, %v171_v3, -inf  ;;  %s163_s25 = scalar_lea.vmem %s622_s1, %s321_s17 }
  0x38   : > { %v196_v24 = vmax.f32 %v193_v18, %v195_v21  ;;  %v198_v25 = vmax.f32 %v194_v20, %v197_v22  ;;  %v200_v26 = vsel %vm173_vm0, %v166_v7, -inf  ;;  %v201_v28 = vsel %vm173_vm0, %v168_v8, -inf }
  0x39   : > { %v185_v23 = vadd.f32 %v184_v16, %v183_v15  ;;  %v180_v27 = vadd.f32 %v179_v10, %v178_v19  ;;  %v202_v29 = vsel %vm173_vm0, %v170_v11, -inf  ;;  %v204_v30 = vsel %vm173_vm0, %v172_v12, -inf }
  0x3a   : > { %v199_v32 = vmax.f32 %v196_v24, %v198_v25  ;;  %v203_v33 = vmax.f32 %v200_v26, %v202_v29  ;;  %v205_v34 = vmax.f32 %v201_v28, %v204_v30 }
  0x3b   : > { %v187_v31 = vadd.f32 %v186_v17, %v185_v23  ;;  %v189_v35 = vmul.f32 0.25, %v180_v27 }
  0x3c   : > { %316 = vst.msk [vmem:[%s163_s25 + $0x10] sm:$0xff] %vm173_vm0, %v199_v32  ;;  %v206_v37 = vmax.f32 %v203_v33, %v205_v34 }
  0x3d   : > { %v190_v36 = vmul.f32 0.25, %v187_v31  ;;  %191 = vst.msk [vmem:[%s163_s25] sm:$0xff] %vm173_vm0, %v189_v35 }
  0x3e   : > { %317 = vst.msk [vmem:[%s163_s25 + $0x18] sm:$0xff] %vm173_vm0, %v206_v37 }
  0x3f   : > { %192 = vst.msk [vmem:[%s163_s25 + $0x8] sm:$0xff] %vm173_vm0, %v190_v36 }
  0x40 PF: > { %s14_s11 = sadd.s32 1, %s459_s11   ;;  %s626_s6 = smov %s443_s7 }
  0x41   : > { %p11_p7 = scmp.ge.s32.totalorder %s14_s11, 4   ;;  %s627_s7 = smov %s447_s8 }
  0x42   : > { %s628_s8 = smov %s523_s18  ;;  %s629_s9 = smov %s455_s10 }
  0x43   : > { %s630_s10 = smov %s632_s13  ;;  %13 = sbr.rel (!%p11_p7) target bundleno = 4 (0x4), region = 65 }
  0x4a   :  { %240 = vsyncpa [#allocation3], 1 }
  0x4b   :  { %242 = vsyncpa [#allocation3 + $0x1], 1 }

// kernel: spatial_attention_forward.3
= control target key start
LH: loop header
LB: loop body
LE: loop exit
PB: predicated region body
PF: predicated region fallthrough
CT: control target
= control target key end

     0   :  { %s2579_s0 = inlined_call_operand.vmem [shape: f32[2,2,22,22], index: 0, kind: input, shape index: {}]   ;;  %s2580_s1 = inlined_call_operand.vmem [shape: f32[2,7,7], index: 1, kind: input, shape index: {}]   ;;  %s2581_s2 = inlined_call_operand.<no memory space> [shape: f32[1], index: 2, kind: input, shape index: {}]   ;;  %s2582_s3 = inlined_call_operand.hbm [shape: f32[2,1,16,16], index: 3, kind: output, shape index: {}]  }
   0x1   :  { %8 = sst [smem:[#allocation2]] %s2581_s2 }
   0x2   :  { %9 = vsyncpa [#allocation5], 0 }
   0x3   :  { %10 = vsyncpa [#allocation4], 0 }
   0x4   :  { %12 = vsyncpa [#allocation4 + $0x1], 0  ;;  %s1892_s14 = smov 0   ;;  %s1894_s15 = smov 0  }
   0x5   :  { %s1896_s16 = smov 0   ;;  %s1898_s17 = smov 0  }
   0x6 LB: > { %s1913_s2 = sadd.s32 4294967295, %s1855_s17   ;;  %s1580_s18 = sadd.s32 4294967294, %s1855_s17   ;;  %s1855_s17 = sphi %s1898_s17, %s2590_s17   ;;  %s1851_s16 = sphi %s1896_s16, %s2589_s16   ;;  %s1847_s15 = sphi %s1894_s15, %s2588_s15   ;;  %s1843_s14 = sphi %s1892_s14, %s2587_s14  }
   0x7   : > { %s1917_s19 = sadd.s32 1, %s1855_s17   ;;  %s93_s20 = sadd.s32 1, %s1851_s16 }
   0x8   : > { %s90_s21 = ssub.s32 %s1855_s17, %s1917_s19  ;;  %p103_p0 = scmp.ne.s32.totalorder %s1851_s16, %s1847_s15 }
   0x9   : > { %p91_p1 = scmp.eq.s32.totalorder %s90_s21, 0  ;;  %p104_p2 = scmp.eq.s32.totalorder %s1913_s2, 1 }
   0xa   : > { %p109_p3 = scmp.ne.s32.totalorder %s1847_s15, %s1843_s14  ;;  %p110_p4 = scmp.eq.s32.totalorder %s1580_s18, 1 }
   0xb   : > { %s1928_s22 = scalar_select %p91_p1, %s1851_s16, %s93_s20  }
   0xc   : > { %p1930_p5 = por %p104_p2, %p103_p0  ;;  %p1934_p6 = por %p110_p4, %p109_p3 }
   0xd   : > { %p1581_p7 = scmp.ge.s32.totalorder %s1855_s17, 1  ;;  %p117_p8 = scmp.lt.s32.totalorder %s1855_s17, 3 }
   0xe   : > { %p1720_p9 = scmp.eq.s32.totalorder %s1913_s2, 0  ;;  %s129_s28 = sshll.u32 %s2580_s1, 4  ;;  %s130_s28 = int_to_ptr.vmem [resolvable:$true] %s129_s28 }
   0xf   : > { %p1941_p10 = pnand %p1581_p7, %p117_p8  ;;  %s1774_s30 = scalar_lea.vmem %s130_s28, 256 }
  0x10   : > { %p1775_p13 = scmp.ne.s32.totalorder %s130_s28, %s1774_s30  ;;  %p1782_p3 = scmp.lt.s32.totalorder %s130_s28, %s130_s28 }
  0x11   : > { %p1712_p11 = pneg %p1941_p10  ;;  %p1783_p4 = scmp.lt.s32.totalorder %s1774_s30, %s1774_s30 }
  0x13   : > { %p1952_p12 = pnand %p1720_p9, %p1712_p11  ;;  %p1784_p7 = por %p1783_p4, %p1782_p3 }
  0x15   : > { %p1776_p0 = pneg %p1952_p12 }
  0x17   : > { %p1777_p1 = pnand %p1776_p0, %p1775_p13 }
  0x19   : > { %p1778_p2 = pneg %p1777_p1 }
  0x1b   : > { %p1785_p8 = pnand %p1784_p7, %p1778_p2 }
  0x1d   : > { %1788 = shalt.err (!%p1785_p8)
}
  0x1e   : > { %s1857_s4 = smov [#allocation3]   ;;  %s1858_s5 = smov 128  }
  0x1f   : > { %s1859_s6 = smov 8   ;;  %156 = sbr.rel (%p1941_p10) target bundleno = 544 (0x220), region = 32 }
  0x20   : > { %1715 = dma.vmem_to_smem (!%p1952_p12), %s130_s28, 256, %s1857_s4, [#allocation5], %s1858_s5, %s1858_s5, %s1859_s6  }
  0x26   : > { %1834 = dma.done.wait (%p1720_p9), [#allocation5], 256  }
  0x27   : > { %1836 = vsyncadd (%p1720_p9), [#allocation5], 4294967040 }
  0x28   : > { %162 = sfence }
  0x29   : > { %p181_p11 = scmp.lt.s32.totalorder %s1913_s2, 1  ;;  %s1589_s7 = sld [smem:[#allocation3 + $0x2]]  ;;  %vm1489_vm0 = vcmask 130048  }
  0x2a   : > { %s1588_s8 = sld [smem:[#allocation3 + $0x1]]  ;;  %s1590_s10 = sld [smem:[#allocation3 + $0x3]] }
  0x2b   : > { %s182_s9 = scalar_select %p181_p11, %s1913_s2, 1 }
  0x2c   : > { %s1591_s20 = sld [smem:[#allocation3 + $0x4]]  ;;  %s1860_s21 = smov 126  }
  0x2d   : > { %s1705_s11 = smul.u32 48, %s182_s9  ;;  %s1861_s25 = smov 127  }
  0x2e   : > { %s1592_s26 = sld [smem:[#allocation3 + $0x5]]  ;;  %s1593_s27 = sld [smem:[#allocation3 + $0x6]] }
  0x2f   : > { %s1971_s18 = scalar_lea.vmem %s2579_s0, %s1705_s11  ;;  %v211_v0 = vstv %s1589_s7  ;;  %s1862_s28 = smov 125  }
  0x30   : > { %v1974_v1 = vld [vmem:[%s1971_s18] sm:$0xff]  ;;  %v1977_v2 = vld [vmem:[%s1971_s18 + $0x8] sm:$0xff]  ;;  %v197_v3 = vstv %s1588_s8  ;;  %v225_v8 = vstv %s1590_s10  ;;  %s1595_s29 = sld [smem:[#allocation3 + $0x81]]  ;;  %s1863_s30 = smov 124  }
  0x31   : > { %v212_v4 = vmul.f32 %v211_v0, %v1974_v1  ;;  %v198_v5 = vmul.f32 %v197_v3, %v1974_v1  ;;  %v213_v6 = vmul.f32 %v211_v0, %v1977_v2  ;;  %v199_v7 = vmul.f32 %v197_v3, %v1977_v2  ;;  %s1596_s4 = sld [smem:[#allocation3 + $0x82]]  ;;  %s1864_s5 = smov 123   ;;  %v2002_v20 = vld [vmem:[%s1971_s18 + $0x9] sm:$0xff]  ;;  %v2005_v22 = vld [vmem:[%s1971_s18 + $0x1] sm:$0xff] }
  0x32   : > { %v227_v9 = vmul.f32 %v225_v8, %v1977_v2  ;;  %v226_v10 = vmul.f32 %v225_v8, %v1974_v1  ;;  %v239_v11 = vstv %s1591_s20  ;;  %s1597_s6 = sld [smem:[#allocation3 + $0x83]]  ;;  %s1865_s7 = smov 122   ;;  %v2032_v40 = vld [vmem:[%s1971_s18 + $0xa] sm:$0xff]  ;;  %v2035_v42 = vld [vmem:[%s1971_s18 + $0x2] sm:$0xff] }
  0x33   : > { %216 = vrot.lane.b32.xlu1 %v212_v4, %s1860_s21  ;;  %202 = vrot.lane.b32.xlu0 %v198_v5, %s1861_s25  ;;  %v241_v12 = vmul.f32 %v239_v11, %v1977_v2  ;;  %v240_v13 = vmul.f32 %v239_v11, %v1974_v1  ;;  %s1598_s8 = sld [smem:[#allocation3 + $0x84]]  ;;  %s1599_s9 = sld [smem:[#allocation3 + $0x85]]  ;;  %v2062_v60 = vld [vmem:[%s1971_s18 + $0xb] sm:$0xff]  ;;  %v2065_v62 = vld [vmem:[%s1971_s18 + $0x3] sm:$0xff] }
  0x34   : > { %v253_v14 = vstv %s1592_s26  ;;  %v267_v17 = vstv %s1593_s27  ;;  %s1600_s10 = sld [smem:[#allocation3 + $0x86]]  ;;  %s1602_s11 = sld [smem:[#allocation3 + $0x101]] }
  0x35   : > { %v255_v15 = vmul.f32 %v253_v14, %v1977_v2  ;;  %v254_v16 = vmul.f32 %v253_v14, %v1974_v1  ;;  %v269_v18 = vmul.f32 %v267_v17, %v1977_v2  ;;  %v268_v19 = vmul.f32 %v267_v17, %v1974_v1  ;;  %s1603_s12 = sld [smem:[#allocation3 + $0x102]]  ;;  %s1604_s13 = sld [smem:[#allocation3 + $0x103]] }
  0x36   : > { %v289_v21 = vstv %s1595_s29  ;;  %s1605_s20 = sld [smem:[#allocation3 + $0x104]]  ;;  %s1606_s26 = sld [smem:[#allocation3 + $0x105]] }
  0x37   : > { %218 = vrot.lane.b32.xlu1 %v213_v6, %s1860_s21  ;;  %204 = vrot.lane.b32.xlu0 %v199_v7, %s1861_s25  ;;  %v291_v23 = vmul.f32 %v289_v21, %v2002_v20  ;;  %v290_v24 = vmul.f32 %v289_v21, %v2005_v22  ;;  %v303_v25 = vstv %s1596_s4  ;;  %s1607_s27 = sld [smem:[#allocation3 + $0x106]]  ;;  %s1609_s29 = sld [smem:[#allocation3 + $0x181]]  ;;  %v2095_v21 = vld [vmem:[%s1971_s18 + $0x4] sm:$0xff] }
  0x38   : > { %v305_v26 = vmul.f32 %v303_v25, %v2002_v20  ;;  %v304_v27 = vmul.f32 %v303_v25, %v2005_v22  ;;  %v317_v28 = vstv %s1597_s6  ;;  %s1610_s4 = sld [smem:[#allocation3 + $0x182]]  ;;  %s1611_s6 = sld [smem:[#allocation3 + $0x183]] }
  0x39   : > { %v319_v29 = vmul.f32 %v317_v28, %v2002_v20  ;;  %v318_v30 = vmul.f32 %v317_v28, %v2005_v22  ;;  %v331_v31 = vstv %s1598_s8  ;;  %v345_v34 = vstv %s1599_s9  ;;  %s1612_s8 = sld [smem:[#allocation3 + $0x184]]  ;;  %s1613_s9 = sld [smem:[#allocation3 + $0x185]] }
  0x3a   : > { %v333_v32 = vmul.f32 %v331_v31, %v2002_v20  ;;  %v332_v33 = vmul.f32 %v331_v31, %v2005_v22  ;;  %v347_v35 = vmul.f32 %v345_v34, %v2002_v20  ;;  %v346_v36 = vmul.f32 %v345_v34, %v2005_v22 }
  0x3b   : > { %232 = vrot.lane.b32.xlu1 %v227_v9, %s1862_s28  ;;  %230 = vrot.lane.b32.xlu0 %v226_v10, %s1862_s28  ;;  %v359_v37 = vstv %s1600_s10  ;;  %v381_v41 = vstv %s1602_s11  ;;  %s1614_s10 = sld [smem:[#allocation3 + $0x186]]  ;;  %s1616_s11 = sld [smem:[#allocation3 + $0x201]] }
  0x3c   : > { %v361_v38 = vmul.f32 %v359_v37, %v2002_v20  ;;  %v360_v39 = vmul.f32 %v359_v37, %v2005_v22  ;;  %v383_v43 = vmul.f32 %v381_v41, %v2032_v40  ;;  %v382_v44 = vmul.f32 %v381_v41, %v2035_v42 }
  0x3d   : > { %v395_v45 = vstv %s1603_s12  ;;  %v409_v48 = vstv %s1604_s13  ;;  %v423_v51 = vstv %s1605_s20  ;;  %v437_v54 = vstv %s1606_s26  ;;  %s1617_s12 = sld [smem:[#allocation3 + $0x202]]  ;;  %s1618_s13 = sld [smem:[#allocation3 + $0x203]] }
  0x3e   : > { %v397_v46 = vmul.f32 %v395_v45, %v2032_v40  ;;  %v396_v47 = vmul.f32 %v395_v45, %v2035_v42  ;;  %v411_v49 = vmul.f32 %v409_v48, %v2032_v40  ;;  %v410_v50 = vmul.f32 %v409_v48, %v2035_v42  ;;  %s1619_s20 = sld [smem:[#allocation3 + $0x204]]  ;;  %s1620_s26 = sld [smem:[#allocation3 + $0x205]] }
  0x3f   : > { %246 = vrot.lane.b32.xlu1 %v241_v12, %s1863_s30  ;;  %244 = vrot.lane.b32.xlu0 %v240_v13, %s1863_s30  ;;  %v425_v52 = vmul.f32 %v423_v51, %v2032_v40  ;;  %v424_v53 = vmul.f32 %v423_v51, %v2035_v42  ;;  %v439_v55 = vmul.f32 %v437_v54, %v2032_v40  ;;  %v451_v57 = vstv %s1607_s27  ;;  %s1621_s27 = sld [smem:[#allocation3 + $0x206]] }
  0x40   : > { %v438_v56 = vmul.f32 %v437_v54, %v2035_v42  ;;  %v453_v58 = vmul.f32 %v451_v57, %v2032_v40  ;;  %v452_v59 = vmul.f32 %v451_v57, %v2035_v42  ;;  %v473_v61 = vstv %s1609_s29  ;;  %s190_s29 = sld [smem:[#allocation3]] }
  0x41   : > { %v475_v63 = vmul.f32 %v473_v61, %v2062_v60  ;;  %v474_v0 = vmul.f32 %v473_v61, %v2065_v62  ;;  %v487_v3 = vstv %s1610_s4  ;;  %v501_v6 = vstv %s1611_s6  ;;  %s1623_s4 = sld [smem:[#allocation3 + $0x281]]  ;;  %s186_s6 = sld [smem:[#allocation2]] }
  0x42   : > { %v489_v4 = vmul.f32 %v487_v3, %v2062_v60  ;;  %v488_v5 = vmul.f32 %v487_v3, %v2065_v62  ;;  %v503_v7 = vmul.f32 %v501_v6, %v2062_v60  ;;  %v502_v8 = vmul.f32 %v501_v6, %v2065_v62 }
  0x43   : > { %260 = vrot.lane.b32.xlu1 %v255_v15, %s1864_s5  ;;  %258 = vrot.lane.b32.xlu0 %v254_v16, %s1864_s5  ;;  %v515_v9 = vstv %s1612_s8  ;;  %v529_v12 = vstv %s1613_s9  ;;  %s1624_s8 = sld [smem:[#allocation3 + $0x282]]  ;;  %s1625_s9 = sld [smem:[#allocation3 + $0x283]] }
  0x44   : > { %v517_v10 = vmul.f32 %v515_v9, %v2062_v60  ;;  %v516_v11 = vmul.f32 %v515_v9, %v2065_v62  ;;  %v531_v13 = vmul.f32 %v529_v12, %v2062_v60  ;;  %v530_v14 = vmul.f32 %v529_v12, %v2065_v62 }
  0x45   : > { %v543_v15 = vstv %s1614_s10  ;;  %v579_v25 = vstv %s1617_s12  ;;  %v593_v28 = vstv %s1618_s13  ;;  %v607_v31 = vstv %s1619_s20  ;;  %s1626_s10 = sld [smem:[#allocation3 + $0x284]]  ;;  %s2139_s12 = sld [smem:[#allocation3 + $0x285]] }
  0x46   : > { %v545_v16 = vmul.f32 %v543_v15, %v2062_v60  ;;  %v544_v17 = vmul.f32 %v543_v15, %v2065_v62  ;;  %v621_v34 = vstv %s1620_s26  ;;  %v635_v37 = vstv %s1621_s27  ;;  %s2145_s13 = sld [smem:[#allocation3 + $0x286]]  ;;  %s2153_s20 = sld [smem:[#allocation3 + $0x301]] }
  0x47   : > { %274 = vrot.lane.b32.xlu1 %v269_v18, %s1865_s7  ;;  %272 = vrot.lane.b32.xlu0 %v268_v19, %s1865_s7  ;;  %v2092_v18 = vld [vmem:[%s1971_s18 + $0xc] sm:$0xff]  ;;  %v565_v19 = vstv %s1616_s11  ;;  %v636_v41 = vmul.f32 %v635_v37, %v2095_v21  ;;  %s2137_s11 = sld [smem:[#allocation3 + $0x80]]  ;;  %s1631_s26 = sld [smem:[#allocation3 + $0x302]] }
  0x48   : > { %v657_v45 = vstv %s1623_s4  ;;  %s1632_s27 = sld [smem:[#allocation3 + $0x303]]  ;;  %s2181_s4 = sld [smem:[#allocation3 + $0x100]] }
  0x4b   : > { %296 = vrot.lane.b32.xlu1 %v291_v23, %s1861_s25  ;;  %294 = vrot.lane.b32.xlu0 %v290_v24, %s1861_s25  ;;  %v567_v23 = vmul.f32 %v565_v19, %v2092_v18  ;;  %v566_v24 = vmul.f32 %v565_v19, %v2095_v21  ;;  %v699_v6 = vstv %s1626_s10  ;;  %v713_v15 = vstv %s2139_s12  ;;  %s1640_s10 = sld [smem:[#allocation3 + $0x402]]  ;;  %s1642_s12 = sld [smem:[#allocation3 + $0x404]] }
  0x4f   : > { %310 = vrot.lane.b32.xlu1 %v305_v26, %s1860_s21  ;;  %308 = vrot.lane.b32.xlu0 %v304_v27, %s1860_s21  ;;  %v581_v26 = vmul.f32 %v579_v25, %v2092_v18  ;;  %v580_v27 = vmul.f32 %v579_v25, %v2095_v21 }
  0x53   : > { %324 = vrot.lane.b32.xlu1 %v319_v29, %s1862_s28  ;;  %322 = vrot.lane.b32.xlu0 %v318_v30, %s1862_s28  ;;  %v595_v29 = vmul.f32 %v593_v28, %v2092_v18  ;;  %v594_v30 = vmul.f32 %v593_v28, %v2095_v21 }
  0x57   : > { %338 = vrot.lane.b32.xlu1 %v333_v32, %s1863_s30  ;;  %336 = vrot.lane.b32.xlu0 %v332_v33, %s1863_s30  ;;  %v609_v32 = vmul.f32 %v607_v31, %v2092_v18  ;;  %v608_v33 = vmul.f32 %v607_v31, %v2095_v21 }
  0x5b   : > { %352 = vrot.lane.b32.xlu1 %v347_v35, %s1864_s5  ;;  %350 = vrot.lane.b32.xlu0 %v346_v36, %s1864_s5  ;;  %v623_v35 = vmul.f32 %v621_v34, %v2092_v18  ;;  %v622_v36 = vmul.f32 %v621_v34, %v2095_v21 }
  0x5f   : > { %366 = vrot.lane.b32.xlu1 %v361_v38, %s1865_s7  ;;  %364 = vrot.lane.b32.xlu0 %v360_v39, %s1865_s7  ;;  %v191_v38 = vstv %s190_s29  ;;  %v637_v39 = vmul.f32 %v635_v37, %v2092_v18  ;;  %s1633_s29 = sld [smem:[#allocation3 + $0x304]] }
  0x63   : > { %388 = vrot.lane.b32.xlu1 %v383_v43, %s1861_s25  ;;  %386 = vrot.lane.b32.xlu0 %v382_v44, %s1861_s25  ;;  %v193_v43 = vmul.f32 %v191_v38, %v1977_v2  ;;  %v2123_v44 = vld [vmem:[%s1971_s18 + $0xd] sm:$0xff] }
  0x64   : > { %v659_v51 = vmul.f32 %v657_v45, %v2123_v44  ;;  %v715_v25 = vmul.f32 %v713_v15, %v2123_v44 }
  0x67   : > { %402 = vrot.lane.b32.xlu1 %v397_v46, %s1860_s21  ;;  %400 = vrot.lane.b32.xlu0 %v396_v47, %s1860_s21  ;;  %v2126_v46 = vld [vmem:[%s1971_s18 + $0x5] sm:$0xff] }
  0x6b   : > { %416 = vrot.lane.b32.xlu1 %v411_v49, %s1862_s28  ;;  %414 = vrot.lane.b32.xlu0 %v410_v50, %s1862_s28  ;;  %v192_v49 = vmul.f32 %v191_v38, %v1974_v1  ;;  %v187_v50 = vstv %s186_s6  ;;  %v2167_v38 = vld [vmem:[%s1971_s18 + $0xe] sm:$0xff]  ;;  %s2183_s6 = sld [smem:[#allocation3 + $0x305]] }
  0x6c   : > { %v195_v2 = vadd.f32 %v193_v43, %v187_v50 }
  0x6f   : > { %430 = vrot.lane.b32.xlu1 %v425_v52, %s1863_s30  ;;  %428 = vrot.lane.b32.xlu0 %v424_v53, %s1863_s30  ;;  %v658_v52 = vmul.f32 %v657_v45, %v2126_v46  ;;  %v671_v53 = vstv %s1624_s8  ;;  %s2189_s8 = sld [smem:[#allocation3 + $0x306]] }
  0x70   : > { %v673_v1 = vmul.f32 %v671_v53, %v2123_v44  ;;  %v672_v57 = vmul.f32 %v671_v53, %v2126_v46 }
  0x73   : > { %444 = vrot.lane.b32.xlu1 %v439_v55, %s1864_s5  ;;  %442 = vrot.lane.b32.xlu0 %v438_v56, %s1864_s5  ;;  %v194_v56 = vadd.f32 %v192_v49, %v187_v50 }
  0x77   : > { %458 = vrot.lane.b32.xlu1 %v453_v58, %s1865_s7  ;;  %456 = vrot.lane.b32.xlu0 %v452_v59, %s1865_s7  ;;  %v685_v59 = vstv %s1625_s9  ;;  %s2197_s9 = sld [smem:[#allocation3 + $0x401]] }
  0x78   : > { %v687_v3 = vmul.f32 %v685_v59, %v2123_v44 }
  0x7b   : > { %480 = vrot.lane.b32.xlu1 %v475_v63, %s1861_s25  ;;  %478 = vrot.lane.b32.xlu0 %v474_v0, %s1861_s25 }
  0x7f   : > { %494 = vrot.lane.b32.xlu1 %v489_v4, %s1860_s21  ;;  %492 = vrot.lane.b32.xlu0 %v488_v5, %s1860_s21  ;;  %v686_v4 = vmul.f32 %v685_v59, %v2126_v46 }
  0x83   : > { %508 = vrot.lane.b32.xlu1 %v503_v7, %s1862_s28  ;;  %506 = vrot.lane.b32.xlu0 %v502_v8, %s1862_s28 }
  0x87   : > { %522 = vrot.lane.b32.xlu1 %v517_v10, %s1863_s30  ;;  %520 = vrot.lane.b32.xlu0 %v516_v11, %s1863_s30  ;;  %v701_v10 = vmul.f32 %v699_v6, %v2123_v44  ;;  %v700_v11 = vmul.f32 %v699_v6, %v2126_v46 }
  0x8b   : > { %536 = vrot.lane.b32.xlu1 %v531_v13, %s1864_s5  ;;  %534 = vrot.lane.b32.xlu0 %v530_v14, %s1864_s5  ;;  %v283_v14 = vstv %s2137_s11  ;;  %s1641_s11 = sld [smem:[#allocation3 + $0x403]] }
  0x8f   : > { %550 = vrot.lane.b32.xlu1 %v545_v16, %s1865_s7  ;;  %548 = vrot.lane.b32.xlu0 %v544_v17, %s1865_s7 }
  0x93   : > { %572 = vrot.lane.b32.xlu1 %v567_v23, %s1861_s25  ;;  %570 = vrot.lane.b32.xlu0 %v566_v24, %s1861_s25  ;;  %v285_v24 = vmul.f32 %v283_v14, %v2002_v20 }
  0x97   : > { %586 = vrot.lane.b32.xlu1 %v581_v26, %s1860_s21  ;;  %584 = vrot.lane.b32.xlu0 %v580_v27, %s1860_s21  ;;  %v714_v26 = vmul.f32 %v713_v15, %v2126_v46 }
  0x9b   : > { %600 = vrot.lane.b32.xlu1 %v595_v29, %s1862_s28  ;;  %598 = vrot.lane.b32.xlu0 %v594_v30, %s1862_s28  ;;  %v284_v29 = vmul.f32 %v283_v14, %v2005_v22  ;;  %v727_v30 = vstv %s2145_s13  ;;  %v2171_v22 = vld [vmem:[%s1971_s18 + $0x6] sm:$0xff]  ;;  %s2225_s13 = sld [smem:[#allocation3 + $0x180]] }
  0x9c   : > { %v729_v20 = vmul.f32 %v727_v30, %v2123_v44 }
  0x9f   : > { %614 = vrot.lane.b32.xlu1 %v609_v32, %s1863_s30  ;;  %612 = vrot.lane.b32.xlu0 %v608_v33, %s1863_s30 }
  0xa3   : > { %628 = vrot.lane.b32.xlu1 %v623_v35, %s1864_s5  ;;  %626 = vrot.lane.b32.xlu0 %v622_v36, %s1864_s5  ;;  %v728_v35 = vmul.f32 %v727_v30, %v2126_v46 }
  0xa5   : > { %v217_v47 = vpop.permute.xlu1 %216  ;;  %v203_v48 = vpop.permute.xlu0 %202 }
  0xa6   : > { %v208_v0 = vadd.f32 %v203_v48, %v194_v56  ;;  %v763_v48 = vstv %s1631_s26  ;;  %s2233_s26 = sld [smem:[#allocation3 + $0x406]] }
  0xa7   : > { %642 = vrot.lane.b32.xlu1 %v637_v39, %s1865_s7  ;;  %640 = vrot.lane.b32.xlu0 %v636_v41, %s1865_s7  ;;  %v749_v39 = vstv %s2153_s20  ;;  %s2227_s20 = sld [smem:[#allocation3 + $0x405]] }
  0xa8   : > { %v222_v9 = vadd.f32 %v217_v47, %v208_v0  ;;  %v751_v45 = vmul.f32 %v749_v39, %v2167_v38  ;;  %v750_v47 = vmul.f32 %v749_v39, %v2171_v22 }
  0xa9   : > { %v219_v54 = vpop.permute.xlu1 %218  ;;  %v205_v55 = vpop.permute.xlu0 %204 }
  0xaa   : > { %v209_v58 = vadd.f32 %v205_v55, %v195_v2  ;;  %v777_v2 = vstv %s1632_s27  ;;  %s2241_s27 = sld [smem:[#allocation3 + $0x481]] }
  0xab   : > { %664 = vrot.lane.b32.xlu1 %v659_v51, %s1861_s25  ;;  %662 = vrot.lane.b32.xlu0 %v658_v52, %s1861_s25  ;;  %v765_v51 = vmul.f32 %v763_v48, %v2167_v38  ;;  %v764_v52 = vmul.f32 %v763_v48, %v2171_v22  ;;  %v779_v55 = vmul.f32 %v777_v2, %v2167_v38 }
  0xac   : > { %v223_v5 = vadd.f32 %v219_v54, %v209_v58  ;;  %v778_v56 = vmul.f32 %v777_v2, %v2171_v22  ;;  %v791_v58 = vstv %s1633_s29  ;;  %v884_v2 = vstv %s1642_s12  ;;  %s1649_s29 = sld [smem:[#allocation3 + $0x482]] }
  0xad   : > { %v233_v61 = vpop.permute.xlu1 %232  ;;  %v231_v63 = vpop.permute.xlu0 %230  ;;  %s1658_s12 = sld [smem:[#allocation3 + $0x502]] }
  0xae   : > { %v237_v12 = vadd.f32 %v233_v61, %v223_v5  ;;  %v236_v13 = vadd.f32 %v231_v63, %v222_v9 }
  0xaf   : > { %678 = vrot.lane.b32.xlu1 %v673_v1, %s1860_s21  ;;  %676 = vrot.lane.b32.xlu0 %v672_v57, %s1860_s21 }
  0xb1   : > { %v247_v7 = vpop.permute.xlu1 %246  ;;  %v245_v8 = vpop.permute.xlu0 %244 }
  0xb2   : > { %v251_v19 = vadd.f32 %v247_v7, %v237_v12  ;;  %v250_v23 = vadd.f32 %v245_v8, %v236_v13  ;;  %v375_v7 = vstv %s2181_s4  ;;  %v805_v8 = vstv %s2183_s6  ;;  %s1650_s4 = sld [smem:[#allocation3 + $0x483]]  ;;  %s1651_s6 = sld [smem:[#allocation3 + $0x484]] }
  0xb3   : > { %692 = vrot.lane.b32.xlu1 %v687_v3, %s1862_s28  ;;  %690 = vrot.lane.b32.xlu0 %v686_v4, %s1862_s28  ;;  %v793_v3 = vmul.f32 %v791_v58, %v2167_v38  ;;  %v792_v4 = vmul.f32 %v791_v58, %v2171_v22  ;;  %v377_v13 = vmul.f32 %v375_v7, %v2032_v40 }
  0xb4   : > { %v807_v14 = vmul.f32 %v805_v8, %v2167_v38  ;;  %v806_v15 = vmul.f32 %v805_v8, %v2171_v22 }
  0xb5   : > { %v261_v16 = vpop.permute.xlu1 %260  ;;  %v259_v17 = vpop.permute.xlu0 %258 }
  0xb6   : > { %v265_v27 = vadd.f32 %v261_v16, %v251_v19  ;;  %v264_v28 = vadd.f32 %v259_v17, %v250_v23  ;;  %v376_v19 = vmul.f32 %v375_v7, %v2035_v42  ;;  %v819_v23 = vstv %s2189_s8  ;;  %v2215_v42 = vld [vmem:[%s1971_s18 + $0x18] sm:$0xff]  ;;  %s2269_s8 = sld [smem:[#allocation3 + $0x200]] }
  0xb7   : > { %706 = vrot.lane.b32.xlu1 %v701_v10, %s1863_s30  ;;  %704 = vrot.lane.b32.xlu0 %v700_v11, %s1863_s30  ;;  %v821_v40 = vmul.f32 %v819_v23, %v2167_v38 }
  0xb9   : > { %v275_v31 = vpop.permute.xlu1 %274  ;;  %v273_v32 = vpop.permute.xlu0 %272 }
  0xba   : > { %v279_v33 = vadd.f32 %v275_v31, %v265_v27  ;;  %v278_v34 = vadd.f32 %v273_v32, %v264_v28  ;;  %v820_v28 = vmul.f32 %v819_v23, %v2171_v22  ;;  %v2211_v31 = vld [vmem:[%s1971_s18 + $0x20] sm:$0xff]  ;;  %v842_v32 = vstv %s2197_s9  ;;  %s2271_s9 = sld [smem:[#allocation3 + $0x485]] }
  0xbb   : > { %720 = vrot.lane.b32.xlu1 %v715_v25, %s1864_s5  ;;  %718 = vrot.lane.b32.xlu0 %v714_v26, %s1864_s5 }
  0xbc   : > { %v287_v36 = vadd.f32 %v285_v24, %v279_v33  ;;  %v286_v37 = vadd.f32 %v284_v29, %v278_v34 }
  0xbd   : > { %v297_v41 = vpop.permute.xlu1 %296  ;;  %v295_v43 = vpop.permute.xlu0 %294 }
  0xbe   : > { %v301_v1 = vadd.f32 %v297_v41, %v287_v36  ;;  %v300_v57 = vadd.f32 %v295_v43, %v286_v37  ;;  %v856_v36 = vstv %s1640_s10  ;;  %s2277_s10 = sld [smem:[#allocation3 + $0x486]] }
  0xbf   : > { %734 = vrot.lane.b32.xlu1 %v729_v20, %s1865_s7  ;;  %732 = vrot.lane.b32.xlu0 %v728_v35, %s1865_s7  ;;  %v844_v20 = vmul.f32 %v2211_v31, %v842_v32  ;;  %v843_v35 = vmul.f32 %v2215_v42, %v842_v32  ;;  %v858_v41 = vmul.f32 %v2211_v31, %v856_v36 }
  0xc0   : > { %v857_v43 = vmul.f32 %v2215_v42, %v856_v36 }
  0xc1   : > { %v311_v49 = vpop.permute.xlu1 %310  ;;  %v309_v50 = vpop.permute.xlu0 %308 }
  0xc2   : > { %v315_v63 = vadd.f32 %v311_v49, %v301_v1  ;;  %v314_v0 = vadd.f32 %v309_v50, %v300_v57  ;;  %v886_v1 = vmul.f32 %v2211_v31, %v884_v2  ;;  %v885_v57 = vmul.f32 %v2215_v42, %v884_v2 }
  0xc3   : > { %756 = vrot.lane.b32.xlu1 %v751_v45, %s1861_s25  ;;  %754 = vrot.lane.b32.xlu0 %v750_v47, %s1861_s25  ;;  %v870_v45 = vstv %s1641_s11  ;;  %s2285_s11 = sld [smem:[#allocation3 + $0x501]] }
  0xc4   : > { %v872_v49 = vmul.f32 %v2211_v31, %v870_v45  ;;  %v871_v50 = vmul.f32 %v2215_v42, %v870_v45  ;;  %v976_v45 = vstv %s1651_s6  ;;  %s2329_s6 = sld [smem:[#allocation3 + $0x582]] }
  0xc5   : > { %v325_v53 = vpop.permute.xlu1 %324  ;;  %v323_v54 = vpop.permute.xlu0 %322 }
  0xc6   : > { %v329_v5 = vadd.f32 %v325_v53, %v315_v63  ;;  %v328_v6 = vadd.f32 %v323_v54, %v314_v0  ;;  %v898_v63 = vstv %s2227_s20  ;;  %s1660_s20 = sld [smem:[#allocation3 + $0x504]] }
  0xc7   : > { %770 = vrot.lane.b32.xlu1 %v765_v51, %s1860_s21  ;;  %768 = vrot.lane.b32.xlu0 %v764_v52, %s1860_s21  ;;  %v900_v7 = vmul.f32 %v2211_v31, %v898_v63  ;;  %v899_v8 = vmul.f32 %v2215_v42, %v898_v63 }
  0xc9   : > { %v339_v59 = vpop.permute.xlu1 %338  ;;  %v337_v61 = vpop.permute.xlu0 %336 }
  0xca   : > { %v343_v11 = vadd.f32 %v339_v59, %v329_v5  ;;  %v342_v12 = vadd.f32 %v337_v61, %v328_v6  ;;  %v467_v61 = vstv %s2225_s13  ;;  %s1659_s13 = sld [smem:[#allocation3 + $0x503]] }
  0xcb   : > { %784 = vrot.lane.b32.xlu1 %v779_v55, %s1862_s28  ;;  %782 = vrot.lane.b32.xlu0 %v778_v56, %s1862_s28  ;;  %v469_v6 = vmul.f32 %v467_v61, %v2062_v60 }
  0xcd   : > { %v353_v9 = vpop.permute.xlu1 %352  ;;  %v351_v10 = vpop.permute.xlu0 %350 }
  0xce   : > { %v357_v16 = vadd.f32 %v353_v9, %v343_v11  ;;  %v356_v17 = vadd.f32 %v351_v10, %v342_v12  ;;  %v468_v11 = vmul.f32 %v467_v61, %v2065_v62  ;;  %v912_v12 = vstv %s2233_s26  ;;  %v2259_v62 = vld [vmem:[%s1971_s18 + $0x19] sm:$0xff]  ;;  %s1661_s26 = sld [smem:[#allocation3 + $0x505]] }
  0xcf   : > { %798 = vrot.lane.b32.xlu1 %v793_v3, %s1863_s30  ;;  %796 = vrot.lane.b32.xlu0 %v792_v4, %s1863_s30  ;;  %v914_v60 = vmul.f32 %v2211_v31, %v912_v12 }
  0xd1   : > { %v367_v24 = vpop.permute.xlu1 %366  ;;  %v365_v25 = vpop.permute.xlu0 %364 }
  0xd2   : > { %v371_v26 = vadd.f32 %v367_v24, %v357_v16  ;;  %v370_v27 = vadd.f32 %v365_v25, %v356_v17  ;;  %v913_v17 = vmul.f32 %v2215_v42, %v912_v12  ;;  %v2255_v24 = vld [vmem:[%s1971_s18 + $0x21] sm:$0xff]  ;;  %v934_v25 = vstv %s2241_s27  ;;  %s1662_s27 = sld [smem:[#allocation3 + $0x506]] }
  0xd3   : > { %812 = vrot.lane.b32.xlu1 %v807_v14, %s1864_s5  ;;  %810 = vrot.lane.b32.xlu0 %v806_v15, %s1864_s5 }
  0xd4   : > { %v379_v29 = vadd.f32 %v377_v13, %v371_v26  ;;  %v378_v30 = vadd.f32 %v376_v19, %v370_v27 }
  0xd5   : > { %v389_v33 = vpop.permute.xlu1 %388  ;;  %v387_v34 = vpop.permute.xlu0 %386 }
  0xd6   : > { %v393_v51 = vadd.f32 %v389_v33, %v379_v29  ;;  %v392_v52 = vadd.f32 %v387_v34, %v378_v30  ;;  %v948_v29 = vstv %s1649_s29  ;;  %s2321_s29 = sld [smem:[#allocation3 + $0x280]] }
  0xd7   : > { %826 = vrot.lane.b32.xlu1 %v821_v40, %s1865_s7  ;;  %824 = vrot.lane.b32.xlu0 %v820_v28, %s1865_s7  ;;  %v936_v40 = vmul.f32 %v2255_v24, %v934_v25  ;;  %v935_v28 = vmul.f32 %v2259_v62, %v934_v25  ;;  %v950_v33 = vmul.f32 %v2255_v24, %v948_v29 }
  0xd8   : > { %v949_v34 = vmul.f32 %v2259_v62, %v948_v29 }
  0xd9   : > { %v403_v37 = vpop.permute.xlu1 %402  ;;  %v401_v39 = vpop.permute.xlu0 %400 }
  0xda   : > { %v407_v55 = vadd.f32 %v403_v37, %v393_v51  ;;  %v406_v56 = vadd.f32 %v401_v39, %v392_v52  ;;  %v978_v51 = vmul.f32 %v2255_v24, %v976_v45  ;;  %v977_v52 = vmul.f32 %v2259_v62, %v976_v45 }
  0xdb   : > { %849 = vrot.lane.b32.xlu1 %v844_v20, %s1861_s25  ;;  %847 = vrot.lane.b32.xlu0 %v843_v35, %s1861_s25  ;;  %v962_v20 = vstv %s1650_s4  ;;  %s2323_s4 = sld [smem:[#allocation3 + $0x581]] }
  0xdc   : > { %v964_v37 = vmul.f32 %v2255_v24, %v962_v20  ;;  %v963_v39 = vmul.f32 %v2259_v62, %v962_v20 }
  0xdd   : > { %v417_v47 = vpop.permute.xlu1 %416  ;;  %v415_v48 = vpop.permute.xlu0 %414 }
  0xde   : > { %v421_v58 = vadd.f32 %v417_v47, %v407_v55  ;;  %v420_v59 = vadd.f32 %v415_v48, %v406_v56  ;;  %v990_v55 = vstv %s2271_s9  ;;  %s1669_s9 = sld [smem:[#allocation3 + $0x584]] }
  0xdf   : > { %863 = vrot.lane.b32.xlu1 %v858_v41, %s1860_s21  ;;  %861 = vrot.lane.b32.xlu0 %v857_v43, %s1860_s21  ;;  %v992_v61 = vmul.f32 %v2255_v24, %v990_v55  ;;  %v991_v63 = vmul.f32 %v2259_v62, %v990_v55 }
  0xe1   : > { %v431_v53 = vpop.permute.xlu1 %430  ;;  %v429_v54 = vpop.permute.xlu0 %428 }
  0xe2   : > { %v435_v4 = vadd.f32 %v431_v53, %v421_v58  ;;  %v434_v5 = vadd.f32 %v429_v54, %v420_v59  ;;  %v559_v54 = vstv %s2269_s8  ;;  %s2343_s8 = sld [smem:[#allocation3 + $0x583]] }
  0xe3   : > { %877 = vrot.lane.b32.xlu1 %v872_v49, %s1862_s28  ;;  %875 = vrot.lane.b32.xlu0 %v871_v50, %s1862_s28  ;;  %v561_v59 = vmul.f32 %v559_v54, %v2092_v18 }
  0xe5   : > { %v445_v0 = vpop.permute.xlu1 %444  ;;  %v443_v3 = vpop.permute.xlu0 %442 }
  0xe6   : > { %v449_v9 = vadd.f32 %v445_v0, %v435_v4  ;;  %v448_v10 = vadd.f32 %v443_v3, %v434_v5  ;;  %v560_v4 = vmul.f32 %v559_v54, %v2095_v21  ;;  %v1004_v5 = vstv %s2277_s10  ;;  %v2303_v21 = vld [vmem:[%s1971_s18 + $0x1a] sm:$0xff]  ;;  %s2357_s10 = sld [smem:[#allocation3 + $0x300]] }
  0xe7   : > { %891 = vrot.lane.b32.xlu1 %v886_v1, %s1863_s30  ;;  %889 = vrot.lane.b32.xlu0 %v885_v57, %s1863_s30  ;;  %v1006_v18 = vmul.f32 %v2255_v24, %v1004_v5 }
  0xe9   : > { %v459_v13 = vpop.permute.xlu1 %458  ;;  %v457_v14 = vpop.permute.xlu0 %456 }
  0xea   : > { %v463_v15 = vadd.f32 %v459_v13, %v449_v9  ;;  %v462_v16 = vadd.f32 %v457_v14, %v448_v10  ;;  %v1005_v10 = vmul.f32 %v2259_v62, %v1004_v5  ;;  %v2299_v13 = vld [vmem:[%s1971_s18 + $0x22] sm:$0xff]  ;;  %v1026_v14 = vstv %s2285_s11  ;;  %s2359_s11 = sld [smem:[#allocation3 + $0x585]] }
  0xeb   : > { %905 = vrot.lane.b32.xlu1 %v900_v7, %s1864_s5  ;;  %903 = vrot.lane.b32.xlu0 %v899_v8, %s1864_s5 }
  0xec   : > { %v471_v19 = vadd.f32 %v469_v6, %v463_v15  ;;  %v470_v23 = vadd.f32 %v468_v11, %v462_v16 }
  0xed   : > { %v481_v26 = vpop.permute.xlu1 %480  ;;  %v479_v27 = vpop.permute.xlu0 %478 }
  0xee   : > { %v485_v41 = vadd.f32 %v481_v26, %v471_v19  ;;  %v484_v43 = vadd.f32 %v479_v27, %v470_v23  ;;  %v1040_v19 = vstv %s1658_s12  ;;  %s2365_s12 = sld [smem:[#allocation3 + $0x586]] }
  0xef   : > { %919 = vrot.lane.b32.xlu1 %v914_v60, %s1865_s7  ;;  %917 = vrot.lane.b32.xlu0 %v913_v17, %s1865_s7  ;;  %v1028_v60 = vmul.f32 %v2299_v13, %v1026_v14  ;;  %v1027_v17 = vmul.f32 %v2303_v21, %v1026_v14  ;;  %v1042_v26 = vmul.f32 %v2299_v13, %v1040_v19 }
  0xf0   : > { %v1041_v27 = vmul.f32 %v2303_v21, %v1040_v19 }
  0xf1   : > { %v495_v30 = vpop.permute.xlu1 %494  ;;  %v493_v32 = vpop.permute.xlu0 %492 }
  0xf2   : > { %v499_v49 = vadd.f32 %v495_v30, %v485_v41  ;;  %v498_v50 = vadd.f32 %v493_v32, %v484_v43 }
  0xf3   : > { %941 = vrot.lane.b32.xlu1 %v936_v40, %s1861_s25  ;;  %939 = vrot.lane.b32.xlu0 %v935_v28, %s1861_s25  ;;  %v1054_v40 = vstv %s1659_s13  ;;  %s2373_s13 = sld [smem:[#allocation3 + $0x601]] }
  0xf4   : > { %v1056_v30 = vmul.f32 %v2299_v13, %v1054_v40  ;;  %v1055_v32 = vmul.f32 %v2303_v21, %v1054_v40  ;;  %v1160_v40 = vstv %s1669_s9  ;;  %s2423_s9 = sld [smem:[#allocation3 + $0x682]] }
  0xf5   : > { %v509_v35 = vpop.permute.xlu1 %508  ;;  %v507_v36 = vpop.permute.xlu0 %506 }
  0xf6   : > { %v513_v2 = vadd.f32 %v509_v35, %v499_v49  ;;  %v512_v53 = vadd.f32 %v507_v36, %v498_v50 }
  0xf7   : > { %955 = vrot.lane.b32.xlu1 %v950_v33, %s1860_s21  ;;  %953 = vrot.lane.b32.xlu0 %v949_v34, %s1860_s21  ;;  %v1068_v33 = vstv %s1660_s20  ;;  %s2382_s20 = sld [smem:[#allocation3 + $0x602]] }
  0xf8   : > { %v1070_v35 = vmul.f32 %v2299_v13, %v1068_v33  ;;  %v1069_v36 = vmul.f32 %v2303_v21, %v1068_v33 }
  0xf9   : > { %v523_v47 = vpop.permute.xlu1 %522  ;;  %v521_v48 = vpop.permute.xlu0 %520 }
  0xfa   : > { %v527_v57 = vadd.f32 %v523_v47, %v513_v2  ;;  %v526_v58 = vadd.f32 %v521_v48, %v512_v53 }
  0xfb   : > { %969 = vrot.lane.b32.xlu1 %v964_v37, %s1862_s28  ;;  %967 = vrot.lane.b32.xlu0 %v963_v39, %s1862_s28  ;;  %v1082_v37 = vstv %s1661_s26  ;;  %s1677_s26 = sld [smem:[#allocation3 + $0x603]] }
  0xfc   : > { %v1084_v47 = vmul.f32 %v2299_v13, %v1082_v37  ;;  %v1083_v48 = vmul.f32 %v2303_v21, %v1082_v37  ;;  %v1174_v37 = vstv %s2359_s11  ;;  %s1687_s11 = sld [smem:[#allocation3 + $0x684]] }
  0xfd   : > { %v537_v56 = vpop.permute.xlu1 %536  ;;  %v535_v1 = vpop.permute.xlu0 %534 }
  0xfe   : > { %v541_v0 = vadd.f32 %v537_v56, %v527_v57  ;;  %v540_v3 = vadd.f32 %v535_v1, %v526_v58  ;;  %v651_v58 = vstv %s2321_s29  ;;  %s1679_s29 = sld [smem:[#allocation3 + $0x605]] }
  0xff   : > { %983 = vrot.lane.b32.xlu1 %v978_v51, %s1863_s30  ;;  %981 = vrot.lane.b32.xlu0 %v977_v52, %s1863_s30  ;;  %v1096_v51 = vstv %s1662_s27  ;;  %s1678_s27 = sld [smem:[#allocation3 + $0x604]] }
 0x100   : > { %v1098_v55 = vmul.f32 %v2299_v13, %v1096_v51  ;;  %v1097_v56 = vmul.f32 %v2303_v21, %v1096_v51 }
 0x101   : > { %v551_v6 = vpop.permute.xlu1 %550  ;;  %v549_v7 = vpop.permute.xlu0 %548 }
 0x102   : > { %v555_v8 = vadd.f32 %v551_v6, %v541_v0  ;;  %v554_v9 = vadd.f32 %v549_v7, %v540_v3  ;;  %v653_v6 = vmul.f32 %v651_v58, %v2123_v44 }
 0x103   : > { %997 = vrot.lane.b32.xlu1 %v992_v61, %s1864_s5  ;;  %995 = vrot.lane.b32.xlu0 %v991_v63, %s1864_s5  ;;  %v1118_v61 = vstv %s2323_s4  ;;  %v2341_v63 = vld [vmem:[%s1971_s18 + $0x1b] sm:$0xff]  ;;  %s1638_s4 = sld [smem:[#allocation3 + $0x400]] }
 0x104   : > { %v563_v11 = vadd.f32 %v561_v59, %v555_v8  ;;  %v562_v12 = vadd.f32 %v560_v4, %v554_v9  ;;  %v2337_v59 = vld [vmem:[%s1971_s18 + $0x23] sm:$0xff]  ;;  %v1119_v8 = vmul.f32 %v2341_v63, %v1118_v61 }
 0x105   : > { %v573_v15 = vpop.permute.xlu1 %572  ;;  %v571_v16 = vpop.permute.xlu0 %570  ;;  %v1120_v7 = vmul.f32 %v2337_v59, %v1118_v61  ;;  %v1162_v33 = vmul.f32 %v2337_v59, %v1160_v40  ;;  %v2389_v61 = vld [vmem:[%s1971_s18 + $0x24] sm:$0xff] }
 0x106   : > { %v577_v43 = vadd.f32 %v573_v15, %v563_v11  ;;  %v576_v45 = vadd.f32 %v571_v16, %v562_v12  ;;  %v1132_v11 = vstv %s2329_s6  ;;  %s2408_s6 = sld [smem:[#allocation3 + $0x606]] }
 0x107   : > { %1011 = vrot.lane.b32.xlu1 %v1006_v18, %s1865_s7  ;;  %1009 = vrot.lane.b32.xlu0 %v1005_v10, %s1865_s7  ;;  %v652_v18 = vmul.f32 %v651_v58, %v2126_v46  ;;  %v1134_v44 = vmul.f32 %v2337_v59, %v1132_v11  ;;  %v1133_v15 = vmul.f32 %v2341_v63, %v1132_v11 }
 0x109   : > { %v587_v23 = vpop.permute.xlu1 %586  ;;  %v585_v25 = vpop.permute.xlu0 %584 }
 0x10a   : > { %v591_v49 = vadd.f32 %v587_v23, %v577_v43  ;;  %v590_v50 = vadd.f32 %v585_v25, %v576_v45 }
 0x10b   : > { %1033 = vrot.lane.b32.xlu1 %v1028_v60, %s1861_s25  ;;  %1031 = vrot.lane.b32.xlu0 %v1027_v17, %s1861_s25  ;;  %v1146_v17 = vstv %s2343_s8  ;;  %s2414_s8 = sld [smem:[#allocation3 + $0x681]] }
 0x10c   : > { %v1148_v23 = vmul.f32 %v2337_v59, %v1146_v17  ;;  %v1147_v25 = vmul.f32 %v2341_v63, %v1146_v17 }
 0x10d   : > { %v601_v28 = vpop.permute.xlu1 %600  ;;  %v599_v29 = vpop.permute.xlu0 %598 }
 0x10e   : > { %v605_v53 = vadd.f32 %v601_v28, %v591_v49  ;;  %v604_v54 = vadd.f32 %v599_v29, %v590_v50  ;;  %v1175_v49 = vmul.f32 %v2341_v63, %v1174_v37 }
 0x10f   : > { %1047 = vrot.lane.b32.xlu1 %v1042_v26, %s1860_s21  ;;  %1045 = vrot.lane.b32.xlu0 %v1041_v27, %s1860_s21 }
 0x111   : > { %v615_v34 = vpop.permute.xlu1 %614  ;;  %v613_v20 = vpop.permute.xlu0 %612 }
 0x112   : > { %v619_v1 = vadd.f32 %v615_v34, %v605_v53  ;;  %v618_v57 = vadd.f32 %v613_v20, %v604_v54  ;;  %v1161_v34 = vmul.f32 %v2341_v63, %v1160_v40 }
 0x113   : > { %1061 = vrot.lane.b32.xlu1 %v1056_v30, %s1862_s28  ;;  %1059 = vrot.lane.b32.xlu0 %v1055_v32, %s1862_s28 }
 0x115   : > { %v629_v39 = vpop.permute.xlu1 %628  ;;  %v627_v41 = vpop.permute.xlu0 %626 }
 0x116   : > { %v633_v4 = vadd.f32 %v629_v39, %v619_v1  ;;  %v632_v5 = vadd.f32 %v627_v41, %v618_v57 }
 0x117   : > { %1075 = vrot.lane.b32.xlu1 %v1070_v35, %s1863_s30  ;;  %1073 = vrot.lane.b32.xlu0 %v1069_v36, %s1863_s30  ;;  %v743_v36 = vstv %s2357_s10  ;;  %s1686_s10 = sld [smem:[#allocation3 + $0x683]] }
 0x119   : > { %v643_v52 = vpop.permute.xlu1 %642  ;;  %v641_v2 = vpop.permute.xlu0 %640 }
 0x11a   : > { %v647_v9 = vadd.f32 %v643_v52, %v633_v4  ;;  %v646_v10 = vadd.f32 %v641_v2, %v632_v5  ;;  %v744_v52 = vmul.f32 %v743_v36, %v2171_v22  ;;  %v1188_v2 = vstv %s2365_s12  ;;  %s1688_s12 = sld [smem:[#allocation3 + $0x685]] }
 0x11b   : > { %1089 = vrot.lane.b32.xlu1 %v1084_v47, %s1864_s5  ;;  %1087 = vrot.lane.b32.xlu0 %v1083_v48, %s1864_s5  ;;  %v745_v47 = vmul.f32 %v743_v36, %v2167_v38  ;;  %v1176_v48 = vmul.f32 %v2337_v59, %v1174_v37  ;;  %v1190_v38 = vmul.f32 %v2337_v59, %v1188_v2  ;;  %v1210_v22 = vstv %s2373_s13  ;;  %s1689_s13 = sld [smem:[#allocation3 + $0x686]] }
 0x11c   : > { %v655_v16 = vadd.f32 %v653_v6, %v647_v9  ;;  %v654_v60 = vadd.f32 %v652_v18, %v646_v10  ;;  %v1189_v1 = vmul.f32 %v2341_v63, %v1188_v2  ;;  %v1224_v9 = vstv %s2382_s20  ;;  %s1693_s20 = sld [smem:[#allocation3 + $0x701]] }
 0x11d   : > { %v665_v0 = vpop.permute.xlu1 %664  ;;  %v663_v3 = vpop.permute.xlu0 %662 }
 0x11e   : > { %v669_v26 = vadd.f32 %v665_v0, %v655_v16  ;;  %v668_v27 = vadd.f32 %v663_v3, %v654_v60  ;;  %v2393_v0 = vld [vmem:[%s1971_s18 + $0x1c] sm:$0xff] }
 0x11f   : > { %1103 = vrot.lane.b32.xlu1 %v1098_v55, %s1865_s7  ;;  %1101 = vrot.lane.b32.xlu0 %v1097_v56, %s1865_s7 }
 0x121   : > { %v679_v12 = vpop.permute.xlu1 %678  ;;  %v677_v14 = vpop.permute.xlu0 %676 }
 0x122   : > { %v683_v30 = vadd.f32 %v679_v12, %v669_v26  ;;  %v682_v32 = vadd.f32 %v677_v14, %v668_v27  ;;  %v1226_v14 = vmul.f32 %v2389_v61, %v1224_v9 }
 0x123   : > { %1125 = vrot.lane.b32.xlu1 %v1120_v7, %s1861_s25  ;;  %1123 = vrot.lane.b32.xlu0 %v1119_v8, %s1861_s25  ;;  %v1212_v7 = vmul.f32 %v2389_v61, %v1210_v22  ;;  %v1211_v8 = vmul.f32 %v2393_v0, %v1210_v22  ;;  %v1316_v22 = vstv %s2423_s9  ;;  %s1704_s9 = sshll.u32 %s1913_s2, 8 }
 0x125   : > { %v693_v46 = vpop.permute.xlu1 %692  ;;  %v691_v19 = vpop.permute.xlu0 %690 }
 0x126   : > { %v697_v20 = vadd.f32 %v693_v46, %v683_v30  ;;  %v696_v35 = vadd.f32 %v691_v19, %v682_v32  ;;  %v1266_v32 = vstv %s1679_s29  ;;  %s1696_s29 = sld [smem:[#allocation3 + $0x704]] }
 0x127   : > { %1139 = vrot.lane.b32.xlu1 %v1134_v44, %s1860_s21  ;;  %1137 = vrot.lane.b32.xlu0 %v1133_v15, %s1860_s21  ;;  %v1225_v44 = vmul.f32 %v2393_v0, %v1224_v9  ;;  %v1238_v15 = vstv %s1677_s26  ;;  %v1268_v37 = vmul.f32 %v2389_v61, %v1266_v32  ;;  %v1330_v9 = vstv %s1686_s10  ;;  %s1694_s26 = sld [smem:[#allocation3 + $0x702]] }
 0x128   : > { %v1240_v19 = vmul.f32 %v2389_v61, %v1238_v15 }
 0x129   : > { %v707_v28 = vpop.permute.xlu1 %706  ;;  %v705_v29 = vpop.permute.xlu0 %704 }
 0x12a   : > { %v711_v43 = vadd.f32 %v707_v28, %v697_v20  ;;  %v710_v45 = vadd.f32 %v705_v29, %v696_v35  ;;  %v836_v20 = vstv %s1638_s4  ;;  %s1698_s4 = sld [smem:[#allocation3 + $0x706]] }
 0x12b   : > { %1153 = vrot.lane.b32.xlu1 %v1148_v23, %s1862_s28  ;;  %1151 = vrot.lane.b32.xlu0 %v1147_v25, %s1862_s28  ;;  %v1239_v23 = vmul.f32 %v2393_v0, %v1238_v15  ;;  %v1252_v25 = vstv %s1678_s27  ;;  %v1344_v15 = vstv %s1687_s11  ;;  %s1695_s27 = sld [smem:[#allocation3 + $0x703]] }
 0x12c   : > { %v1254_v29 = vmul.f32 %v2389_v61, %v1252_v25  ;;  %v1253_v30 = vmul.f32 %v2393_v0, %v1252_v25  ;;  %v1358_v25 = vstv %s1688_s12 }
 0x12d   : > { %v721_v39 = vpop.permute.xlu1 %720  ;;  %v719_v41 = vpop.permute.xlu0 %718 }
 0x12e   : > { %v725_v50 = vadd.f32 %v721_v39, %v711_v43  ;;  %v724_v51 = vadd.f32 %v719_v41, %v710_v45  ;;  %v1267_v39 = vmul.f32 %v2393_v0, %v1266_v32  ;;  %v838_v41 = vmul.f32 %v2211_v31, %v836_v20 }
 0x12f   : > { %1167 = vrot.lane.b32.xlu1 %v1162_v33, %s1863_s30  ;;  %1165 = vrot.lane.b32.xlu0 %v1161_v34, %s1863_s30  ;;  %v837_v43 = vmul.f32 %v2215_v42, %v836_v20  ;;  %v1280_v45 = vstv %s2408_s6  ;;  %v1302_v42 = vstv %s2414_s8  ;;  %s178_s6 = sand.u32 1, %s1847_s15  }
 0x130   : > { %v2474_v20 = vld [vmem:[%s1971_s18 + $0x26] sm:$0xff]  ;;  %s1586_s8 = sshll.u32 %s178_s6, 4 }
 0x131   : > { %v735_v53 = vpop.permute.xlu1 %734  ;;  %v733_v54 = vpop.permute.xlu0 %732  ;;  %s180_s10 = scalar_lea.vmem [#allocation6], %s1586_s8 }
 0x132   : > { %v739_v55 = vadd.f32 %v735_v53, %v725_v50  ;;  %v738_v56 = vadd.f32 %v733_v54, %v724_v51  ;;  %v1282_v51 = vmul.f32 %v2389_v61, %v1280_v45  ;;  %v2430_v53 = vld [vmem:[%s1971_s18 + $0x25] sm:$0xff]  ;;  %v2434_v54 = vld [vmem:[%s1971_s18 + $0x1d] sm:$0xff]  ;;  %s1506_s11 = sshll.u32 %s180_s10, 4  ;;  %s2536_s11 = int_to_ptr.vmem [resolvable:$true] %s1506_s11 }
 0x133   : > { %1181 = vrot.lane.b32.xlu1 %v1176_v48, %s1864_s5  ;;  %1179 = vrot.lane.b32.xlu0 %v1175_v49, %s1864_s5  ;;  %s1789_s2 = scalar_lea.vmem %s2536_s11, 256 }
 0x134   : > { %v747_v57 = vadd.f32 %v745_v47, %v739_v55  ;;  %v746_v58 = vadd.f32 %v744_v52, %v738_v56  ;;  %v1281_v52 = vmul.f32 %v2393_v0, %v1280_v45  ;;  %v1408_v45 = vstv %s1694_s26  ;;  %s2538_s26 = scalar_lea.sflag [#allocation4], %s178_s6  ;;  %p1790_p9 = scmp.ne.s32.totalorder %s2536_s11, %s1789_s2 }
 0x135   : > { %v757_v3 = vpop.permute.xlu1 %756  ;;  %v755_v4 = vpop.permute.xlu0 %754 }
 0x136   : > { %v761_v5 = vadd.f32 %v757_v3, %v747_v57  ;;  %v760_v6 = vadd.f32 %v755_v4, %v746_v58  ;;  %v1304_v57 = vmul.f32 %v2430_v53, %v1302_v42  ;;  %v1303_v58 = vmul.f32 %v2434_v54, %v1302_v42  ;;  %p1791_p10 = pnand %p1790_p9, %p1930_p5 }
 0x137   : > { %1195 = vrot.lane.b32.xlu1 %v1190_v38, %s1865_s7  ;;  %1193 = vrot.lane.b32.xlu0 %v1189_v1, %s1865_s7 }
 0x138   : > { %p1792_p12 = pneg %p1791_p10 }
 0x139   : > { %v771_v18 = vpop.permute.xlu1 %770  ;;  %v769_v10 = vpop.permute.xlu0 %768 }
 0x13a   : > { %v775_v11 = vadd.f32 %v771_v18, %v761_v5  ;;  %v774_v12 = vadd.f32 %v769_v10, %v760_v6 }
 0x13b   : > { %1217 = vrot.lane.b32.xlu1 %v1212_v7, %s1861_s25  ;;  %1215 = vrot.lane.b32.xlu0 %v1211_v8, %s1861_s25  ;;  %v1318_v7 = vmul.f32 %v2430_v53, %v1316_v22  ;;  %v1317_v8 = vmul.f32 %v2434_v54, %v1316_v22 }
 0x13d   : > { %v785_v16 = vpop.permute.xlu1 %784  ;;  %v783_v60 = vpop.permute.xlu0 %782 }
 0x13e   : > { %v789_v17 = vadd.f32 %v785_v16, %v775_v11  ;;  %v788_v46 = vadd.f32 %v783_v60, %v774_v12 }
 0x13f   : > { %1231 = vrot.lane.b32.xlu1 %v1226_v14, %s1860_s21  ;;  %1229 = vrot.lane.b32.xlu0 %v1225_v44, %s1860_s21  ;;  %v1332_v14 = vmul.f32 %v2430_v53, %v1330_v9  ;;  %v1331_v44 = vmul.f32 %v2434_v54, %v1330_v9 }
 0x141   : > { %v799_v26 = vpop.permute.xlu1 %798  ;;  %v797_v27 = vpop.permute.xlu0 %796 }
 0x142   : > { %v803_v40 = vadd.f32 %v799_v26, %v789_v17  ;;  %v802_v28 = vadd.f32 %v797_v27, %v788_v46 }
 0x143   : > { %1245 = vrot.lane.b32.xlu1 %v1240_v19, %s1862_s28  ;;  %1243 = vrot.lane.b32.xlu0 %v1239_v23, %s1862_s28  ;;  %v1346_v19 = vmul.f32 %v2430_v53, %v1344_v15  ;;  %v1345_v23 = vmul.f32 %v2434_v54, %v1344_v15 }
 0x145   : > { %v813_v33 = vpop.permute.xlu1 %812  ;;  %v811_v34 = vpop.permute.xlu0 %810 }
 0x146   : > { %v817_v35 = vadd.f32 %v813_v33, %v803_v40  ;;  %v816_v36 = vadd.f32 %v811_v34, %v802_v28  ;;  %v1360_v40 = vmul.f32 %v2430_v53, %v1358_v25  ;;  %v1359_v28 = vmul.f32 %v2434_v54, %v1358_v25 }
 0x147   : > { %1259 = vrot.lane.b32.xlu1 %v1254_v29, %s1863_s30  ;;  %1257 = vrot.lane.b32.xlu0 %v1253_v30, %s1863_s30  ;;  %v1372_v29 = vstv %s1689_s13 }
 0x148   : > { %v1374_v33 = vmul.f32 %v2430_v53, %v1372_v29  ;;  %v1373_v34 = vmul.f32 %v2434_v54, %v1372_v29 }
 0x149   : > { %v827_v47 = vpop.permute.xlu1 %826  ;;  %v825_v48 = vpop.permute.xlu0 %824 }
 0x14a   : > { %v831_v49 = vadd.f32 %v827_v47, %v817_v35  ;;  %v830_v50 = vadd.f32 %v825_v48, %v816_v36  ;;  %v1394_v35 = vstv %s1693_s20  ;;  %v2477_v36 = vld [vmem:[%s1971_s18 + $0x1e] sm:$0xff]  ;;  %s1697_s18 = sld [smem:[#allocation3 + $0x705]]  ;;  %s2534_s20 = scalar_lea.hbm %s2582_s3, %s1704_s9 }
 0x14b   : > { %1273 = vrot.lane.b32.xlu1 %v1268_v37, %s1864_s5  ;;  %1271 = vrot.lane.b32.xlu0 %v1267_v39, %s1864_s5 }
 0x14c   : > { %v840_v31 = vadd.f32 %v838_v41, %v831_v49  ;;  %v839_v2 = vadd.f32 %v837_v43, %v830_v50  ;;  %v1396_v41 = vmul.f32 %v2474_v20, %v1394_v35  ;;  %v1395_v43 = vmul.f32 %v2477_v36, %v1394_v35 }
 0x14d   : > { %v850_v55 = vpop.permute.xlu1 %849  ;;  %v848_v56 = vpop.permute.xlu0 %847  ;;  %v1410_v49 = vmul.f32 %v2474_v20, %v1408_v45  ;;  %v1409_v50 = vmul.f32 %v2477_v36, %v1408_v45 }
 0x14e   : > { %v854_v38 = vadd.f32 %v850_v55, %v840_v31  ;;  %v853_v1 = vadd.f32 %v848_v56, %v839_v2  ;;  %v1436_v55 = vstv %s1696_s29 }
 0x14f   : > { %1287 = vrot.lane.b32.xlu1 %v1282_v51, %s1865_s7  ;;  %1285 = vrot.lane.b32.xlu0 %v1281_v52, %s1865_s7  ;;  %v1422_v51 = vstv %s1695_s27  ;;  %s1866_s27 = smov [#allocation6]  }
 0x150   : > { %v1424_v2 = vmul.f32 %v2474_v20, %v1422_v51  ;;  %v1423_v42 = vmul.f32 %v2477_v36, %v1422_v51  ;;  %s1793_s29 = sshll.u32 %s1866_s27, 4  ;;  %s1794_s29 = int_to_ptr.vmem [resolvable:$false] %s1793_s29 }
 0x151   : > { %v864_v3 = vpop.permute.xlu1 %863  ;;  %v862_v4 = vpop.permute.xlu0 %861  ;;  %p1796_p13 = scmp.lt.s32.totalorder %s2536_s11, %s1794_s29 }
 0x152   : > { %v868_v5 = vadd.f32 %v864_v3, %v854_v38  ;;  %v867_v6 = vadd.f32 %v862_v4, %v853_v1  ;;  %v1438_v1 = vmul.f32 %v2474_v20, %v1436_v55 }
 0x153   : > { %1309 = vrot.lane.b32.xlu1 %v1304_v57, %s1861_s25  ;;  %1307 = vrot.lane.b32.xlu0 %v1303_v58, %s1861_s25  ;;  %v1437_v57 = vmul.f32 %v2477_v36, %v1436_v55  ;;  %v1450_v58 = vstv %s1697_s18  ;;  %s1795_s18 = scalar_lea.vmem %s1794_s29, 512 }
 0x154   : > { %v1452_v4 = vmul.f32 %v2474_v20, %v1450_v58  ;;  %p1797_p0 = scmp.lt.s32.totalorder %s1795_s18, %s1789_s2 }
 0x155   : > { %v878_v18 = vpop.permute.xlu1 %877  ;;  %v876_v10 = vpop.permute.xlu0 %875 }
 0x156   : > { %v882_v11 = vadd.f32 %v878_v18, %v868_v5  ;;  %v881_v12 = vadd.f32 %v876_v10, %v867_v6  ;;  %v1451_v5 = vmul.f32 %v2477_v36, %v1450_v58  ;;  %v1464_v6 = vstv %s1698_s4  ;;  %p1798_p1 = por %p1797_p0, %p1796_p13 }
 0x157   : > { %1323 = vrot.lane.b32.xlu1 %v1318_v7, %s1860_s21  ;;  %1321 = vrot.lane.b32.xlu0 %v1317_v8, %s1860_s21  ;;  %v1466_v9 = vmul.f32 %v2474_v20, %v1464_v6  ;;  %v1465_v18 = vmul.f32 %v2477_v36, %v1464_v6 }
 0x158   : > { %p1799_p2 = pnand %p1798_p1, %p1792_p12 }
 0x159   : > { %v892_v16 = vpop.permute.xlu1 %891  ;;  %v890_v60 = vpop.permute.xlu0 %889 }
 0x15a   : > { %v2449_v17 = vadd.f32 %v892_v16, %v882_v11  ;;  %v2451_v46 = vadd.f32 %v890_v60, %v881_v12 }
 0x15b   : > { %1337 = vrot.lane.b32.xlu1 %v1332_v14, %s1862_s28  ;;  %1335 = vrot.lane.b32.xlu0 %v1331_v44, %s1862_s28 }
 0x15d   : > { %v2457_v26 = vpop.permute.xlu1 %905  ;;  %v2459_v27 = vpop.permute.xlu0 %903 }
 0x15e   : > { %v910_v15 = vadd.f32 %v2457_v26, %v2449_v17  ;;  %v909_v16 = vadd.f32 %v2459_v27, %v2451_v46 }
 0x15f   : > { %1351 = vrot.lane.b32.xlu1 %v1346_v19, %s1863_s30  ;;  %1349 = vrot.lane.b32.xlu0 %v1345_v23, %s1863_s30 }
 0x161   : > { %v2465_v30 = vpop.permute.xlu1 %919  ;;  %v2467_v32 = vpop.permute.xlu0 %917 }
 0x162   : > { %v924_v25 = vadd.f32 %v2465_v30, %v910_v15 }
 0x163   : > { %1365 = vrot.lane.b32.xlu1 %v1360_v40, %s1864_s5  ;;  %1363 = vrot.lane.b32.xlu0 %v1359_v28, %s1864_s5  ;;  %v923_v28 = vadd.f32 %v2467_v32, %v909_v16 }
 0x165   : > { %v2479_v37 = vpop.permute.xlu1 %941  ;;  %v2481_v39 = vpop.permute.xlu0 %939 }
 0x167   : > { %1379 = vrot.lane.b32.xlu1 %v1374_v33, %s1865_s7  ;;  %1377 = vrot.lane.b32.xlu0 %v1373_v34, %s1865_s7 }
 0x169   : > { %v956_v47 = vpop.permute.xlu1 %955  ;;  %v954_v48 = vpop.permute.xlu0 %953 }
 0x16b   : > { %1401 = vrot.lane.b32.xlu1 %v1396_v41, %s1861_s25  ;;  %1399 = vrot.lane.b32.xlu0 %v1395_v43, %s1861_s25  ;;  %s1656_s25 = sld [smem:[#allocation3 + $0x500]] }
 0x16d   : > { %v970_v52 = vpop.permute.xlu1 %969  ;;  %v968_v31 = vpop.permute.xlu0 %967 }
 0x16f   : > { %1415 = vrot.lane.b32.xlu1 %v1410_v49, %s1860_s21  ;;  %1413 = vrot.lane.b32.xlu0 %v1409_v50, %s1860_s21  ;;  %s1647_s21 = sld [smem:[#allocation3 + $0x480]] }
 0x171   : > { %v984_v56 = vpop.permute.xlu1 %983  ;;  %v982_v38 = vpop.permute.xlu0 %981  ;;  %v1020_v32 = vstv %s1656_s25 }
 0x173   : > { %1429 = vrot.lane.b32.xlu1 %v1424_v2, %s1862_s28  ;;  %1427 = vrot.lane.b32.xlu0 %v1423_v42, %s1862_s28  ;;  %s1665_s28 = sld [smem:[#allocation3 + $0x580]] }
 0x175   : > { %v998_v22 = vpop.permute.xlu1 %997  ;;  %v996_v3 = vpop.permute.xlu0 %995  ;;  %v928_v44 = vstv %s1647_s21 }
 0x176   : > { %v930_v23 = vmul.f32 %v2255_v24, %v928_v44  ;;  %v929_v40 = vmul.f32 %v2259_v62, %v928_v44 }
 0x177   : > { %1443 = vrot.lane.b32.xlu1 %v1438_v1, %s1863_s30  ;;  %1441 = vrot.lane.b32.xlu0 %v1437_v57, %s1863_s30  ;;  %v1022_v1 = vmul.f32 %v2299_v13, %v1020_v32  ;;  %s1674_s30 = sld [smem:[#allocation3 + $0x600]] }
 0x178   : > { %v932_v34 = vadd.f32 %v930_v23, %v924_v25  ;;  %v931_v35 = vadd.f32 %v929_v40, %v923_v28 }
 0x179   : > { %v1012_v7 = vpop.permute.xlu1 %1011  ;;  %v1010_v8 = vpop.permute.xlu0 %1009 }
 0x17a   : > { %v946_v26 = vadd.f32 %v2479_v37, %v932_v34  ;;  %v945_v46 = vadd.f32 %v2481_v39, %v931_v35  ;;  %v1021_v37 = vmul.f32 %v2303_v21, %v1020_v32 }
 0x17b   : > { %1457 = vrot.lane.b32.xlu1 %v1452_v4, %s1864_s5  ;;  %1455 = vrot.lane.b32.xlu0 %v1451_v5, %s1864_s5  ;;  %s1683_s5 = sld [smem:[#allocation3 + $0x680]] }
 0x17c   : > { %v960_v27 = vadd.f32 %v956_v47, %v946_v26  ;;  %v959_v43 = vadd.f32 %v954_v48, %v945_v46 }
 0x17d   : > { %v1034_v10 = vpop.permute.xlu1 %1033  ;;  %v1032_v11 = vpop.permute.xlu0 %1031 }
 0x17e   : > { %v974_v30 = vadd.f32 %v970_v52, %v960_v27  ;;  %v973_v49 = vadd.f32 %v968_v31, %v959_v43 }
 0x17f   : > { %1471 = vrot.lane.b32.xlu1 %v1466_v9, %s1865_s7  ;;  %1469 = vrot.lane.b32.xlu0 %v1465_v18, %s1865_s7  ;;  %s1692_s7 = sld [smem:[#allocation3 + $0x700]] }
 0x180   : > { %v988_v62 = vadd.f32 %v984_v56, %v974_v30  ;;  %v987_v50 = vadd.f32 %v982_v38, %v973_v49 }
 0x181   : > { %v1048_v12 = vpop.permute.xlu1 %1047  ;;  %v1046_v14 = vpop.permute.xlu0 %1045 }
 0x182   : > { %v1002_v42 = vadd.f32 %v998_v22, %v988_v62  ;;  %v1001_v55 = vadd.f32 %v996_v3, %v987_v50 }
 0x184   : > { %v1016_v57 = vadd.f32 %v1012_v7, %v1002_v42  ;;  %v1015_v58 = vadd.f32 %v1010_v8, %v1001_v55  ;;  %v1112_v8 = vstv %s1665_s28 }
 0x185   : > { %v1062_v60 = vpop.permute.xlu1 %1061  ;;  %v1060_v19 = vpop.permute.xlu0 %1059 }
 0x186   : > { %v1024_v48 = vadd.f32 %v1022_v1, %v1016_v57  ;;  %v1023_v4 = vadd.f32 %v1021_v37, %v1015_v58 }
 0x188   : > { %v1038_v31 = vadd.f32 %v1034_v10, %v1024_v48  ;;  %v1037_v56 = vadd.f32 %v1032_v11, %v1023_v4  ;;  %v1114_v10 = vmul.f32 %v2337_v59, %v1112_v8  ;;  %v1113_v11 = vmul.f32 %v2341_v63, %v1112_v8 }
 0x189   : > { %v1076_v29 = vpop.permute.xlu1 %1075  ;;  %v1074_v33 = vpop.permute.xlu0 %1073  ;;  %v1204_v59 = vstv %s1674_s30 }
 0x18a   : > { %v1052_v9 = vadd.f32 %v1048_v12, %v1038_v31  ;;  %v1051_v22 = vadd.f32 %v1046_v14, %v1037_v56  ;;  %v1206_v42 = vmul.f32 %v2389_v61, %v1204_v59 }
 0x18c   : > { %v1066_v3 = vadd.f32 %v1062_v60, %v1052_v9  ;;  %v1065_v18 = vadd.f32 %v1060_v19, %v1051_v22 }
 0x18d   : > { %v1090_v41 = vpop.permute.xlu1 %1089  ;;  %v1088_v17 = vpop.permute.xlu0 %1087 }
 0x18e   : > { %v1080_v44 = vadd.f32 %v1076_v29, %v1066_v3  ;;  %v1079_v21 = vadd.f32 %v1074_v33, %v1065_v18 }
 0x190   : > { %v1094_v15 = vadd.f32 %v1090_v41, %v1080_v44  ;;  %v1093_v16 = vadd.f32 %v1088_v17, %v1079_v21 }
 0x191   : > { %v1104_v24 = vpop.permute.xlu1 %1103  ;;  %v1102_v45 = vpop.permute.xlu0 %1101 }
 0x192   : > { %v1108_v40 = vadd.f32 %v1104_v24, %v1094_v15  ;;  %v1107_v28 = vadd.f32 %v1102_v45, %v1093_v16 }
 0x194   : > { %v1116_v14 = vadd.f32 %v1114_v10, %v1108_v40  ;;  %v1115_v60 = vadd.f32 %v1113_v11, %v1107_v28 }
 0x195   : > { %v1126_v51 = vpop.permute.xlu1 %1125  ;;  %v1124_v2 = vpop.permute.xlu0 %1123 }
 0x196   : > { %v1130_v29 = vadd.f32 %v1126_v51, %v1116_v14  ;;  %v1129_v33 = vadd.f32 %v1124_v2, %v1115_v60  ;;  %v1205_v51 = vmul.f32 %v2393_v0, %v1204_v59  ;;  %v1296_v0 = vstv %s1683_s5 }
 0x197   : > { %v1298_v21 = vmul.f32 %v2430_v53, %v1296_v0  ;;  %v1297_v8 = vmul.f32 %v2434_v54, %v1296_v0  ;;  %v1388_v53 = vstv %s1692_s7 }
 0x199   : > { %v1140_v39 = vpop.permute.xlu1 %1139  ;;  %v1138_v47 = vpop.permute.xlu0 %1137 }
 0x19a   : > { %v1144_v26 = vadd.f32 %v1140_v39, %v1130_v29  ;;  %v1143_v41 = vadd.f32 %v1138_v47, %v1129_v33 }
 0x19d   : > { %v1154_v5 = vpop.permute.xlu1 %1153  ;;  %v1152_v52 = vpop.permute.xlu0 %1151 }
 0x19e   : > { %v1158_v27 = vadd.f32 %v1154_v5, %v1144_v26  ;;  %v1157_v43 = vadd.f32 %v1152_v52, %v1143_v41 }
 0x1a1   : > { %v1168_v38 = vpop.permute.xlu1 %1167  ;;  %v1166_v6 = vpop.permute.xlu0 %1165 }
 0x1a2   : > { %v1172_v24 = vadd.f32 %v1168_v38, %v1158_v27  ;;  %v1171_v45 = vadd.f32 %v1166_v6, %v1157_v43  ;;  %v1390_v43 = vmul.f32 %v2474_v20, %v1388_v53 }
 0x1a5   : > { %v1182_v13 = vpop.permute.xlu1 %1181  ;;  %v1180_v7 = vpop.permute.xlu0 %1179 }
 0x1a6   : > { %v1186_v49 = vadd.f32 %v1182_v13, %v1172_v24  ;;  %v1185_v62 = vadd.f32 %v1180_v7, %v1171_v45  ;;  %v1389_v24 = vmul.f32 %v2477_v36, %v1388_v53 }
 0x1a9   : > { %v1196_v23 = vpop.permute.xlu1 %1195  ;;  %v1194_v25 = vpop.permute.xlu0 %1193 }
 0x1aa   : > { %v1200_v50 = vadd.f32 %v1196_v23, %v1186_v49  ;;  %v1199_v32 = vadd.f32 %v1194_v25, %v1185_v62 }
 0x1ac   : > { %v1208_v1 = vadd.f32 %v1206_v42, %v1200_v50  ;;  %v1207_v57 = vadd.f32 %v1205_v51, %v1199_v32 }
 0x1ad   : > { %v1218_v34 = vpop.permute.xlu1 %1217  ;;  %v1216_v12 = vpop.permute.xlu0 %1215 }
 0x1ae   : > { %v1222_v39 = vadd.f32 %v1218_v34, %v1208_v1  ;;  %v1221_v47 = vadd.f32 %v1216_v12, %v1207_v57 }
 0x1b1   : > { %v1232_v19 = vpop.permute.xlu1 %1231  ;;  %v1230_v35 = vpop.permute.xlu0 %1229 }
 0x1b2   : > { %v1236_v5 = vadd.f32 %v1232_v19, %v1222_v39  ;;  %v1235_v52 = vadd.f32 %v1230_v35, %v1221_v47 }
 0x1b5   : > { %v1246_v17 = vpop.permute.xlu1 %1245  ;;  %v1244_v46 = vpop.permute.xlu0 %1243 }
 0x1b6   : > { %v1250_v31 = vadd.f32 %v1246_v17, %v1236_v5  ;;  %v1249_v56 = vadd.f32 %v1244_v46, %v1235_v52 }
 0x1b9   : > { %v1260_v30 = vpop.permute.xlu1 %1259  ;;  %v1258_v63 = vpop.permute.xlu0 %1257 }
 0x1ba   : > { %v1264_v61 = vadd.f32 %v1260_v30, %v1250_v31  ;;  %v1263_v9 = vadd.f32 %v1258_v63, %v1249_v56 }
 0x1bd   : > { %v1274_v2 = vpop.permute.xlu1 %1273  ;;  %v1272_v55 = vpop.permute.xlu0 %1271 }
 0x1be   : > { %v1278_v22 = vadd.f32 %v1274_v2, %v1264_v61  ;;  %v1277_v3 = vadd.f32 %v1272_v55, %v1263_v9 }
 0x1c1   : > { %v1288_v37 = vpop.permute.xlu1 %1287  ;;  %v1286_v58 = vpop.permute.xlu0 %1285 }
 0x1c2   : > { %v1292_v7 = vadd.f32 %v1288_v37, %v1278_v22  ;;  %v1291_v44 = vadd.f32 %v1286_v58, %v1277_v3 }
 0x1c4   : > { %v1300_v23 = vadd.f32 %v1298_v21, %v1292_v7  ;;  %v1299_v25 = vadd.f32 %v1297_v8, %v1291_v44 }
 0x1c5   : > { %v1310_v48 = vpop.permute.xlu1 %1309  ;;  %v1308_v4 = vpop.permute.xlu0 %1307 }
 0x1c6   : > { %v1314_v10 = vadd.f32 %v1310_v48, %v1300_v23  ;;  %v1313_v11 = vadd.f32 %v1308_v4, %v1299_v25 }
 0x1c9   : > { %v1324_v38 = vpop.permute.xlu1 %1323  ;;  %v1322_v6 = vpop.permute.xlu0 %1321 }
 0x1ca   : > { %v1328_v34 = vadd.f32 %v1324_v38, %v1314_v10  ;;  %v1327_v12 = vadd.f32 %v1322_v6, %v1313_v11 }
 0x1cd   : > { %v1338_v18 = vpop.permute.xlu1 %1337  ;;  %v1336_v13 = vpop.permute.xlu0 %1335 }
 0x1ce   : > { %v1342_v19 = vadd.f32 %v1338_v18, %v1328_v34  ;;  %v1341_v35 = vadd.f32 %v1336_v13, %v1327_v12 }
 0x1d1   : > { %v1352_v15 = vpop.permute.xlu1 %1351  ;;  %v1350_v16 = vpop.permute.xlu0 %1349 }
 0x1d2   : > { %v1356_v29 = vadd.f32 %v1352_v15, %v1342_v19  ;;  %v1355_v33 = vadd.f32 %v1350_v16, %v1341_v35 }
 0x1d5   : > { %v1366_v40 = vpop.permute.xlu1 %1365  ;;  %v1364_v28 = vpop.permute.xlu0 %1363 }
 0x1d6   : > { %v1370_v41 = vadd.f32 %v1366_v40, %v1356_v29  ;;  %v1369_v17 = vadd.f32 %v1364_v28, %v1355_v33 }
 0x1d9   : > { %v1380_v14 = vpop.permute.xlu1 %1379  ;;  %v1378_v60 = vpop.permute.xlu0 %1377 }
 0x1da   : > { %v1384_v46 = vadd.f32 %v1380_v14, %v1370_v41  ;;  %v1383_v27 = vadd.f32 %v1378_v60, %v1369_v17 }
 0x1dc   : > { %v1392_v30 = vadd.f32 %v1390_v43, %v1384_v46  ;;  %v1391_v63 = vadd.f32 %v1389_v24, %v1383_v27 }
 0x1dd   : > { %v1402_v26 = vpop.permute.xlu1 %1401  ;;  %v1400_v54 = vpop.permute.xlu0 %1399 }
 0x1de   : > { %v1406_v50 = vadd.f32 %v1402_v26, %v1392_v30  ;;  %v1405_v32 = vadd.f32 %v1400_v54, %v1391_v63 }
 0x1e1   : > { %v1416_v45 = vpop.permute.xlu1 %1415  ;;  %v1414_v59 = vpop.permute.xlu0 %1413 }
 0x1e2   : > { %v1420_v2 = vadd.f32 %v1416_v45, %v1406_v50  ;;  %v1419_v55 = vadd.f32 %v1414_v59, %v1405_v32 }
 0x1e5   : > { %v1430_v49 = vpop.permute.xlu1 %1429  ;;  %v1428_v62 = vpop.permute.xlu0 %1427 }
 0x1e6   : > { %v1434_v1 = vadd.f32 %v1430_v49, %v1420_v2  ;;  %v1433_v57 = vadd.f32 %v1428_v62, %v1419_v55 }
 0x1e9   : > { %v1444_v42 = vpop.permute.xlu1 %1443  ;;  %v1442_v51 = vpop.permute.xlu0 %1441 }
 0x1ea   : > { %v1448_v20 = vadd.f32 %v1444_v42, %v1434_v1  ;;  %v1447_v39 = vadd.f32 %v1442_v51, %v1433_v57 }
 0x1ed   : > { %v1458_v37 = vpop.permute.xlu1 %1457  ;;  %v1456_v58 = vpop.permute.xlu0 %1455 }
 0x1ee   : > { %v1462_v36 = vadd.f32 %v1458_v37, %v1448_v20  ;;  %v1461_v47 = vadd.f32 %v1456_v58, %v1447_v39 }
 0x1f1   : > { %v1472_v48 = vpop.permute.xlu1 %1471  ;;  %v1470_v4 = vpop.permute.xlu0 %1469 }
 0x1f2   : > { %v1476_v5 = vadd.f32 %v1472_v48, %v1462_v36  ;;  %v1475_v52 = vadd.f32 %v1470_v4, %v1461_v47 }
 0x1f4   : > { %v1478_v31 = vsub.f32 0.0, %v1476_v5  ;;  %v1477_v56 = vsub.f32 0.0, %v1475_v52 }
 0x1f6   : > { %v1481_v38 = vmul.f32 1.442695, %v1478_v31  ;;  %v1479_v6 = vmul.f32 1.442695, %v1477_v56 }
 0x1f8   : > { %1766 = vpow2.f32 %v1481_v38 }
 0x1f9   : > { %1768 = vpow2.f32 %v1479_v6 }
 0x202   : > { %v1767_v61 = vpop.eup %1766 }
 0x203   : > { %v1769_v9 = vpop.eup %1768  ;;  %v1484_v0 = vadd.f32 1.0, %v1767_v61 }
 0x204   : > { %v1483_v22 = vadd.f32 1.0, %v1769_v9 }
 0x205   : > { %1770 = vrcp.f32 %v1484_v0 }
 0x206   : > { %1772 = vrcp.f32 %v1483_v22 }
 0x20f   : > { %v1771_v3 = vpop.eup %1770 }
 0x210   : > { %v1773_v18 = vpop.eup %1772  ;;  %1491 = vst.msk [vmem:[%s180_s10 + $0x8] sm:$0xff] %vm1489_vm0, %v1771_v3 }
 0x211   : > { %1490 = vst.msk [vmem:[%s180_s10] sm:$0xff] %vm1489_vm0, %v1773_v18 }
 0x212   : > { %1802 = shalt.err (!%p1799_p2)
}
 0x213   : > { %s1803_s4 = scalar_lea.hbm %s2534_s20, 256  ;;  %s1807_s28 = scalar_lea.hbm %s2582_s3, 512 }
 0x214   : > { %p1804_p3 = scmp.ne.s32.totalorder %s2534_s20, %s1803_s4  ;;  %p1808_p8 = scmp.lt.u32.totalorder %s2534_s20, %s2582_s3 }
 0x215   : > { %p1809_p11 = scmp.lt.u32.totalorder %s1807_s28, %s1803_s4  ;;  %p1811_p10 = scmp.lt.u32.totalorder %s1803_s4, %s2534_s20 }
 0x216   : > { %p1805_p4 = pnand %p1804_p3, %p1930_p5 }
 0x217   : > { %p1810_p9 = por %p1809_p11, %p1808_p8 }
 0x218   : > { %p1806_p7 = pneg %p1805_p4 }
 0x219   : > { %p1812_p12 = por %p1811_p10, %p1810_p9 }
 0x21b   : > { %p1813_p13 = pnand %p1812_p12, %p1806_p7 }
 0x21d   : > { %1816 = shalt.err (!%p1813_p13)
}
 0x21e   : > { %s1867_s7 = smov 128   ;;  %s1868_s6 = smov 8  }
 0x21f   : > { %1710 = dma.vmem_to_hbm [thread:$0]  (%p1930_p5), %s2536_s11, 256, %s2534_s20, %s2538_s26, %s1867_s7, %s1867_s7, %s1868_s6  }
 0x220 PF: > { %p1722_p0 = scmp.ge.s32.totalorder %s1855_s17, 2  ;;  %s1521_s8 = sand.u32 1, %s1843_s14  }
 0x221   : > { %s1522_s9 = scalar_lea.sflag [#allocation4], %s1521_s8 }
 0x222   : > { %p1717_p1 = pnand %p1722_p0, %p1934_p6 }
 0x224   : > { %1838 = dma.done.wait (!%p1717_p1), %s1522_s9, 256  }
 0x225   : > { %1840 = vsyncadd (!%p1717_p1), %s1522_s9, 4294967040  ;;  %p15_p2 = scmp.ge.s32.totalorder %s1917_s19, 4   ;;  %s2587_s14 = smov %s1847_s15 }
 0x226   : > { %s2588_s15 = smov %s1851_s16  ;;  %s2589_s16 = smov %s1928_s22 }
 0x227   : > { %s2590_s17 = smov %s1917_s19  ;;  %17 = sbr.rel (!%p15_p2) target bundleno = 6 (0x6), region = 73 }
 0x22e   :  { %1527 = vsyncpa [#allocation4], 1 }
 0x22f   :  { %1529 = vsyncpa [#allocation4 + $0x1], 1 }
 0x230   :  { %1530 = vsyncpa [#allocation5], 1 }
 0x231   :  { %1532 = vsyncpa [#allocation5 + $0x1], 1 }

</bundles_post_ra>
